<compile_context>
chip_gen: v5e
topology: v5e:2x2
jax: 0.10.0
libtpu: 0.0.40
codegen_flags: <defaults>
</compile_context>

<pallas_src>
import functools

import jax
import jax.numpy as jnp
import numpy as np
from jax.experimental import pallas as pl
from jax.experimental.pallas import tpu as pltpu


# ----------------------------------------------------------------------------
# Pallas kernel: one grid step = P packed groups = P*G graphs, all T
# transformations and all L layers (T folded into the 128-wide lane axis).
# ----------------------------------------------------------------------------
def _ocgtl_kernel(*refs, num_trans, num_layers, hidden_dim,
                  graphs_per_group, nodes_per_graph, groups_per_step):
    if num_layers > 1:
        (x_ref, adj_ref, w1f_ref, w1r_ref, b1_ref, w2_ref, b2_ref,
         center_ref, out_ref) = refs
    else:  # no w1_r operand when there is a single GIN layer
        (x_ref, adj_ref, w1f_ref, b1_ref, w2_ref, b2_ref,
         center_ref, out_ref) = refs
        w1r_ref = None

    T, L, H = num_trans, num_layers, hidden_dim
    G, N, P = graphs_per_group, nodes_per_graph, groups_per_step
    GN = G * N
    TH = T * H
    rows = P * GN
    cdt = w2_ref.dtype                      # MXU operand dtype (bf16 or f32)

    x = x_ref[...]                          # (P, GN, F)   compute dtype
    adj = adj_ref[...]                      # (P, GN, GN)  compute dtype (block diag)

    # ---- layer-0 aggregation: t-independent, computed exactly ONCE ----
    agg = x.astype(jnp.float32) + jnp.einsum(
        'gij,gjf->gif', adj, x, preferred_element_type=jnp.float32)

    def mlp(agg3d_f32, w1, layer):
        # Flatten groups*nodes into matmul rows; lane axis packs [t, h].
        a2d = agg3d_f32.reshape(rows, agg3d_f32.shape[-1]).astype(cdt)
        hid = jnp.dot(a2d, w1, preferred_element_type=jnp.float32)
        hid = jnp.maximum(hid + b1_ref[layer:layer + 1, :], 0.0)
        h2d = jnp.dot(hid.astype(cdt), w2_ref[layer],
                      preferred_element_type=jnp.float32)
        return h2d + b2_ref[layer:layer + 1, :]              # (rows, TH) f32

    def store_readout(layer, h2d_f32):
        # global add pool per graph, then ONE lane-dense (B_step, TH) store.
        readout = jnp.sum(h2d_f32.reshape(P * G, N, TH), axis=1)   # (B_step, TH)
        # center is pre-stacked (L, TH), zero outside the t == 0 lane block.
        out_ref[layer, :, :] = readout + center_ref[layer:layer + 1, :]

    # layer 0: stacked first linear (F, T*H)
    h2d = mlp(agg, w1f_ref[...], 0)
    store_readout(0, h2d)

    # layers 1..L-1: block-diagonal stacked linears (T*H, T*H)
    for layer in range(1, L):
        h3d = h2d.reshape(P, GN, TH)
        agg = h3d + jnp.einsum('gij,gjf->gif', adj, h3d.astype(cdt),
                               preferred_element_type=jnp.float32)
        h2d = mlp(agg, w1r_ref[layer - 1], layer)
        store_readout(layer, h2d)


# ----------------------------------------------------------------------------
# Wrapper: fold T into the lane axis, pack graphs into 128-wide groups,
# stream the batch through a "parallel" grid.
# ----------------------------------------------------------------------------
def _block_diag(w):
    """(T, Hi, Ho) -> (T*Hi, T*Ho) block-diagonal."""
    T, Hi, Ho = w.shape
    eye = jnp.eye(T, dtype=w.dtype)
    return jnp.einsum('st,tik->sitk', eye, w).reshape(T * Hi, T * Ho)


def ocgtl_forward(x, adj, params, *, compute_dtype=jnp.bfloat16,
                  target_rows=512, adj_tile_budget_bytes=8 * (1 << 20)):
    B, N, Fin = x.shape
    T, _, H = params['w1_0'].shape
    L = params['w2'].shape[1]
    TH = T * H
    center = params['center']                              # (1, 1, L*H)
    f32 = jnp.float32
    bpe = jnp.dtype(compute_dtype).itemsize

    # ---- graph packing: G graphs share one 128-wide lane group -------------
    G = max(1, 128 // N)                                   # graphs per group
    GN = G * N
    # groups per grid step: ~target_rows live activation rows per step and a
    # VMEM budget on the adjacency tile (re-derive budgets for v7x's 64 MiB).
    max_by_budget = max(1, adj_tile_budget_bytes // max(1, GN * GN * bpe))
    P = max(1, min(pl.cdiv(B, G), max(1, target_rows // GN), max_by_budget))
    B_step = P * G                                         # graphs per grid step
    n_steps = pl.cdiv(B, B_step)
    B_pad = n_steps * B_step
    n_groups = B_pad // G

    # zero-pad the batch, pack groups, build block-diagonal group adjacency
    pad = B_pad - B
    x_p = jnp.pad(x, ((0, pad), (0, 0), (0, 0)))
    adj_p = jnp.pad(adj, ((0, pad), (0, 0), (0, 0)))
    x_packed = x_p.reshape(n_groups, GN, Fin).astype(compute_dtype)
    adj_g = adj_p.reshape(n_groups, G, N, N)
    eye_g = jnp.eye(G, dtype=adj.dtype)
    adj_bd = jnp.einsum('qsij,st->qsitj', adj_g, eye_g).reshape(
        n_groups, GN, GN).astype(compute_dtype)

    # ---- stack the T transformations along the lane axis (param-only prep) --
    w1_first = jnp.transpose(params['w1_0'], (1, 0, 2)).reshape(Fin, TH)
    b1 = jnp.transpose(params['b1'], (1, 0, 2)).reshape(L, TH).astype(f32)
    b2 = jnp.transpose(params['b2'], (1, 0, 2)).reshape(L, TH).astype(f32)
    w2_bd = jnp.stack([_block_diag(params['w2'][:, l]) for l in range(L)])
    w1_first = w1_first.astype(compute_dtype)
    w2_bd = w2_bd.astype(compute_dtype)
    # pre-stacked center, nonzero only in the t == 0 lane block
    center_k = jnp.zeros((L, TH), f32).at[:, :H].set(
        center.reshape(L, H).astype(f32))

    operands = [x_packed, adj_bd, w1_first]
    in_specs = [
        pl.BlockSpec((P, GN, Fin), lambda s: (s, 0, 0)),     # x        (streamed)
        pl.BlockSpec((P, GN, GN), lambda s: (s, 0, 0)),      # adj      (streamed)
        pl.BlockSpec((Fin, TH), lambda s: (0, 0)),           # w1 layer0 (resident)
    ]
    if L > 1:                                                # skip dummy when L==1
        w1r_bd = jnp.stack([_block_diag(params['w1_r'][:, l])
                            for l in range(L - 1)]).astype(compute_dtype)
        operands.append(w1r_bd)
        in_specs.append(pl.BlockSpec((L - 1, TH, TH), lambda s: (0, 0, 0)))
    operands += [b1, w2_bd, b2, center_k]
    in_specs += [
        pl.BlockSpec((L, TH), lambda s: (0, 0)),             # b1
        pl.BlockSpec((L, TH, TH), lambda s: (0, 0, 0)),      # w2
        pl.BlockSpec((L, TH), lambda s: (0, 0)),             # b2
        pl.BlockSpec((L, TH), lambda s: (0, 0)),             # stacked center
    ]

    kernel = functools.partial(
        _ocgtl_kernel, num_trans=T, num_layers=L, hidden_dim=H,
        graphs_per_group=G, nodes_per_graph=N, groups_per_step=P)

    # advisory cost estimate for XLA scheduling around the custom call
    rows_total = B_pad * N
    flops = (2 * n_groups * GN * GN * (Fin + (L - 1) * TH)           # A @ h
             + 2 * rows_total * (Fin * TH + (2 * L - 1) * TH * TH))  # MLP linears
    bytes_accessed = (sum(int(np.prod(a.shape)) * a.dtype.itemsize
                          for a in operands) + L * B_pad * TH * 4)
    cost = pl.CostEstimate(flops=int(flops), transcendentals=0,
                           bytes_accessed=int(bytes_accessed))

    # per-step VMEM estimate; only raise the scoped limit if we would exceed it
    weight_bytes = (Fin * TH + (2 * L - 1) * TH * TH) * bpe + 3 * L * TH * 4
    io_block_bytes = P * GN * (Fin + GN) * bpe + L * B_step * TH * 4
    act_bytes = 3 * P * GN * TH * 4
    est_step_bytes = 2 * io_block_bytes + weight_bytes + act_bytes
    vmem_limit = None
    if est_step_bytes > 12 * (1 << 20):
        vmem_limit = int(min(64 * (1 << 20),
                             max(16 * (1 << 20), 2 * est_step_bytes)))

    out = pl.pallas_call(
        kernel,
        out_shape=jax.ShapeDtypeStruct((L, B_pad, TH), f32),
        grid=(n_steps,),
        in_specs=in_specs,
        out_specs=pl.BlockSpec((L, B_step, TH), lambda s: (0, s, 0)),
        compiler_params=pltpu.CompilerParams(
            dimension_semantics=("parallel",),
            vmem_limit_bytes=vmem_limit),
        cost_estimate=cost,
    )(*operands)

    # lane-dense kernel layout (L, B_pad, T*H) -> module layout (B, T, L*H)
    z_cat = (out[:, :B, :]
             .reshape(L, B, T, H)
             .transpose(1, 2, 0, 3)
             .reshape(B, T, L * H))
    return [z_cat, center]


# ----------------------------------------------------------------------------
# Pure-JAX f32 reference of the same forward (gold standard for the check)
# ----------------------------------------------------------------------------
def ocgtl_reference(x, adj, params):
    T = params['w1_0'].shape[0]
    L = params['w2'].shape[1]
    hp = jax.lax.Precision.HIGHEST
    zs = []
    for t in range(T):
        h = x
        reads = []
        for layer in range(L):
            agg = h + jnp.einsum('bij,bjf->bif', adj, h, precision=hp)
            w1 = params['w1_0'][t] if layer == 0 else params['w1_r'][t, layer - 1]
            hid = jnp.maximum(jnp.einsum('bnf,fh->bnh', agg, w1, precision=hp)
                              + params['b1'][t, layer], 0.0)
            h = jnp.einsum('bnh,hk->bnk', hid, params['w2'][t, layer],
                           precision=hp) + params['b2'][t, layer]
            reads.append(jnp.sum(h, axis=1))
        zs.append(jnp.concatenate(reads, axis=-1)[:, None, :])
    z_cat = jnp.concatenate(zs, axis=1)
    z_cat = z_cat.at[:, 0].add(params['center'][:, 0])
    return [z_cat, params['center']]


# ----------------------------------------------------------------------------
# Deterministic parameter init (mirrors ocgtl.__init__ / reset_parameters)
# ----------------------------------------------------------------------------
def init_params(key, num_trans, dim_features, hidden_dim, num_layers):
    ks = jax.random.split(key, 6)
    T, F, H, L = num_trans, dim_features, hidden_dim, num_layers
    return {
        'w1_0': 0.1 * jax.random.normal(ks[0], (T, F, H), jnp.float32),
        'w1_r': 0.1 * jax.random.normal(ks[1], (T, max(L - 1, 0), H, H),
                                        jnp.float32),
        'b1': 0.1 * jax.random.normal(ks[2], (T, L, H), jnp.float32),
        'w2': 0.1 * jax.random.normal(ks[3], (T, L, H, H), jnp.float32),
        'b2': 0.1 * jax.random.normal(ks[4], (T, L, H), jnp.float32),
        # nn.Parameter(torch.empty(1, 1, H*L)) + init.normal_
        'center': jax.random.normal(ks[5], (1, 1, H * L), jnp.float32),
    }


if __name__ == "__main__":
    # args: num_trans=4, hidden_dim=32, num_layer=2; dim_features=16
    # B=40 graphs of N=16 nodes -> G=8 graphs/group, 4 groups/step, 2 grid steps
    # (exercises graph packing, batch streaming, and batch padding).
    B, N, F, H, L, T = 40, 16, 16, 32, 2, 4

    key = jax.random.PRNGKey(0)
    k_x, k_adj, k_p = jax.random.split(key, 3)

    x = jax.random.normal(k_x, (B, N, F), jnp.float32)
    # symmetric 0/1 adjacency, no self loops
    a = (jax.random.uniform(k_adj, (B, N, N)) > 0.7).astype(jnp.float32)
    adj = jnp.clip(a + jnp.transpose(a, (0, 2, 1)), 0.0, 1.0)
    adj = adj * (1.0 - jnp.eye(N, dtype=jnp.float32)[None])

    params = init_params(k_p, T, F, H, L)
    z_ref, _ = ocgtl_reference(x, adj, params)

    # exact path (f32 MXU operands) -- tight check against the f32 reference
    z_f32, center = ocgtl_forward(x, adj, params, compute_dtype=jnp.float32)
    jax.block_until_ready(z_f32)
    np.testing.assert_allclose(np.asarray(z_f32), np.asarray(z_ref),
                               rtol=2e-4, atol=2e-4)

    # fast path (bf16 MXU operands, f32 accumulation) -- relaxed tolerance
    # TODO(synk): relaxed tolerance is inherent to the bf16 MXU cast suggested
    # by the perf review; the f32 path above is the exactness check.
    z_bf16, _ = ocgtl_forward(x, adj, params, compute_dtype=jnp.bfloat16)
    jax.block_until_ready(z_bf16)
    np.testing.assert_allclose(np.asarray(z_bf16), np.asarray(z_ref),
                               rtol=5e-2, atol=1.5e-1)

    assert z_f32.shape == (B, T, L * H)
    assert z_bf16.shape == (B, T, L * H)
    assert center.shape == (1, 1, L * H)

    print("KERNEL_OK")
</pallas_src>

<mosaic_0001>
module attributes {stable_mosaic.version = 11 : i64} {
  func.func @_ocgtl_kernel(%arg0: i32, %arg1: memref<4x128x16xf32, #tpu.memory_space<vmem>>, %arg2: memref<4x128x128xf32, #tpu.memory_space<vmem>>, %arg3: memref<16x128xf32, #tpu.memory_space<vmem>>, %arg4: memref<1x128x128xf32, #tpu.memory_space<vmem>>, %arg5: memref<2x128xf32, #tpu.memory_space<vmem>>, %arg6: memref<2x128x128xf32, #tpu.memory_space<vmem>>, %arg7: memref<2x128xf32, #tpu.memory_space<vmem>>, %arg8: memref<2x128xf32, #tpu.memory_space<vmem>>, %arg9: memref<2x32x128xf32, #tpu.memory_space<vmem>>) attributes {dimension_semantics = [#tpu.dimension_semantics<parallel>], iteration_bounds = array<i64: 2>, scalar_prefetch = 0 : i64, scratch_operands = 0 : i64, tpu.core_type = #tpu.core_type<tc>, window_params = [{transform_indices = @transform_0, window_bounds = array<i64: 4, 128, 16>}, {transform_indices = @transform_1, window_bounds = array<i64: 4, 128, 128>}, {pipeline_mode = #tpu.pipeline_mode<synchronous>, transform_indices = @transform_2, window_bounds = array<i64: 16, 128>}, {pipeline_mode = #tpu.pipeline_mode<synchronous>, transform_indices = @transform_3, window_bounds = array<i64: 1, 128, 128>}, {pipeline_mode = #tpu.pipeline_mode<synchronous>, transform_indices = @transform_4, window_bounds = array<i64: 2, 128>}, {pipeline_mode = #tpu.pipeline_mode<synchronous>, transform_indices = @transform_5, window_bounds = array<i64: 2, 128, 128>}, {pipeline_mode = #tpu.pipeline_mode<synchronous>, transform_indices = @transform_6, window_bounds = array<i64: 2, 128>}, {pipeline_mode = #tpu.pipeline_mode<synchronous>, transform_indices = @transform_7, window_bounds = array<i64: 2, 128>}, {transform_indices = @transform_8, window_bounds = array<i64: 2, 32, 128>}]} {
    %c0 = arith.constant 0 : index
    %c0_0 = arith.constant 0 : index
    %c0_1 = arith.constant 0 : index
    %0 = vector.load %arg1[%c0, %c0_0, %c0_1] : memref<4x128x16xf32, #tpu.memory_space<vmem>>, vector<4x128x16xf32>
    %c0_2 = arith.constant 0 : index
    %c0_3 = arith.constant 0 : index
    %c0_4 = arith.constant 0 : index
    %1 = vector.load %arg2[%c0_2, %c0_3, %c0_4] : memref<4x128x128xf32, #tpu.memory_space<vmem>>, vector<4x128x128xf32>
    "tpu.trace_start"() <{level = 10 : i32, message = "gij,gjf->gif"}> : () -> ()
    %cst = arith.constant dense<0.000000e+00> : vector<4x128x16xf32>
    %2 = tpu.matmul %1, %0, %cst {dimension_numbers = #tpu.dot_dimension_numbers<[2], [1], [1], [2], [0, 0, 0, 1, 1, 2], [0], [0]>} : vector<4x128x128xf32>, vector<4x128x16xf32>, vector<4x128x16xf32> -> vector<4x128x16xf32>
    "tpu.trace_stop"() : () -> ()
    %3 = arith.addf %0, %2 : vector<4x128x16xf32>
    %c0_5 = arith.constant 0 : index
    %c0_6 = arith.constant 0 : index
    %4 = vector.load %arg3[%c0_5, %c0_6] : memref<16x128xf32, #tpu.memory_space<vmem>>, vector<16x128xf32>
    %5 = vector.shape_cast %3 : vector<4x128x16xf32> to vector<512x16xf32>
    %cst_7 = arith.constant dense<0.000000e+00> : vector<512x128xf32>
    %6 = tpu.matmul %5, %4, %cst_7 {dimension_numbers = #tpu.dot_dimension_numbers<[1], [0], [0], [1], [0, 0, 1, 1], [], []>} : vector<512x16xf32>, vector<16x128xf32>, vector<512x128xf32> -> vector<512x128xf32>
    %c0_8 = arith.constant 0 : index
    %c0_9 = arith.constant 0 : index
    %7 = vector.load %arg5[%c0_8, %c0_9] : memref<2x128xf32, #tpu.memory_space<vmem>>, vector<1x128xf32>
    %8 = vector.broadcast %7 : vector<1x128xf32> to vector<512x128xf32>
    %9 = arith.addf %6, %8 : vector<512x128xf32>
    %cst_10 = arith.constant 0.000000e+00 : f32
    %10 = vector.broadcast %cst_10 : f32 to vector<512x128xf32>
    %11 = arith.maximumf %9, %10 : vector<512x128xf32>
    %c0_11 = arith.constant 0 : index
    %c0_12 = arith.constant 0 : index
    %c0_13 = arith.constant 0 : index
    %12 = vector.load %arg6[%c0_11, %c0_12, %c0_13] : memref<2x128x128xf32, #tpu.memory_space<vmem>>, vector<1x128x128xf32>
    %13 = vector.shape_cast %12 : vector<1x128x128xf32> to vector<128x128xf32>
    %cst_14 = arith.constant dense<0.000000e+00> : vector<512x128xf32>
    %14 = tpu.matmul %11, %13, %cst_14 {dimension_numbers = #tpu.dot_dimension_numbers<[1], [0], [0], [1], [0, 0, 1, 1], [], []>} : vector<512x128xf32>, vector<128x128xf32>, vector<512x128xf32> -> vector<512x128xf32>
    %c0_15 = arith.constant 0 : index
    %c0_16 = arith.constant 0 : index
    %15 = vector.load %arg7[%c0_15, %c0_16] : memref<2x128xf32, #tpu.memory_space<vmem>>, vector<1x128xf32>
    %16 = vector.broadcast %15 : vector<1x128xf32> to vector<512x128xf32>
    %17 = arith.addf %14, %16 : vector<512x128xf32>
    %18 = vector.shape_cast %17 : vector<512x128xf32> to vector<32x16x128xf32>
    %cst_17 = arith.constant dense<0.000000e+00> : vector<32x128xf32>
    %19 = vector.multi_reduction <add>, %18, %cst_17 [1] : vector<32x16x128xf32> to vector<32x128xf32>
    %c0_18 = arith.constant 0 : index
    %c0_19 = arith.constant 0 : index
    %20 = vector.load %arg8[%c0_18, %c0_19] : memref<2x128xf32, #tpu.memory_space<vmem>>, vector<1x128xf32>
    %21 = vector.broadcast %20 : vector<1x128xf32> to vector<32x128xf32>
    %22 = arith.addf %19, %21 : vector<32x128xf32>
    %c0_20 = arith.constant 0 : index
    %c0_21 = arith.constant 0 : index
    %c0_22 = arith.constant 0 : index
    %23 = vector.load %arg9[%c0_20, %c0_21, %c0_22] : memref<2x32x128xf32, #tpu.memory_space<vmem>>, vector<1x32x128xf32>
    %24 = vector.shape_cast %23 : vector<1x32x128xf32> to vector<32x128xf32>
    %25 = vector.shape_cast %22 : vector<32x128xf32> to vector<1x32x128xf32>
    tpu.vector_store %arg9[%c0_20, %c0_21, %c0_22], %25 {strides = array<i32>} : memref<2x32x128xf32, #tpu.memory_space<vmem>>, vector<1x32x128xf32>,
    %26 = vector.shape_cast %17 : vector<512x128xf32> to vector<4x128x128xf32>
    "tpu.trace_start"() <{level = 10 : i32, message = "gij,gjf->gif"}> : () -> ()
    %cst_23 = arith.constant dense<0.000000e+00> : vector<4x128x128xf32>
    %27 = tpu.matmul %1, %26, %cst_23 {dimension_numbers = #tpu.dot_dimension_numbers<[2], [1], [1], [2], [0, 0, 0, 1, 1, 2], [0], [0]>} : vector<4x128x128xf32>, vector<4x128x128xf32>, vector<4x128x128xf32> -> vector<4x128x128xf32>
    "tpu.trace_stop"() : () -> ()
    %28 = arith.addf %26, %27 : vector<4x128x128xf32>
    %c0_24 = arith.constant 0 : index
    %c0_25 = arith.constant 0 : index
    %c0_26 = arith.constant 0 : index
    %29 = vector.load %arg4[%c0_24, %c0_25, %c0_26] : memref<1x128x128xf32, #tpu.memory_space<vmem>>, vector<1x128x128xf32>
    %30 = vector.shape_cast %29 : vector<1x128x128xf32> to vector<128x128xf32>
    %31 = vector.shape_cast %28 : vector<4x128x128xf32> to vector<512x128xf32>
    %cst_27 = arith.constant dense<0.000000e+00> : vector<512x128xf32>
    %32 = tpu.matmul %31, %30, %cst_27 {dimension_numbers = #tpu.dot_dimension_numbers<[1], [0], [0], [1], [0, 0, 1, 1], [], []>} : vector<512x128xf32>, vector<128x128xf32>, vector<512x128xf32> -> vector<512x128xf32>
    %c1 = arith.constant 1 : index
    %c0_28 = arith.constant 0 : index
    %33 = vector.load %arg5[%c1, %c0_28] : memref<2x128xf32, #tpu.memory_space<vmem>>, vector<1x128xf32>
    %34 = vector.broadcast %33 : vector<1x128xf32> to vector<512x128xf32>
    %35 = arith.addf %32, %34 : vector<512x128xf32>
    %cst_29 = arith.constant 0.000000e+00 : f32
    %36 = vector.broadcast %cst_29 : f32 to vector<512x128xf32>
    %37 = arith.maximumf %35, %36 : vector<512x128xf32>
    %c1_30 = arith.constant 1 : index
    %c0_31 = arith.constant 0 : index
    %c0_32 = arith.constant 0 : index
    %38 = vector.load %arg6[%c1_30, %c0_31, %c0_32] : memref<2x128x128xf32, #tpu.memory_space<vmem>>, vector<1x128x128xf32>
    %39 = vector.shape_cast %38 : vector<1x128x128xf32> to vector<128x128xf32>
    %cst_33 = arith.constant dense<0.000000e+00> : vector<512x128xf32>
    %40 = tpu.matmul %37, %39, %cst_33 {dimension_numbers = #tpu.dot_dimension_numbers<[1], [0], [0], [1], [0, 0, 1, 1], [], []>} : vector<512x128xf32>, vector<128x128xf32>, vector<512x128xf32> -> vector<512x128xf32>
    %c1_34 = arith.constant 1 : index
    %c0_35 = arith.constant 0 : index
    %41 = vector.load %arg7[%c1_34, %c0_35] : memref<2x128xf32, #tpu.memory_space<vmem>>, vector<1x128xf32>
    %42 = vector.broadcast %41 : vector<1x128xf32> to vector<512x128xf32>
    %43 = arith.addf %40, %42 : vector<512x128xf32>
    %44 = vector.shape_cast %43 : vector<512x128xf32> to vector<32x16x128xf32>
    %cst_36 = arith.constant dense<0.000000e+00> : vector<32x128xf32>
    %45 = vector.multi_reduction <add>, %44, %cst_36 [1] : vector<32x16x128xf32> to vector<32x128xf32>
    %c1_37 = arith.constant 1 : index
    %c0_38 = arith.constant 0 : index
    %46 = vector.load %arg8[%c1_37, %c0_38] : memref<2x128xf32, #tpu.memory_space<vmem>>, vector<1x128xf32>
    %47 = vector.broadcast %46 : vector<1x128xf32> to vector<32x128xf32>
    %48 = arith.addf %45, %47 : vector<32x128xf32>
    %c1_39 = arith.constant 1 : index
    %c0_40 = arith.constant 0 : index
    %c0_41 = arith.constant 0 : index
    %49 = vector.load %arg9[%c1_39, %c0_40, %c0_41] : memref<2x32x128xf32, #tpu.memory_space<vmem>>, vector<1x32x128xf32>
    %50 = vector.shape_cast %49 : vector<1x32x128xf32> to vector<32x128xf32>
    %51 = vector.shape_cast %48 : vector<32x128xf32> to vector<1x32x128xf32>
    tpu.vector_store %arg9[%c1_39, %c0_40, %c0_41], %51 {strides = array<i32>} : memref<2x32x128xf32, #tpu.memory_space<vmem>>, vector<1x32x128xf32>,
    return
  }
  func.func @transform_0(%arg0: i32) -> (i32, i32, i32) {
    %c0_i32 = arith.constant 0 : i32
    %c0_i32_0 = arith.constant 0 : i32
    %c0_i32_1 = arith.constant 0 : i32
    return %arg0, %c0_i32, %c0_i32_0 : i32, i32, i32
  }
  func.func @transform_1(%arg0: i32) -> (i32, i32, i32) {
    %c0_i32 = arith.constant 0 : i32
    %c0_i32_0 = arith.constant 0 : i32
    %c0_i32_1 = arith.constant 0 : i32
    return %arg0, %c0_i32, %c0_i32_0 : i32, i32, i32
  }
  func.func @transform_2(%arg0: i32) -> (i32, i32) {
    %c0_i32 = arith.constant 0 : i32
    %c0_i32_0 = arith.constant 0 : i32
    %c0_i32_1 = arith.constant 0 : i32
    return %c0_i32, %c0_i32_0 : i32, i32
  }
  func.func @transform_3(%arg0: i32) -> (i32, i32, i32) {
    %c0_i32 = arith.constant 0 : i32
    %c0_i32_0 = arith.constant 0 : i32
    %c0_i32_1 = arith.constant 0 : i32
    %c0_i32_2 = arith.constant 0 : i32
    return %c0_i32, %c0_i32_0, %c0_i32_1 : i32, i32, i32
  }
  func.func @transform_4(%arg0: i32) -> (i32, i32) {
    %c0_i32 = arith.constant 0 : i32
    %c0_i32_0 = arith.constant 0 : i32
    %c0_i32_1 = arith.constant 0 : i32
    return %c0_i32, %c0_i32_0 : i32, i32
  }
  func.func @transform_5(%arg0: i32) -> (i32, i32, i32) {
    %c0_i32 = arith.constant 0 : i32
    %c0_i32_0 = arith.constant 0 : i32
    %c0_i32_1 = arith.constant 0 : i32
    %c0_i32_2 = arith.constant 0 : i32
    return %c0_i32, %c0_i32_0, %c0_i32_1 : i32, i32, i32
  }
  func.func @transform_6(%arg0: i32) -> (i32, i32) {
    %c0_i32 = arith.constant 0 : i32
    %c0_i32_0 = arith.constant 0 : i32
    %c0_i32_1 = arith.constant 0 : i32
    return %c0_i32, %c0_i32_0 : i32, i32
  }
  func.func @transform_7(%arg0: i32) -> (i32, i32) {
    %c0_i32 = arith.constant 0 : i32
    %c0_i32_0 = arith.constant 0 : i32
    %c0_i32_1 = arith.constant 0 : i32
    return %c0_i32, %c0_i32_0 : i32, i32
  }
  func.func @transform_8(%arg0: i32) -> (i32, i32, i32) {
    %c0_i32 = arith.constant 0 : i32
    %c0_i32_0 = arith.constant 0 : i32
    %c0_i32_1 = arith.constant 0 : i32
    return %c0_i32, %arg0, %c0_i32_0 : i32, i32, i32
  }
}

</mosaic_0001>

<bundles_post_ra>
// kernel: tpu_custom_call.1
= control target key start
LH: loop header
LB: loop body
LE: loop exit
PB: predicated region body
PF: predicated region fallthrough
CT: control target
= control target key end

     0   :  { %s5667_s0 = inlined_call_operand.vmem [shape: f32[8,128,16], index: 0, kind: input, shape index: {}]   ;;  %s5668_s1 = inlined_call_operand.vmem [shape: f32[8,128,128], index: 1, kind: input, shape index: {}]   ;;  %s5669_s2 = inlined_call_operand.hbm [shape: f32[16,128], index: 2, kind: input, shape index: {}]   ;;  %s5670_s3 = inlined_call_operand.vmem [shape: f32[1,128,128], index: 3, kind: input, shape index: {}]   ;;  %s5671_s4 = inlined_call_operand.hbm [shape: f32[2,128], index: 4, kind: input, shape index: {}]   ;;  %s5672_s5 = inlined_call_operand.hbm [shape: f32[2,128,128], index: 5, kind: input, shape index: {}]   ;;  %s5673_s6 = inlined_call_operand.hbm [shape: f32[2,128], index: 6, kind: input, shape index: {}]   ;;  %s5674_s7 = inlined_call_operand.hbm [shape: f32[2,128], index: 7, kind: input, shape index: {}]   ;;  %s5675_s8 = inlined_call_operand.hbm [shape: f32[2,64,128], index: 8, kind: output, shape index: {}]  }
   0x1   :  { %5726 = sst [smem:[#allocation59_spill]] %s5669_s2 }
   0x2   :  { %5727 = sst [smem:[#allocation60_spill]] %s5671_s4 }
   0x3   :  { %5728 = sst [smem:[#allocation61_spill]] %s5673_s6 }
   0x4   :  { %13 = vsyncpa [#allocation3], 0 }
   0x5   :  { %14 = vsyncpa [#allocation6], 0 }
   0x6   :  { %15 = vsyncpa [#allocation9], 0 }
   0x7   :  { %16 = vsyncpa [#allocation4], 0 }
   0x8   :  { %18 = vsyncpa [#allocation4 + $0x1], 0  ;;  %s3835_s27 = smov 0   ;;  %s3837_s28 = smov 0  }
   0x9   :  { %s3839_s29 = smov 0   ;;  %s3841_s30 = smov 0  }
   0xa LB: > { %s3856_s9 = sadd.s32 4294967295, %s3774_s30   ;;  %s3283_s10 = sadd.s32 4294967294, %s3774_s30   ;;  %s3774_s30 = sphi %s3841_s30, %s5849_s30   ;;  %s3770_s29 = sphi %s3839_s29, %s5848_s29   ;;  %s3766_s28 = sphi %s3837_s28, %s5847_s28   ;;  %s3762_s27 = sphi %s3835_s27, %s5846_s27  }
   0xb   : > { %s3860_s11 = sadd.s32 1, %s3774_s30   ;;  %s209_s12 = sadd.s32 1, %s3770_s29 }
   0xc   : > { %s206_s13 = ssub.s32 %s3774_s30, %s3860_s11  ;;  %p219_p0 = scmp.ne.s32.totalorder %s3770_s29, %s3766_s28 }
   0xd   : > { %p207_p1 = scmp.eq.s32.totalorder %s206_s13, 0  ;;  %p220_p2 = scmp.eq.s32.totalorder %s3856_s9, 1 }
   0xe   : > { %p225_p3 = scmp.ne.s32.totalorder %s3766_s28, %s3762_s27  ;;  %p226_p4 = scmp.eq.s32.totalorder %s3283_s10, 1 }
   0xf   : > { %s3871_s14 = scalar_select %p207_p1, %s3770_s29, %s209_s12  }
  0x10   : > { %p3873_p5 = por %p220_p2, %p219_p0  ;;  %p3877_p6 = por %p226_p4, %p225_p3 }
  0x11   : > { %5729 = sst [smem:[#allocation18_spill]] %s3871_s14  ;;  %p3284_p7 = scmp.ge.s32.totalorder %s3774_s30, 1 }
  0x12   : > { %p233_p8 = scmp.lt.s32.totalorder %s3774_s30, 3  ;;  %p3428_p9 = scmp.eq.s32.totalorder %s3856_s9, 0 }
  0x13   : > { %s5733_s4 = sld [smem:[#allocation60_spill]]  ;;  %s3776_s21 = smov [#allocation5]  }
  0x14   : > { %p3884_p10 = pnand %p3284_p7, %p233_p8  ;;  %s264_s22 = sshll.u32 %s3776_s21, 4  ;;  %s265_s22 = int_to_ptr.vmem [resolvable:$true] %s264_s22 }
  0x15   : > { %s5734_s6 = sld [smem:[#allocation61_spill]]  ;;  %s3777_s18 = smov [#allocation8]  }
  0x16   : > { %p3408_p11 = pneg %p3884_p10  ;;  %s5736_s2 = sld [smem:[#allocation59_spill]] }
  0x17   : > { %s290_s19 = sshll.u32 %s3777_s18, 4  ;;  %s3778_s21 = smov [#allocation2]   ;;  %s291_s19 = int_to_ptr.vmem [resolvable:$true] %s290_s19 }
  0x18   : > { %p3898_p12 = pnand %p3428_p9, %p3408_p11  ;;  %s246_s23 = sshll.u32 %s3778_s21, 4  ;;  %s247_s23 = int_to_ptr.vmem [resolvable:$true] %s246_s23 }
  0x19   : > { %s262_s20 = sshll.u32 %s5733_s4, 4  ;;  %s3779_s14 = smov 128   ;;  %s263_s20 = int_to_ptr.hbm [resolvable:$true] %s262_s20 }
  0x1a   : > { %3414 = dma.hbm_to_vmem [thread:$0]  (!%p3898_p12), %s263_s20, 32, %s265_s22, [#allocation6]  }
  0x1b   : > { %s288_s25 = sshll.u32 %s5734_s6, 4  ;;  %s273_s6 = sshll.u32 %s5672_s5, 4  ;;  %s289_s25 = int_to_ptr.hbm [resolvable:$true] %s288_s25  ;;  %s274_s6 = int_to_ptr.hbm [resolvable:$true] %s273_s6 }
  0x1c   : > { %s244_s13 = sshll.u32 %s5736_s2, 4  ;;  %s3780_s10 = smov 8   ;;  %s245_s13 = int_to_ptr.hbm [resolvable:$true] %s244_s13 }
  0x1d   : > { %3420 = dma.hbm_to_vmem [thread:$0]  (!%p3898_p12), %s289_s25, 32, %s291_s19, [#allocation9]  }
  0x1e   : > { %3411 = dma.hbm_to_vmem [thread:$0]  (!%p3898_p12), %s245_s13, 256, %s247_s23, [#allocation3], %s3779_s14, %s3779_s14, %s3780_s10  }
  0x1f   : > { %s3781_s12 = smov [#allocation7]   ;;  %s300_s2 = sshll.u32 %s5674_s7, 4  ;;  %s301_s2 = int_to_ptr.hbm [resolvable:$true] %s300_s2 }
  0x20   : > { %s275_s20 = sshll.u32 %s3781_s12, 4  ;;  %s3782_s25 = smov [#allocation10]   ;;  %s276_s20 = int_to_ptr.vmem [resolvable:$true] %s275_s20 }
  0x21   : > { %3417 = dma.hbm_to_vmem [thread:$0]  (!%p3898_p12), %s274_s6, 4096, %s276_s20, [#allocation6], %s3779_s14, %s3779_s14, %s3780_s10  }
  0x22   : > { %s302_s19 = sshll.u32 %s3782_s25, 4  ;;  %335 = sbr.rel (%p3884_p10) target bundleno = 1935 (0x78f), region = 52  ;;  %s303_s19 = int_to_ptr.vmem [resolvable:$true] %s302_s19 }
  0x23   : > { %3423 = dma.hbm_to_vmem [thread:$0]  (!%p3898_p12), %s301_s2, 32, %s303_s19, [#allocation9]  }
  0x27   : > { %3745 = dma.done.wait (%p3428_p9), [#allocation3], 256  }
  0x28   : > { %3747 = vsyncadd (%p3428_p9), [#allocation3], 4294967040 }
  0x29   : > { %3749 = dma.done.wait (%p3428_p9), [#allocation6], 4128  }
  0x2a   : > { %3751 = vsyncadd (%p3428_p9), [#allocation6], 4294963168 }
  0x2b   : > { %3753 = dma.done.wait (%p3428_p9), [#allocation9], 64  }
  0x2c   : > { %3755 = vsyncadd (%p3428_p9), [#allocation9], 4294967232  ;;  %s3298_s2 = sshll.u32 %s3856_s9, 2  ;;  %vm868_vm0 = vcmask 130048   ;;  %s394_s23 = sand.u32 1, %s3766_s28   ;;  %vm1852_vm1 = vcmask 1041409  }
  0x2d   : > { %p398_p13 = scmp.lt.s32.totalorder %s3298_s2, 7  ;;  %vm1855_vm2 = vcmask 1042434   ;;  %vm1858_vm3 = vcmask 1043459   ;;  %vm1861_vm4 = vcmask 1044484   ;;  %vm1864_vm5 = vcmask 1045509   ;;  %s3297_s24 = sshll.u32 %s394_s23, 6 }
  0x2e   : > { %vm1867_vm6 = vcmask 1046534   ;;  %vm1870_vm7 = vcmask 1047559   ;;  %s4648_s10 = scalar_lea.vmem [#allocation11], %s3297_s24 }
  0x2f   : > { %s5851_s2 = smov (!%p398_p13, %s3298_s2), 7 }
  0x30   : > { %s3377_s4 = sshll.u32 %s5851_s2, 7 }
  0x31   : > { %s3944_s17 = scalar_lea.vmem %s5667_s0, %s3377_s4  ;;  %s4009_s21 = scalar_lea.vmem %s5668_s1, %s3377_s4 }
  0x32   : > { %v3947_v0 = vld [vmem:[%s3944_s17 + $0x78] sm:$0xff]  ;;  %v3950_v1 = vld [vmem:[%s3944_s17 + $0x70] sm:$0xff]  ;;  %v3954_v2 = vld [vmem:[%s3944_s17 + $0x68] sm:$0xff] }
  0x33   : > { %540 = vmatpush.msra.mxu0 %v3947_v0  ;;  %v3958_v3 = vld [vmem:[%s3944_s17 + $0x60] sm:$0xff]  ;;  %v3962_v4 = vld [vmem:[%s3944_s17 + $0x58] sm:$0xff]  ;;  %v3966_v5 = vld [vmem:[%s3944_s17 + $0x50] sm:$0xff] }
  0x34   : > { %v3970_v6 = vld [vmem:[%s3944_s17 + $0x48] sm:$0xff]  ;;  %v3974_v7 = vld [vmem:[%s3944_s17 + $0x40] sm:$0xff]  ;;  %v3978_v8 = vld [vmem:[%s3944_s17 + $0x38] sm:$0xff] }
  0x35   : > { %541 = vmatpush.msra.mxu0 %v3950_v1  ;;  %v3982_v9 = vld [vmem:[%s3944_s17 + $0x30] sm:$0xff]  ;;  %v3986_v10 = vld [vmem:[%s3944_s17 + $0x28] sm:$0xff]  ;;  %v3990_v11 = vld [vmem:[%s3944_s17 + $0x20] sm:$0xff] }
  0x36   : > { %v3994_v12 = vld [vmem:[%s3944_s17 + $0x18] sm:$0xff]  ;;  %v3998_v13 = vld [vmem:[%s3944_s17 + $0x10] sm:$0xff]  ;;  %v4002_v14 = vld [vmem:[%s3944_s17 + $0x8] sm:$0xff] }
  0x37   : > { %542 = vmatpush.msra.mxu0 %v3954_v2  ;;  %v4013_v15 = vld [vmem:[%s3944_s17] sm:$0xff]  ;;  %v477_v17 = vld [vmem:[%s4009_s21 + $0x8] sm:$0xff]  ;;  %v478_v18 = vld [vmem:[%s4009_s21 + $0x10] sm:$0xff] }
  0x38   : > { %v476_v16 = vld [vmem:[%s4009_s21] sm:$0xff]  ;;  %v479_v19 = vld [vmem:[%s4009_s21 + $0x18] sm:$0xff]  ;;  %v481_v21 = vld [vmem:[%s4009_s21 + $0x28] sm:$0xff] }
  0x39   : > { %543 = vmatpush.msra.mxu0 %v3958_v3  ;;  %v480_v20 = vld [vmem:[%s4009_s21 + $0x20] sm:$0xff]  ;;  %v482_v22 = vld [vmem:[%s4009_s21 + $0x30] sm:$0xff]  ;;  %v483_v23 = vld [vmem:[%s4009_s21 + $0x38] sm:$0xff] }
  0x3a   : > { %v484_v24 = vld [vmem:[%s4009_s21 + $0x40] sm:$0xff]  ;;  %v459_v25 = vld [vmem:[%s3944_s17 + $0x178] sm:$0xff]  ;;  %v458_v27 = vld [vmem:[%s3944_s17 + $0x170] sm:$0xff] }
  0x3b   : > { %544 = vmatpush.msra.mxu0 %v3962_v4  ;;  %v4028_v26 = vld [vmem:[%s3944_s17 + $0xf8] sm:$0xff]  ;;  %v4033_v28 = vld [vmem:[%s3944_s17 + $0xf0] sm:$0xff]  ;;  %v457_v29 = vld [vmem:[%s3944_s17 + $0x168] sm:$0xff] }
  0x3c   : > { %605 = vmatpush.msra.mxu1 %v4028_v26  ;;  %v4037_v30 = vld [vmem:[%s3944_s17 + $0xe8] sm:$0xff]  ;;  %v456_v31 = vld [vmem:[%s3944_s17 + $0x160] sm:$0xff]  ;;  %v4047_v34 = vld [vmem:[%s3944_s17 + $0x158] sm:$0xff] }
  0x3d   : > { %545 = vmatpush.msra.mxu0 %v3966_v5  ;;  %v485_v32 = vld [vmem:[%s4009_s21 + $0x48] sm:$0xff]  ;;  %v4044_v33 = vld [vmem:[%s3944_s17 + $0xe0] sm:$0xff]  ;;  %5737 = vst [vmem:[#allocation19_spill] sm:$0xff] %v4047_v34  ;;  %v4050_v35 = vld [vmem:[%s3944_s17 + $0xd8] sm:$0xff] }
  0x3e   : > { %606 = vmatpush.msra.mxu1 %v4033_v28  ;;  %v4055_v36 = vld [vmem:[%s3944_s17 + $0x150] sm:$0xff]  ;;  %v4061_v38 = vld [vmem:[%s3944_s17 + $0x148] sm:$0xff]  ;;  %v4069_v40 = vld [vmem:[%s3944_s17 + $0x140] sm:$0xff] }
  0x3f   : > { %546 = vmatpush.msra.mxu0 %v3970_v6  ;;  %5738 = vst [vmem:[#allocation20_spill] sm:$0xff] %v4055_v36  ;;  %v4058_v37 = vld [vmem:[%s3944_s17 + $0xd0] sm:$0xff]  ;;  %v4066_v39 = vld [vmem:[%s3944_s17 + $0xc8] sm:$0xff]  ;;  %v4077_v42 = vld [vmem:[%s3944_s17 + $0xc0] sm:$0xff] }
  0x40   : > { %607 = vmatpush.msra.mxu1 %v4037_v30  ;;  %5739 = vst [vmem:[#allocation21_spill] sm:$0xff] %v4061_v38  ;;  %v486_v41 = vld [vmem:[%s4009_s21 + $0x50] sm:$0xff]  ;;  %v4080_v43 = vld [vmem:[%s3944_s17 + $0x138] sm:$0xff]  ;;  %v4094_v47 = vld [vmem:[%s3944_s17 + $0x128] sm:$0xff] }
  0x41   : > { %547 = vmatpush.msra.mxu0 %v3974_v7  ;;  %5740 = vst [vmem:[#allocation22_spill] sm:$0xff] %v4069_v40  ;;  %v4083_v44 = vld [vmem:[%s3944_s17 + $0xb8] sm:$0xff]  ;;  %v4088_v45 = vld [vmem:[%s3944_s17 + $0x130] sm:$0xff]  ;;  %v4099_v48 = vld [vmem:[%s3944_s17 + $0xa8] sm:$0xff] }
  0x42   : > { %608 = vmatpush.msra.mxu1 %v4044_v33  ;;  %5741 = vst [vmem:[#allocation23_spill] sm:$0xff] %v4080_v43  ;;  %v4091_v46 = vld [vmem:[%s3944_s17 + $0xb0] sm:$0xff]  ;;  %v4102_v49 = vld [vmem:[%s3944_s17 + $0x120] sm:$0xff]  ;;  %v487_v50 = vld [vmem:[%s4009_s21 + $0x58] sm:$0xff] }
  0x43   : > { %548 = vmatpush.msra.mxu0 %v3978_v8  ;;  %5742 = vst [vmem:[#allocation24_spill] sm:$0xff] %v4088_v45  ;;  %v4110_v51 = vld [vmem:[%s3944_s17 + $0xa0] sm:$0xff]  ;;  %v4113_v52 = vld [vmem:[%s3944_s17 + $0x118] sm:$0xff]  ;;  %v4121_v54 = vld [vmem:[%s3944_s17 + $0x110] sm:$0xff] }
  0x44   : > { %609 = vmatpush.msra.mxu1 %v4050_v35  ;;  %5743 = vst [vmem:[#allocation25_spill] sm:$0xff] %v4094_v47  ;;  %v4116_v53 = vld [vmem:[%s3944_s17 + $0x98] sm:$0xff]  ;;  %v4126_v55 = vld [vmem:[%s3944_s17 + $0x90] sm:$0xff]  ;;  %v4129_v56 = vld [vmem:[%s3944_s17 + $0x108] sm:$0xff] }
  0x45   : > { %549 = vmatpush.msra.mxu0 %v3982_v9  ;;  %5744 = vst [vmem:[#allocation26_spill] sm:$0xff] %v4102_v49  ;;  %v488_v57 = vld [vmem:[%s4009_s21 + $0x60] sm:$0xff]  ;;  %v4135_v58 = vld [vmem:[%s3944_s17 + $0x88] sm:$0xff] }
  0x46   : > { %610 = vmatpush.msra.mxu1 %v4058_v37  ;;  %5745 = vst [vmem:[#allocation27_spill] sm:$0xff] %v4113_v52  ;;  %v4138_v59 = vld [vmem:[%s3944_s17 + $0x100] sm:$0xff]  ;;  %v489_v62 = vld [vmem:[%s4009_s21 + $0x68] sm:$0xff] }
  0x47   : > { %550 = vmatpush.msra.mxu0 %v3986_v10  ;;  %v4143_v60 = vld [vmem:[%s3944_s17 + $0x80] sm:$0xff]  ;;  %v493_v63 = vld [vmem:[%s4009_s21 + $0x88] sm:$0xff] }
  0x48   : > { %611 = vmatpush.msra.mxu1 %v4066_v39  ;;  %v492_v61 = vld [vmem:[%s4009_s21 + $0x80] sm:$0xff] }
  0x49   : > { %551 = vmatpush.msra.mxu0 %v3990_v11 }
  0x4a   : > { %612 = vmatpush.msra.mxu1 %v4077_v42 }
  0x4b   : > { %552 = vmatpush.msra.mxu0 %v3994_v12 }
  0x4c   : > { %613 = vmatpush.msra.mxu1 %v4083_v44 }
  0x4d   : > { %553 = vmatpush.msra.mxu0 %v3998_v13 }
  0x4e   : > { %614 = vmatpush.msra.mxu1 %v4091_v46 }
  0x4f   : > { %554 = vmatpush.msra.mxu0 %v4002_v14 }
  0x50   : > { %615 = vmatpush.msra.mxu1 %v4099_v48 }
  0x51   : > { %555 = vmatpush.msra.mxu0 %v4013_v15 }
  0x52   : > { %556 = vmatmul.f32.vlgmr.msra.gmra.mxu0 %v476_v16  ;;  %616 = vmatpush.msra.mxu1 %v4110_v51  ;;  %v490_v16 = vld [vmem:[%s4009_s21 + $0x70] sm:$0xff] }
  0x53   : > { %670 = vmatpush.msrb.mxu0 %v459_v25  ;;  %v497_v25 = vld [vmem:[%s4009_s21 + $0xa8] sm:$0xff] }
  0x54   : > { %617 = vmatpush.msra.mxu1 %v4116_v53 }
  0x55   : > { %671 = vmatpush.msrb.mxu0 %v458_v27 }
  0x56   : > { %618 = vmatpush.msra.mxu1 %v4126_v55 }
  0x57   : > { %672 = vmatpush.msrb.mxu0 %v457_v29  ;;  %v510_v29 = vld [vmem:[%s4009_s21 + $0x110] sm:$0xff] }
  0x58   : > { %619 = vmatpush.msra.mxu1 %v4135_v58 }
  0x59   : > { %673 = vmatpush.msrb.mxu0 %v456_v31  ;;  %v498_v31 = vld [vmem:[%s4009_s21 + $0xb0] sm:$0xff] }
  0x5a   : > { %559 = vmatmul.f32.gmra.mxu0 %v477_v17  ;;  %620 = vmatpush.msra.mxu1 %v4143_v60  ;;  %v494_v17 = vld [vmem:[%s4009_s21 + $0x90] sm:$0xff] }
  0x5b   : > { %674 = vmatpush.msrb.mxu0 %v4047_v34  ;;  %621 = vmatmul.f32.vlgmr.msra.gmra.mxu1 %v492_v61  ;;  %v512_v61 = vld [vmem:[%s4009_s21 + $0x120] sm:$0xff]  ;;  %v463_v34 = vld [vmem:[%s3944_s17 + $0x198] sm:$0xff] }
  0x5d   : > { %675 = vmatpush.msrb.mxu0 %v4055_v36 }
  0x5f   : > { %676 = vmatpush.msrb.mxu0 %v4061_v38  ;;  %v525_v38 = vld [vmem:[%s4009_s21 + $0x188] sm:$0xff] }
  0x61   : > { %677 = vmatpush.msrb.mxu0 %v4069_v40  ;;  %v526_v40 = vld [vmem:[%s4009_s21 + $0x190] sm:$0xff] }
  0x62   : > { %562 = vmatmul.f32.gmra.mxu0 %v478_v18  ;;  %v491_v18 = vld [vmem:[%s4009_s21 + $0x78] sm:$0xff] }
  0x63   : > { %678 = vmatpush.msrb.mxu0 %v4080_v43  ;;  %624 = vmatmul.f32.gmra.mxu1 %v493_v63 }
  0x65   : > { %679 = vmatpush.msrb.mxu0 %v4088_v45  ;;  %v527_v45 = vld [vmem:[%s4009_s21 + $0x198] sm:$0xff] }
  0x67   : > { %680 = vmatpush.msrb.mxu0 %v4094_v47 }
  0x69   : > { %681 = vmatpush.msrb.mxu0 %v4102_v49  ;;  %v529_v49 = vld [vmem:[%s4009_s21 + $0x1a8] sm:$0xff] }
  0x6a   : > { %565 = vmatmul.f32.gmra.mxu0 %v479_v19  ;;  %v495_v19 = vld [vmem:[%s4009_s21 + $0x98] sm:$0xff] }
  0x6b   : > { %682 = vmatpush.msrb.mxu0 %v4113_v52  ;;  %627 = vmatmul.f32.gmra.mxu1 %v494_v17  ;;  %v501_v17 = vld [vmem:[%s4009_s21 + $0xc8] sm:$0xff] }
  0x6d   : > { %683 = vmatpush.msrb.mxu0 %v4121_v54 }
  0x6f   : > { %684 = vmatpush.msrb.mxu0 %v4129_v56 }
  0x71   : > { %685 = vmatpush.msrb.mxu0 %v4138_v59 }
  0x72   : > { %568 = vmatmul.f32.gmra.mxu0 %v480_v20 }
  0x73   : > { %630 = vmatmul.f32.gmra.mxu1 %v495_v19  ;;  %v514_v19 = vld [vmem:[%s4009_s21 + $0x130] sm:$0xff] }
  0x7a   : > { %571 = vmatmul.f32.gmra.mxu0 %v481_v21  ;;  %v508_v21 = vld [vmem:[%s4009_s21 + $0x100] sm:$0xff] }
  0x82   : > { %574 = vmatmul.f32.gmra.mxu0 %v482_v22  ;;  %v496_v22 = vld [vmem:[%s4009_s21 + $0xa0] sm:$0xff] }
  0x83   : > { %633 = vmatmul.f32.gmra.mxu1 %v496_v22 }
  0x8a   : > { %577 = vmatmul.f32.gmra.mxu0 %v483_v23 }
  0x8b   : > { %636 = vmatmul.f32.gmra.mxu1 %v497_v25  ;;  %v503_v25 = vld [vmem:[%s4009_s21 + $0xd8] sm:$0xff] }
  0x92   : > { %580 = vmatmul.f32.gmra.mxu0 %v484_v24  ;;  %v509_v24 = vld [vmem:[%s4009_s21 + $0x108] sm:$0xff] }
  0x93   : > { %639 = vmatmul.f32.gmra.mxu1 %v498_v31  ;;  %v516_v31 = vld [vmem:[%s4009_s21 + $0x140] sm:$0xff] }
  0x9a   : > { %583 = vmatmul.f32.gmra.mxu0 %v485_v32 }
  0xa2   : > { %586 = vmatmul.f32.gmra.mxu0 %v486_v41  ;;  %v511_v41 = vld [vmem:[%s4009_s21 + $0x118] sm:$0xff] }
  0xaa   : > { %589 = vmatmul.f32.gmra.mxu0 %v487_v50  ;;  %v499_v50 = vld [vmem:[%s4009_s21 + $0xb8] sm:$0xff] }
  0xab   : > { %642 = vmatmul.f32.gmra.mxu1 %v499_v50  ;;  %v504_v50 = vld [vmem:[%s4009_s21 + $0xe0] sm:$0xff] }
  0xb2   : > { %592 = vmatmul.f32.gmra.mxu0 %v488_v57 }
  0xba   : > { %595 = vmatmul.f32.gmra.mxu0 %v489_v62  ;;  %v500_v62 = vld [vmem:[%s4009_s21 + $0xc0] sm:$0xff] }
  0xbb   : > { %645 = vmatmul.f32.gmra.mxu1 %v500_v62  ;;  %v474_v62 = vld [vmem:[%s3944_s17 + $0x1f0] sm:$0xff] }
  0xc2   : > { %598 = vmatmul.f32.gmra.mxu0 %v490_v16  ;;  %v513_v16 = vld [vmem:[%s4009_s21 + $0x128] sm:$0xff] }
  0xc3   : > { %648 = vmatmul.f32.gmra.mxu1 %v501_v17  ;;  %v517_v17 = vld [vmem:[%s4009_s21 + $0x148] sm:$0xff] }
  0xca   : > { %601 = vmatmul.f32.gmra.mxu0 %v491_v18 }
  0xcf   : > { %v4153_v20 = vpop.f32.mrf.mxu0 }
  0xd2   : > { %686 = vmatmul.f32.vlgmr.msrb.gmra.mxu0 %v508_v21  ;;  %v502_v21 = vld [vmem:[%s4009_s21 + $0xd0] sm:$0xff] }
  0xd3   : > { %651 = vmatmul.f32.gmra.mxu1 %v502_v21  ;;  %v472_v21 = vld [vmem:[%s3944_s17 + $0x1e0] sm:$0xff] }
  0xd7   : > { %v4157_v23 = vpop.f32.mrf.mxu0 }
  0xda   : > { %689 = vmatmul.f32.gmra.mxu0 %v509_v24  ;;  %v515_v24 = vld [vmem:[%s4009_s21 + $0x138] sm:$0xff] }
  0xdb   : > { %654 = vmatmul.f32.gmra.mxu1 %v503_v25  ;;  %v471_v25 = vld [vmem:[%s3944_s17 + $0x1d8] sm:$0xff] }
  0xdf   : > { %v4161_v27 = vpop.f32.mrf.mxu0 }
  0xe2   : > { %692 = vmatmul.f32.gmra.mxu0 %v510_v29 }
  0xe3   : > { %657 = vmatmul.f32.gmra.mxu1 %v504_v50  ;;  %v518_v50 = vld [vmem:[%s4009_s21 + $0x150] sm:$0xff] }
  0xe7   : > { %v4165_v32 = vpop.f32.mrf.mxu0 }
  0xea   : > { %695 = vmatmul.f32.gmra.mxu0 %v511_v41  ;;  %v865_v41 = vld [vmem:[#allocation2 + $0x8] sm:$0xff] }
  0xeb   : > { %1075 = vmatpush.msra.mxu0 %v865_v41 }
  0xef   : > { %v4169_v57 = vpop.f32.mrf.mxu0 }
  0xf2   : > { %698 = vmatmul.f32.gmra.mxu0 %v512_v61  ;;  %v475_v61 = vld [vmem:[%s3944_s17 + $0x1f8] sm:$0xff] }
  0xf3   : > { %735 = vmatpush.msrb.mxu1 %v475_v61  ;;  %v469_v61 = vld [vmem:[%s3944_s17 + $0x1c8] sm:$0xff] }
  0xf5   : > { %736 = vmatpush.msrb.mxu1 %v474_v62  ;;  %v468_v62 = vld [vmem:[%s3944_s17 + $0x1c0] sm:$0xff] }
  0xf7   : > { %v4173_v63 = vpop.f32.mrf.mxu0 }
  0xfa   : > { %701 = vmatmul.f32.gmra.mxu0 %v513_v16 }
  0xff   : > { %v4177_v18 = vpop.f32.mrf.mxu0 }
 0x102   : > { %704 = vmatmul.f32.gmra.mxu0 %v514_v19  ;;  %v473_v19 = vld [vmem:[%s3944_s17 + $0x1e8] sm:$0xff] }
 0x103   : > { %737 = vmatpush.msrb.mxu1 %v473_v19  ;;  %v467_v19 = vld [vmem:[%s3944_s17 + $0x1b8] sm:$0xff] }
 0x105   : > { %738 = vmatpush.msrb.mxu1 %v472_v21  ;;  %v466_v21 = vld [vmem:[%s3944_s17 + $0x1b0] sm:$0xff] }
 0x107   : > { %v4181_v22 = vpop.f32.mrf.mxu0  ;;  %739 = vmatpush.msrb.mxu1 %v471_v25  ;;  %v519_v25 = vld [vmem:[%s4009_s21 + $0x158] sm:$0xff] }
 0x10a   : > { %707 = vmatmul.f32.gmra.mxu0 %v515_v24  ;;  %v505_v24 = vld [vmem:[%s4009_s21 + $0xe8] sm:$0xff] }
 0x10b   : > { %660 = vmatmul.f32.gmra.mxu1 %v505_v24 }
 0x10f   : > { %v4185_v29 = vpop.f32.mrf.mxu0 }
 0x112   : > { %710 = vmatmul.f32.gmra.mxu0 %v516_v31  ;;  %v470_v31 = vld [vmem:[%s3944_s17 + $0x1d0] sm:$0xff] }
 0x113   : > { %740 = vmatpush.msrb.mxu1 %v470_v31  ;;  %v465_v31 = vld [vmem:[%s3944_s17 + $0x1a8] sm:$0xff] }
 0x115   : > { %741 = vmatpush.msrb.mxu1 %v469_v61  ;;  %v464_v61 = vld [vmem:[%s3944_s17 + $0x1a0] sm:$0xff] }
 0x117   : > { %v4191_v16 = vpop.f32.mrf.mxu0  ;;  %742 = vmatpush.msrb.mxu1 %v468_v62  ;;  %v4215_v62 = vld [vmem:[%s3944_s17 + $0x190] sm:$0xff] }
 0x118   : > { %5746 = vst [vmem:[#allocation28_spill] sm:$0xff] %v4215_v62 }
 0x119   : > { %743 = vmatpush.msrb.mxu1 %v467_v19  ;;  %v520_v19 = vld [vmem:[%s4009_s21 + $0x160] sm:$0xff] }
 0x11a   : > { %713 = vmatmul.f32.gmra.mxu0 %v517_v17  ;;  %v506_v17 = vld [vmem:[%s4009_s21 + $0xf0] sm:$0xff] }
 0x11b   : > { %663 = vmatmul.f32.gmra.mxu1 %v506_v17 }
 0x11c   : > { %744 = vmatpush.msrb.mxu1 %v466_v21  ;;  %v4222_v21 = vld [vmem:[%s3944_s17 + $0x188] sm:$0xff] }
 0x11d   : > { %5747 = vst [vmem:[#allocation29_spill] sm:$0xff] %v4222_v21 }
 0x11e   : > { %745 = vmatpush.msrb.mxu1 %v465_v31  ;;  %v4224_v31 = vpop.f32.mrf.mxu1 }
 0x11f   : > { %v4199_v41 = vpop.f32.mrf.mxu0 }
 0x120   : > { %746 = vmatpush.msrb.mxu1 %v464_v61  ;;  %v524_v61 = vld [vmem:[%s4009_s21 + $0x180] sm:$0xff] }
 0x122   : > { %716 = vmatmul.f32.gmra.mxu0 %v518_v50  ;;  %v507_v50 = vld [vmem:[%s4009_s21 + $0xf8] sm:$0xff]  ;;  %747 = vmatpush.msrb.mxu1 %v463_v34  ;;  %v4228_v34 = vld [vmem:[%s3944_s17 + $0x180] sm:$0xff] }
 0x123   : > { %666 = vmatmul.f32.gmra.mxu1 %v507_v50  ;;  %5748 = vst [vmem:[#allocation30_spill] sm:$0xff] %v4228_v34 }
 0x124   : > { %748 = vmatpush.msrb.mxu1 %v4215_v62  ;;  %v521_v62 = vld [vmem:[%s4009_s21 + $0x168] sm:$0xff] }
 0x126   : > { %749 = vmatpush.msrb.mxu1 %v4222_v21  ;;  %v4235_v36 = vpop.f32.mrf.mxu1 }
 0x127   : > { %v4207_v24 = vpop.f32.mrf.mxu0 }
 0x128   : > { %750 = vmatpush.msrb.mxu1 %v4228_v34 }
 0x12a   : > { %719 = vmatmul.f32.gmra.mxu0 %v519_v25  ;;  %v864_v25 = vld [vmem:[#allocation2] sm:$0xff] }
 0x12b   : > { %1076 = vmatpush.msra.mxu0 %v864_v25  ;;  %751 = vmatmul.f32.vlgmr.msrb.gmra.mxu1 %v524_v61  ;;  %v522_v25 = vld [vmem:[%s4009_s21 + $0x170] sm:$0xff]  ;;  %v523_v61 = vld [vmem:[%s4009_s21 + $0x178] sm:$0xff] }
 0x12f   : > { %v4217_v17 = vpop.f32.mrf.mxu0 }
 0x132   : > { %722 = vmatmul.f32.gmra.mxu0 %v520_v19  ;;  %v4241_v19 = vpop.f32.mrf.mxu1 }
 0x133   : > { %754 = vmatmul.f32.gmra.mxu1 %v525_v38  ;;  %v800_v38 = vadd.f32 %v4153_v20, %v4013_v15  ;;  %v802_v15 = vadd.f32 %v4161_v27, %v3998_v13  ;;  %v804_v13 = vadd.f32 %v4169_v57, %v3990_v11  ;;  %v806_v11 = vadd.f32 %v4177_v18, %v3982_v9 }
 0x134   : > { %v808_v9 = vadd.f32 %v4185_v29, %v3974_v7  ;;  %v1346_v7 = vld [vmem:[#allocation7 + $0x60] sm:$0xff]  ;;  %v537_v29 = vld [vmem:[%s4009_s21 + $0x1e8] sm:$0xff] }
 0x137   : > { %v4232_v50 = vpop.f32.mrf.mxu0 }
 0x13a   : > { %725 = vmatmul.f32.gmra.mxu0 %v521_v62  ;;  %v4247_v43 = vpop.f32.mrf.mxu1 }
 0x13b   : > { %757 = vmatmul.f32.gmra.mxu1 %v526_v40  ;;  %v528_v40 = vld [vmem:[%s4009_s21 + $0x1a0] sm:$0xff] }
 0x13f   : > { %v4238_v21 = vpop.f32.mrf.mxu0 }
 0x142   : > { %728 = vmatmul.f32.gmra.mxu0 %v522_v25  ;;  %v4254_v47 = vpop.f32.mrf.mxu1 }
 0x143   : > { %760 = vmatmul.f32.gmra.mxu1 %v527_v45 }
 0x147   : > { %v4244_v34 = vpop.f32.mrf.mxu0 }
 0x14a   : > { %731 = vmatmul.f32.gmra.mxu0 %v523_v61  ;;  %v801_v61 = vadd.f32 %v4157_v23, %v4002_v14  ;;  %v4262_v45 = vpop.f32.mrf.mxu1  ;;  %v803_v14 = vadd.f32 %v4165_v32, %v3994_v12  ;;  %v805_v12 = vadd.f32 %v4173_v63, %v3986_v10  ;;  %v807_v10 = vadd.f32 %v4181_v22, %v3978_v8  ;;  %v1348_v8 = vld [vmem:[#allocation7 + $0x70] sm:$0xff] }
 0x14b   : > { %763 = vmatmul.f32.gmra.mxu1 %v528_v40 }
 0x14f   : > { %v4250_v62 = vpop.f32.mrf.mxu0 }
 0x152   : > { %3304 = vmatmul.msk.f32.vlgmr.msra.gmra.mxu0 %vm868_vm0, %v800_v38  ;;  %v4270_v20 = vpop.f32.mrf.mxu1  ;;  %v530_v38 = vld [vmem:[%s4009_s21 + $0x1b0] sm:$0xff] }
 0x153   : > { %766 = vmatmul.f32.gmra.mxu1 %v529_v49  ;;  %v531_v49 = vld [vmem:[%s4009_s21 + $0x1b8] sm:$0xff] }
 0x157   : > { %v4258_v25 = vpop.f32.mrf.mxu0 }
 0x15a   : > { %3305 = vmatmul.msk.f32.gmra.mxu0 %vm868_vm0, %v801_v61  ;;  %v4278_v23 = vpop.f32.mrf.mxu1 }
 0x15b   : > { %769 = vmatmul.f32.gmra.mxu1 %v530_v38 }
 0x15f   : > { %v4266_v52 = vpop.f32.mrf.mxu0 }
 0x162   : > { %3306 = vmatmul.msk.f32.gmra.mxu0 %vm868_vm0, %v802_v15  ;;  %v4286_v27 = vpop.f32.mrf.mxu1  ;;  %v532_v15 = vld [vmem:[%s4009_s21 + $0x1c0] sm:$0xff] }
 0x163   : > { %772 = vmatmul.f32.gmra.mxu1 %v531_v49 }
 0x167   : > { %v4274_v40 = vpop.f32.mrf.mxu0 }
 0x16a   : > { %3307 = vmatmul.msk.f32.gmra.mxu0 %vm868_vm0, %v803_v14  ;;  %v4294_v32 = vpop.f32.mrf.mxu1  ;;  %v533_v14 = vld [vmem:[%s4009_s21 + $0x1c8] sm:$0xff] }
 0x16b   : > { %775 = vmatmul.f32.gmra.mxu1 %v532_v15 }
 0x16f   : > { %v4282_v61 = vpop.f32.mrf.mxu0 }
 0x172   : > { %3308 = vmatmul.msk.f32.gmra.mxu0 %vm868_vm0, %v804_v13  ;;  %v4302_v57 = vpop.f32.mrf.mxu1  ;;  %v534_v13 = vld [vmem:[%s4009_s21 + $0x1d0] sm:$0xff] }
 0x173   : > { %778 = vmatmul.f32.gmra.mxu1 %v533_v14 }
 0x177   : > { %v4290_v38 = vpop.f32.mrf.mxu0 }
 0x17a   : > { %3309 = vmatmul.msk.f32.gmra.mxu0 %vm868_vm0, %v805_v12  ;;  %v4310_v63 = vpop.f32.mrf.mxu1  ;;  %v535_v12 = vld [vmem:[%s4009_s21 + $0x1d8] sm:$0xff] }
 0x17b   : > { %781 = vmatmul.f32.gmra.mxu1 %v534_v13  ;;  %v1349_v13 = vld [vmem:[#allocation7 + $0x78] sm:$0xff] }
 0x17c   : > { %1352 = vmatpush.msra.mxu1 %v1349_v13 }
 0x17e   : > { %1353 = vmatpush.msra.mxu1 %v1348_v8 }
 0x17f   : > { %v4298_v49 = vpop.f32.mrf.mxu0 }
 0x182   : > { %3310 = vmatmul.msk.f32.gmra.mxu0 %vm868_vm0, %v806_v11  ;;  %v4318_v18 = vpop.f32.mrf.mxu1  ;;  %v536_v11 = vld [vmem:[%s4009_s21 + $0x1e0] sm:$0xff] }
 0x183   : > { %784 = vmatmul.f32.gmra.mxu1 %v535_v12  ;;  %v1347_v12 = vld [vmem:[#allocation7 + $0x68] sm:$0xff] }
 0x184   : > { %1354 = vmatpush.msra.mxu1 %v1347_v12  ;;  %v538_v12 = vld [vmem:[%s4009_s21 + $0x1f0] sm:$0xff] }
 0x186   : > { %1355 = vmatpush.msra.mxu1 %v1346_v7  ;;  %v1340_v7 = vld [vmem:[#allocation7 + $0x30] sm:$0xff] }
 0x187   : > { %v4306_v15 = vpop.f32.mrf.mxu0 }
 0x18a   : > { %3311 = vmatmul.msk.f32.gmra.mxu0 %vm868_vm0, %v807_v10  ;;  %v809_v10 = vadd.f32 %v4191_v16, %v3970_v6  ;;  %v810_v6 = vadd.f32 %v4199_v41, %v3966_v5  ;;  %v1343_v16 = vld [vmem:[#allocation7 + $0x48] sm:$0xff]  ;;  %v811_v5 = vadd.f32 %v4207_v24, %v3962_v4 }
 0x18b   : > { %787 = vmatmul.f32.gmra.mxu1 %v536_v11  ;;  %v1344_v11 = vld [vmem:[#allocation7 + $0x50] sm:$0xff]  ;;  %v1339_v41 = vld [vmem:[#allocation7 + $0x28] sm:$0xff] }
 0x18c   : > { %v1335_v4 = vld [vmem:[#allocation7 + $0x8] sm:$0xff] }
 0x18f   : > { %v4314_v14 = vpop.f32.mrf.mxu0 }
 0x190   : > { %5749 = vst [vmem:[#allocation31_spill] sm:$0xff] %v4314_v14  ;;  %v4326_v14 = vpop.f32.mrf.mxu1 }
 0x192   : > { %3312 = vmatmul.msk.f32.gmra.mxu0 %vm868_vm0, %v808_v9  ;;  %v1345_v9 = vld [vmem:[#allocation7 + $0x58] sm:$0xff] }
 0x193   : > { %790 = vmatmul.f32.gmra.mxu1 %v537_v29 }
 0x194   : > { %1356 = vmatpush.msra.mxu1 %v1345_v9 }
 0x196   : > { %1357 = vmatpush.msra.mxu1 %v1344_v11  ;;  %v1338_v11 = vld [vmem:[#allocation7 + $0x20] sm:$0xff] }
 0x197   : > { %v4322_v22 = vpop.f32.mrf.mxu0 }
 0x198   : > { %5750 = vst [vmem:[#allocation32_spill] sm:$0xff] %v4322_v22  ;;  %v4334_v8 = vpop.f32.mrf.mxu1  ;;  %1358 = vmatpush.msra.mxu1 %v1343_v16  ;;  %v1341_v22 = vld [vmem:[#allocation7 + $0x38] sm:$0xff] }
 0x199   : > { %v1337_v16 = vld [vmem:[#allocation7 + $0x18] sm:$0xff] }
 0x19a   : > { %3313 = vmatmul.msk.f32.gmra.mxu0 %vm868_vm0, %v809_v10  ;;  %v1342_v10 = vld [vmem:[#allocation7 + $0x40] sm:$0xff] }
 0x19b   : > { %1359 = vmatpush.msra.mxu1 %v1342_v10 }
 0x19c   : > { %793 = vmatmul.f32.gmra.mxu1 %v538_v12  ;;  %v812_v12 = vadd.f32 %v4217_v17, %v3958_v3  ;;  %v814_v3 = vadd.f32 %v4238_v21, %v3950_v1 }
 0x19d   : > { %1360 = vmatpush.msra.mxu1 %v1341_v22  ;;  %v1336_v22 = vld [vmem:[#allocation7 + $0x10] sm:$0xff] }
 0x19f   : > { %v4330_v13 = vpop.f32.mrf.mxu0  ;;  %1361 = vmatpush.msra.mxu1 %v1340_v7  ;;  %v1334_v7 = vld [vmem:[#allocation7] sm:$0xff] }
 0x1a0   : > { %v4342_v9 = vpop.f32.mrf.mxu1 }
 0x1a1   : > { %1362 = vmatpush.msra.mxu1 %v1339_v41  ;;  %v813_v41 = vadd.f32 %v4232_v50, %v3954_v2  ;;  %v4372_v2 = vld [vmem:[#allocation5] ss:$0 sm:$0xff] }
 0x1a2   : > { %3314 = vmatmul.msk.f32.gmra.mxu0 %vm868_vm0, %v810_v6  ;;  %v539_v6 = vld [vmem:[%s4009_s21 + $0x1f8] sm:$0xff] }
 0x1a3   : > { %1363 = vmatpush.msra.mxu1 %v1338_v11 }
 0x1a4   : > { %796 = vmatmul.f32.gmra.mxu1 %v539_v6 }
 0x1a5   : > { %1364 = vmatpush.msra.mxu1 %v1337_v16 }
 0x1a7   : > { %v4338_v29 = vpop.f32.mrf.mxu0  ;;  %1365 = vmatpush.msra.mxu1 %v1336_v22  ;;  %v815_v22 = vadd.f32 %v4244_v34, %v3947_v0  ;;  %v817_v0 = vadd.f32 %v4235_v36, %v4135_v58  ;;  %v819_v58 = vadd.f32 %v4247_v43, %v4116_v53  ;;  %v821_v53 = vadd.f32 %v4262_v45, %v4099_v48 }
 0x1a8   : > { %v4350_v24 = vpop.f32.mrf.mxu1  ;;  %v823_v48 = vadd.f32 %v4278_v23, %v4083_v44  ;;  %v825_v23 = vadd.f32 %v4294_v32, %v4066_v39  ;;  %v827_v39 = vadd.f32 %v4310_v63, %v4050_v35  ;;  %v829_v63 = vadd.f32 %v4326_v14, %v4037_v30 }
 0x1a9   : > { %1366 = vmatpush.msra.mxu1 %v1335_v4  ;;  %v816_v4 = vadd.f32 %v4224_v31, %v4143_v60  ;;  %v818_v60 = vadd.f32 %v4241_v19, %v4126_v55  ;;  %v820_v19 = vadd.f32 %v4254_v47, %v4110_v51  ;;  %v822_v47 = vadd.f32 %v4270_v20, %v4091_v46 }
 0x1aa   : > { %3315 = vmatmul.msk.f32.gmra.mxu0 %vm868_vm0, %v811_v5  ;;  %v824_v20 = vadd.f32 %v4286_v27, %v4077_v42  ;;  %v826_v27 = vadd.f32 %v4302_v57, %v4058_v37  ;;  %v828_v37 = vadd.f32 %v4318_v18, %v4044_v33  ;;  %v830_v18 = vadd.f32 %v4334_v8, %v4033_v28 }
 0x1ab   : > { %1367 = vmatpush.msra.mxu1 %v1334_v7  ;;  %v831_v14 = vadd.f32 %v4342_v9, %v4028_v26  ;;  %v832_v8 = vadd.f32 %v4250_v62, %v4138_v59  ;;  %v833_v9 = vadd.f32 %v4258_v25, %v4129_v56  ;;  %v834_v62 = vadd.f32 %v4266_v52, %v4121_v54  ;;  %v5751_v25 = vld [vmem:[#allocation27_spill] sm:$0xff]  ;;  %v5752_v54 = vld [vmem:[#allocation26_spill] sm:$0xff] }
 0x1af   : > { %v4346_v10 = vpop.f32.mrf.mxu0 }
 0x1b0   : > { %v4358_v11 = vpop.f32.mrf.mxu1 }
 0x1b2   : > { %3316 = vmatmul.msk.f32.gmra.mxu0 %vm868_vm0, %v812_v12 }
 0x1b7   : > { %v4353_v5 = vpop.f32.mrf.mxu0 }
 0x1b8   : > { %v4365_v17 = vpop.f32.mrf.mxu1 }
 0x1ba   : > { %3317 = vmatmul.msk.f32.gmra.mxu0 %vm868_vm0, %v813_v41 }
 0x1bf   : > { %v4360_v6 = vpop.f32.mrf.mxu0 }
 0x1c0   : > { %v4374_v12 = vpop.f32.mrf.mxu1 }
 0x1c2   : > { %3318 = vmatmul.msk.f32.gmra.mxu0 %vm868_vm0, %v814_v3 }
 0x1c7   : > { %v4367_v16 = vpop.f32.mrf.mxu0 }
 0x1c8   : > { %v4383_v41 = vpop.f32.mrf.mxu1 }
 0x1ca   : > { %3319 = vmatmul.msk.f32.gmra.mxu0 %vm868_vm0, %v815_v22 }
 0x1cf   : > { %v1078_v50 = vpop.f32.mrf.mxu0 }
 0x1d0   : > { %v1079_v1 = vadd.f32 %v4372_v2, %v1078_v50 }
 0x1d2   : > { %v1270_v21 = vmax.f32 %v1079_v1, 0.0  ;;  %3320 = vmatmul.msk.f32.gmra.mxu0 %vm868_vm0, %v816_v4  ;;  %v4390_v4 = vpop.f32.mrf.mxu1 }
 0x1d4   : > { %1368 = vmatmul.f32.vlgmr.msra.gmra.mxu1 %v1270_v21 }
 0x1d7   : > { %v1081_v7 = vpop.f32.mrf.mxu0 }
 0x1d8   : > { %v1082_v34 = vadd.f32 %v4372_v2, %v1081_v7 }
 0x1da   : > { %v1271_v3 = vmax.f32 %v1082_v34, 0.0  ;;  %3321 = vmatmul.msk.f32.gmra.mxu0 %vm868_vm0, %v817_v0  ;;  %v4396_v7 = vpop.f32.mrf.mxu1 }
 0x1dc   : > { %1371 = vmatmul.f32.gmra.mxu1 %v1271_v3 }
 0x1df   : > { %v1084_v22 = vpop.f32.mrf.mxu0 }
 0x1e0   : > { %v1085_v31 = vadd.f32 %v4372_v2, %v1084_v22 }
 0x1e2   : > { %v1272_v50 = vmax.f32 %v1085_v31, 0.0  ;;  %3322 = vmatmul.msk.f32.gmra.mxu0 %vm868_vm0, %v818_v60  ;;  %v4402_v43 = vpop.f32.mrf.mxu1 }
 0x1e4   : > { %1374 = vmatmul.f32.gmra.mxu1 %v1272_v50 }
 0x1e7   : > { %v1087_v36 = vpop.f32.mrf.mxu0 }
 0x1e8   : > { %v1088_v1 = vadd.f32 %v4372_v2, %v1087_v36 }
 0x1ea   : > { %v1273_v21 = vmax.f32 %v1088_v1, 0.0  ;;  %3323 = vmatmul.msk.f32.gmra.mxu0 %vm868_vm0, %v819_v58  ;;  %v4411_v50 = vpop.f32.mrf.mxu1 }
 0x1ec   : > { %1377 = vmatmul.f32.gmra.mxu1 %v1273_v21 }
 0x1ef   : > { %v1090_v55 = vpop.f32.mrf.mxu0 }
 0x1f0   : > { %v1091_v0 = vadd.f32 %v4372_v2, %v1090_v55 }
 0x1f2   : > { %v1274_v34 = vmax.f32 %v1091_v0, 0.0  ;;  %3324 = vmatmul.msk.f32.gmra.mxu0 %vm868_vm0, %v820_v19  ;;  %v4418_v21 = vpop.f32.mrf.mxu1 }
 0x1f4   : > { %1380 = vmatmul.f32.gmra.mxu1 %v1274_v34 }
 0x1f7   : > { %v1093_v3 = vpop.f32.mrf.mxu0 }
 0x1f8   : > { %v1094_v22 = vadd.f32 %v4372_v2, %v1093_v3 }
 0x1fa   : > { %v1275_v60 = vmax.f32 %v1094_v22, 0.0  ;;  %3325 = vmatmul.msk.f32.gmra.mxu0 %vm868_vm0, %v821_v53  ;;  %v4424_v0 = vpop.f32.mrf.mxu1 }
 0x1fc   : > { %1383 = vmatmul.f32.gmra.mxu1 %v1275_v60 }
 0x1ff   : > { %v1096_v31 = vpop.f32.mrf.mxu0 }
 0x200   : > { %v1097_v51 = vadd.f32 %v4372_v2, %v1096_v31 }
 0x202   : > { %v1276_v36 = vmax.f32 %v1097_v51, 0.0  ;;  %3326 = vmatmul.msk.f32.gmra.mxu0 %vm868_vm0, %v822_v47  ;;  %v4430_v42 = vpop.f32.mrf.mxu1 }
 0x204   : > { %1386 = vmatmul.f32.gmra.mxu1 %v1276_v36 }
 0x207   : > { %v1099_v58 = vpop.f32.mrf.mxu0 }
 0x208   : > { %v1100_v45 = vadd.f32 %v4372_v2, %v1099_v58 }
 0x20a   : > { %v1277_v1 = vmax.f32 %v1100_v45, 0.0  ;;  %3327 = vmatmul.msk.f32.gmra.mxu0 %vm868_vm0, %v823_v48  ;;  %v4439_v47 = vpop.f32.mrf.mxu1 }
 0x20c   : > { %1389 = vmatmul.f32.gmra.mxu1 %v1277_v1 }
 0x20f   : > { %v1102_v46 = vpop.f32.mrf.mxu0 }
 0x210   : > { %v1103_v55 = vadd.f32 %v4372_v2, %v1102_v46 }
 0x212   : > { %v1278_v19 = vmax.f32 %v1103_v55, 0.0  ;;  %3328 = vmatmul.msk.f32.gmra.mxu0 %vm868_vm0, %v824_v20  ;;  %v4446_v48 = vpop.f32.mrf.mxu1 }
 0x214   : > { %1392 = vmatmul.f32.gmra.mxu1 %v1278_v19 }
 0x217   : > { %v1105_v44 = vpop.f32.mrf.mxu0 }
 0x218   : > { %v1106_v34 = vadd.f32 %v4372_v2, %v1105_v44 }
 0x21a   : > { %v1279_v3 = vmax.f32 %v1106_v34, 0.0  ;;  %3329 = vmatmul.msk.f32.gmra.mxu0 %vm868_vm0, %v825_v23  ;;  %v4452_v46 = vpop.f32.mrf.mxu1 }
 0x21c   : > { %1395 = vmatmul.f32.gmra.mxu1 %v1279_v3 }
 0x21f   : > { %v1108_v53 = vpop.f32.mrf.mxu0 }
 0x220   : > { %v1109_v22 = vadd.f32 %v4372_v2, %v1108_v53 }
 0x222   : > { %v1280_v60 = vmax.f32 %v1109_v22, 0.0  ;;  %3330 = vmatmul.msk.f32.gmra.mxu0 %vm868_vm0, %v826_v27  ;;  %v4458_v30 = vpop.f32.mrf.mxu1 }
 0x224   : > { %1398 = vmatmul.f32.gmra.mxu1 %v1280_v60 }
 0x227   : > { %v1111_v31 = vpop.f32.mrf.mxu0 }
 0x228   : > { %v1112_v32 = vadd.f32 %v4372_v2, %v1111_v31 }
 0x22a   : > { %v1281_v51 = vmax.f32 %v1112_v32, 0.0  ;;  %3331 = vmatmul.msk.f32.gmra.mxu0 %vm868_vm0, %v827_v39 }
 0x22c   : > { %1401 = vmatmul.f32.gmra.mxu1 %v1281_v51  ;;  %v835_v51 = vadd.f32 %v4274_v40, %v5751_v25  ;;  %v5759_v25 = vld [vmem:[#allocation32_spill] sm:$0xff] }
 0x22f   : > { %v1114_v36 = vpop.f32.mrf.mxu0 }
 0x230   : > { %v1115_v57 = vadd.f32 %v4372_v2, %v1114_v36 }
 0x232   : > { %v1282_v58 = vmax.f32 %v1115_v57, 0.0  ;;  %3332 = vmatmul.msk.f32.gmra.mxu0 %vm868_vm0, %v828_v37 }
 0x234   : > { %1404 = vmatmul.f32.gmra.mxu1 %v1282_v58  ;;  %v836_v58 = vadd.f32 %v4282_v61, %v5752_v54 }
 0x237   : > { %v1117_v35 = vpop.f32.mrf.mxu0 }
 0x238   : > { %v1118_v45 = vadd.f32 %v4372_v2, %v1117_v35 }
 0x23a   : > { %v1283_v1 = vmax.f32 %v1118_v45, 0.0  ;;  %3333 = vmatmul.msk.f32.gmra.mxu0 %vm868_vm0, %v829_v63 }
 0x23c   : > { %1407 = vmatmul.f32.gmra.mxu1 %v1283_v1  ;;  %v5753_v1 = vld [vmem:[#allocation25_spill] sm:$0xff] }
 0x23f   : > { %v1120_v33 = vpop.f32.mrf.mxu0 }
 0x240   : > { %v1121_v20 = vadd.f32 %v4372_v2, %v1120_v33  ;;  %v837_v33 = vadd.f32 %v4290_v38, %v5753_v1  ;;  %v5755_v38 = vld [vmem:[#allocation23_spill] sm:$0xff] }
 0x242   : > { %v1284_v55 = vmax.f32 %v1121_v20, 0.0  ;;  %3334 = vmatmul.msk.f32.gmra.mxu0 %vm868_vm0, %v830_v18 }
 0x244   : > { %1410 = vmatmul.f32.gmra.mxu1 %v1284_v55 }
 0x247   : > { %v1123_v19 = vpop.f32.mrf.mxu0 }
 0x248   : > { %v1124_v44 = vadd.f32 %v4372_v2, %v1123_v19  ;;  %v5754_v19 = vld [vmem:[#allocation24_spill] sm:$0xff] }
 0x24a   : > { %v1285_v23 = vmax.f32 %v1124_v44, 0.0  ;;  %3335 = vmatmul.msk.f32.gmra.mxu0 %vm868_vm0, %v831_v14  ;;  %v838_v14 = vadd.f32 %v4298_v49, %v5754_v19  ;;  %v5756_v49 = vld [vmem:[#allocation22_spill] sm:$0xff] }
 0x24c   : > { %1413 = vmatmul.f32.gmra.mxu1 %v1285_v23 }
 0x24f   : > { %v1126_v28 = vpop.f32.mrf.mxu0 }
 0x250   : > { %v1127_v34 = vadd.f32 %v4372_v2, %v1126_v28 }
 0x251   : > { %v4467_v3 = vpop.f32.mrf.mxu1 }
 0x252   : > { %v1286_v53 = vmax.f32 %v1127_v34, 0.0  ;;  %3336 = vmatmul.msk.f32.gmra.mxu0 %vm868_vm0, %v832_v8  ;;  %v839_v34 = vadd.f32 %v4306_v15, %v5755_v38  ;;  %v5758_v15 = vld [vmem:[#allocation21_spill] sm:$0xff] }
 0x254   : > { %1416 = vmatmul.f32.gmra.mxu1 %v1286_v53 }
 0x257   : > { %v1129_v26 = vpop.f32.mrf.mxu0 }
 0x258   : > { %v1130_v27 = vadd.f32 %v4372_v2, %v1129_v26 }
 0x259   : > { %v4473_v22 = vpop.f32.mrf.mxu1 }
 0x25a   : > { %v1287_v60 = vmax.f32 %v1130_v27, 0.0  ;;  %3337 = vmatmul.msk.f32.gmra.mxu0 %vm868_vm0, %v833_v9 }
 0x25c   : > { %1419 = vmatmul.f32.gmra.mxu1 %v1287_v60  ;;  %v5757_v60 = vld [vmem:[#allocation31_spill] sm:$0xff] }
 0x25f   : > { %v1132_v59 = vpop.f32.mrf.mxu0 }
 0x260   : > { %v1133_v31 = vadd.f32 %v4372_v2, %v1132_v59  ;;  %v840_v59 = vadd.f32 %v5757_v60, %v5756_v49 }
 0x261   : > { %v4480_v39 = vpop.f32.mrf.mxu1 }
 0x262   : > { %v1288_v32 = vmax.f32 %v1133_v31, 0.0  ;;  %3338 = vmatmul.msk.f32.gmra.mxu0 %vm868_vm0, %v834_v62 }
 0x264   : > { %1422 = vmatmul.f32.gmra.mxu1 %v1288_v32 }
 0x267   : > { %v1135_v56 = vpop.f32.mrf.mxu0 }
 0x268   : > { %v1136_v36 = vadd.f32 %v4372_v2, %v1135_v56 }
 0x269   : > { %v1378_v37 = vpop.f32.mrf.mxu1 }
 0x26a   : > { %v1289_v57 = vmax.f32 %v1136_v36, 0.0  ;;  %3339 = vmatmul.msk.f32.gmra.mxu0 %vm868_vm0, %v835_v51  ;;  %v841_v51 = vadd.f32 %v5759_v25, %v5758_v15  ;;  %v3492_v25 = vld [vmem:[%s3944_s17 + $0x168] sm:$0xff] }
 0x26c   : > { %1425 = vmatmul.f32.gmra.mxu1 %v1289_v57 }
 0x26f   : > { %v1138_v52 = vpop.f32.mrf.mxu0 }
 0x270   : > { %v1139_v35 = vadd.f32 %v4372_v2, %v1138_v52 }
 0x271   : > { %v4490_v63 = vpop.f32.mrf.mxu1 }
 0x272   : > { %v1290_v45 = vmax.f32 %v1139_v35, 0.0  ;;  %3340 = vmatmul.msk.f32.gmra.mxu0 %vm868_vm0, %v836_v58  ;;  %v5760_v58 = vld [vmem:[#allocation20_spill] sm:$0xff] }
 0x273   : > { %v842_v35 = vadd.f32 %v4330_v13, %v5760_v58  ;;  %v4521_v13 = vld [vmem:[#allocation8] ss:$0 sm:$0xff] }
 0x274   : > { %1428 = vmatmul.f32.gmra.mxu1 %v1290_v45  ;;  %v4557_v60 = vadd.f32 %v4521_v13, %v4473_v22 }
 0x277   : > { %v1141_v40 = vpop.f32.mrf.mxu0 }
 0x278   : > { %v1142_v18 = vadd.f32 %v4372_v2, %v1141_v40 }
 0x279   : > { %v1384_v20 = vpop.f32.mrf.mxu1 }
 0x27a   : > { %v1291_v55 = vmax.f32 %v1142_v18, 0.0  ;;  %3341 = vmatmul.msk.f32.gmra.mxu0 %vm868_vm0, %v837_v33  ;;  %v5761_v18 = vld [vmem:[#allocation19_spill] sm:$0xff] }
 0x27c   : > { %1431 = vmatmul.f32.gmra.mxu1 %v1291_v55  ;;  %v843_v55 = vadd.f32 %v4338_v29, %v5761_v18  ;;  %v4531_v29 = vadd.f32 %v4521_v13, %v4480_v39 }
 0x27f   : > { %v1144_v61 = vpop.f32.mrf.mxu0 }
 0x280   : > { %v1145_v44 = vadd.f32 %v4372_v2, %v1144_v61 }
 0x281   : > { %v1387_v23 = vpop.f32.mrf.mxu1 }
 0x282   : > { %v1292_v28 = vmax.f32 %v1145_v44, 0.0  ;;  %3342 = vmatmul.msk.f32.gmra.mxu0 %vm868_vm0, %v838_v14  ;;  %v4524_v44 = vadd.f32 %v4521_v13, %v1378_v37  ;;  %v4544_v37 = vadd.f32 %v4521_v13, %v4490_v63 }
 0x284   : > { %1434 = vmatmul.f32.gmra.mxu1 %v1292_v28 }
 0x287   : > { %v1147_v8 = vpop.f32.mrf.mxu0 }
 0x288   : > { %v1148_v53 = vadd.f32 %v4372_v2, %v1147_v8  ;;  %v3491_v8 = vld [vmem:[%s3944_s17 + $0x160] sm:$0xff] }
 0x289   : > { %v1390_v26 = vpop.f32.mrf.mxu1  ;;  %v844_v38 = vadd.f32 %v3491_v8, %v4346_v10  ;;  %v1568_v10 = vadd.f32 %v4524_v44, %v4531_v29 }
 0x28a   : > { %v1293_v9 = vmax.f32 %v1148_v53, 0.0  ;;  %3343 = vmatmul.msk.f32.gmra.mxu0 %vm868_vm0, %v839_v34  ;;  %v4534_v53 = vadd.f32 %v4521_v13, %v1384_v20  ;;  %v4550_v20 = vadd.f32 %v4521_v13, %v1387_v23 }
 0x28c   : > { %1437 = vmatmul.f32.gmra.mxu1 %v1293_v9 }
 0x28f   : > { %v1150_v27 = vpop.f32.mrf.mxu0 }
 0x290   : > { %v1151_v62 = vadd.f32 %v4372_v2, %v1150_v27  ;;  %v4537_v27 = vadd.f32 %v4521_v13, %v1390_v26 }
 0x291   : > { %v1393_v31 = vpop.f32.mrf.mxu1 }
 0x292   : > { %v1294_v32 = vmax.f32 %v1151_v62, 0.0  ;;  %3344 = vmatmul.msk.f32.gmra.mxu0 %vm868_vm0, %v840_v59  ;;  %v1575_v59 = vadd.f32 %v4534_v53, %v4544_v37  ;;  %v4562_v63 = vadd.f32 %v4521_v13, %v1393_v31  ;;  %v1582_v62 = vadd.f32 %v4537_v27, %v4550_v20 }
 0x294   : > { %1440 = vmatmul.f32.gmra.mxu1 %v1294_v32  ;;  %v4571_v32 = vadd.f32 %v4521_v13, %v4467_v3  ;;  %v1583_v3 = vrot.slane %v1582_v62, 4 }
 0x297   : > { %v1153_v56 = vpop.f32.mrf.mxu0 }
 0x298   : > { %v1154_v36 = vadd.f32 %v4372_v2, %v1153_v56  ;;  %v1569_v56 = vrot.slane %v1568_v10, 4 }
 0x299   : > { %v1396_v57 = vpop.f32.mrf.mxu1 }
 0x29a   : > { %v1295_v52 = vmax.f32 %v1154_v36, 0.0  ;;  %3345 = vmatmul.msk.f32.gmra.mxu0 %vm868_vm0, %v841_v51  ;;  %v4547_v39 = vadd.f32 %v4521_v13, %v1396_v57  ;;  %v845_v51 = vadd.f32 %v3492_v25, %v4353_v5  ;;  %v1561_v57 = vadd.f32 %v4557_v60, %v4571_v32 }
 0x29b   : > { %v1570_v5 = vadd.f32 %v1569_v56, %v1568_v10 }
 0x29c   : > { %1443 = vmatmul.f32.gmra.mxu1 %v1295_v52  ;;  %v1589_v22 = vadd.f32 %v4547_v39, %v4562_v63  ;;  %v1576_v52 = vrot.slane %v1575_v59, 4  ;;  %v1562_v18 = vrot.slane %v1561_v57, 4 }
 0x29e   : > { %v1563_v10 = vadd.f32 %v1562_v18, %v1561_v57  ;;  %v3494_v57 = vld [vmem:[%s3944_s17 + $0x178] sm:$0xff] }
 0x29f   : > { %v1156_v54 = vpop.f32.mrf.mxu0 }
 0x2a0   : > { %v1157_v45 = vadd.f32 %v4372_v2, %v1156_v54 }
 0x2a1   : > { %v1399_v40 = vpop.f32.mrf.mxu1 }
 0x2a2   : > { %v1296_v1 = vmax.f32 %v1157_v45, 0.0  ;;  %3346 = vmatmul.msk.f32.gmra.mxu0 %vm868_vm0, %v842_v35  ;;  %v4567_v23 = vadd.f32 %v4521_v13, %v1399_v40  ;;  %v1590_v40 = vrot.slane %v1589_v22, 4 }
 0x2a4   : > { %1446 = vmatmul.f32.gmra.mxu1 %v1296_v1 }
 0x2a7   : > { %v1159_v33 = vpop.f32.mrf.mxu0 }
 0x2a8   : > { %v1160_v61 = vadd.f32 %v4372_v2, %v1159_v33 }
 0x2a9   : > { %v1402_v19 = vpop.f32.mrf.mxu1 }
 0x2aa   : > { %v1297_v14 = vmax.f32 %v1160_v61, 0.0  ;;  %3347 = vmatmul.msk.f32.gmra.mxu0 %vm868_vm0, %v843_v55  ;;  %v4553_v26 = vadd.f32 %v4521_v13, %v1402_v19  ;;  %v1577_v55 = vadd.f32 %v1576_v52, %v1575_v59  ;;  %v1584_v61 = vadd.f32 %v1583_v3, %v1582_v62 }
 0x2ac   : > { %1449 = vmatmul.f32.gmra.mxu1 %v1297_v14  ;;  %v1596_v31 = vadd.f32 %v4553_v26, %v4567_v23  ;;  %v1571_v14 = vrot.slane %v1570_v5, 2  ;;  %v1578_v56 = vrot.slane %v1577_v55, 2 }
 0x2ae   : > { %v1597_v1 = vrot.slane %v1596_v31, 4  ;;  %v1572_v59 = vadd.f32 %v1571_v14, %v1570_v5 }
 0x2af   : > { %v1162_v28 = vpop.f32.mrf.mxu0 }
 0x2b0   : > { %v1163_v34 = vadd.f32 %v4372_v2, %v1162_v28  ;;  %v1591_v28 = vadd.f32 %v1590_v40, %v1589_v22  ;;  %v1564_v22 = vrot.slane %v1563_v10, 2 }
 0x2b1   : > { %v1405_v9 = vpop.f32.mrf.mxu1 }
 0x2b2   : > { %v1298_v49 = vmax.f32 %v1163_v34, 0.0  ;;  %3348 = vmatmul.msk.f32.gmra.mxu0 %vm868_vm0, %v844_v38  ;;  %v4583_v58 = vadd.f32 %v4521_v13, %v1405_v9  ;;  %v3493_v38 = vld [vmem:[%s3944_s17 + $0x170] sm:$0xff]  ;;  %v1598_v9 = vadd.f32 %v1597_v1, %v1596_v31  ;;  %v1592_v62 = vrot.slane %v1591_v28, 2 }
 0x2b3   : > { %v846_v34 = vadd.f32 %v3493_v38, %v4360_v6  ;;  %v1573_v31 = vrot.slane %v1572_v59, 1  ;;  %v847_v1 = vadd.f32 %v3494_v57, %v4367_v16 }
 0x2b4   : > { %1452 = vmatmul.f32.gmra.mxu1 %v1298_v49  ;;  %5762 = vst [vmem:[#allocation27_spill] sm:$0xff] %v4583_v58  ;;  %v1599_v52 = vrot.slane %v1598_v9, 2 }
 0x2b7   : > { %v1165_v15 = vpop.f32.mrf.mxu0 }
 0x2b8   : > { %v1166_v36 = vadd.f32 %v4372_v2, %v1165_v15 }
 0x2b9   : > { %v1408_v54 = vpop.f32.mrf.mxu1 }
 0x2ba   : > { %v1299_v35 = vmax.f32 %v1166_v36, 0.0  ;;  %v4586_v45 = vadd.f32 %v4521_v13, %v1408_v54  ;;  %3349 = vmatmul.msk.f32.gmra.mxu0 %vm868_vm0, %v845_v51  ;;  %v1585_v51 = vrot.slane %v1584_v61, 2  ;;  %v1579_v54 = vadd.f32 %v1578_v56, %v1577_v55  ;;  %v4608_v56 = vld [vmem:[#allocation10] ss:$0 sm:$0xff] }
 0x2bc   : > { %5763 = vst [vmem:[#allocation26_spill] sm:$0xff] %v4586_v45  ;;  %v1603_v33 = vadd.f32 %v4586_v45, %v4583_v58  ;;  %1455 = vmatmul.f32.gmra.mxu1 %v1299_v35  ;;  %v1586_v6 = vadd.f32 %v1585_v51, %v1584_v61  ;;  %v1593_v35 = vadd.f32 %v1592_v62, %v1591_v28 }
 0x2bd   : > { %v1574_v28 = vadd.f32 %v1573_v31, %v1572_v59 }
 0x2be   : > { %v1604_v19 = vrot.slane %v1603_v33, 4  ;;  %v1587_v14 = vrot.slane %v1586_v6, 1 }
 0x2bf   : > { %v1168_v8 = vpop.f32.mrf.mxu0  ;;  %v1788_v62 = vadd.f32 %v4608_v56, %v1574_v28 }
 0x2c0   : > { %v1169_v49 = vadd.f32 %v4372_v2, %v1168_v8  ;;  %v1605_v15 = vadd.f32 %v1604_v19, %v1603_v33  ;;  %v1600_v33 = vadd.f32 %v1599_v52, %v1598_v9  ;;  %v1565_v19 = vadd.f32 %v1564_v22, %v1563_v10  ;;  %v5766_v22 = vld [vmem:[#allocation30_spill] sm:$0xff] }
 0x2c1   : > { %v1411_v25 = vpop.f32.mrf.mxu1  ;;  %v1580_v8 = vrot.slane %v1579_v54, 1  ;;  %v1588_v51 = vadd.f32 %v1587_v14, %v1586_v6 }
 0x2c2   : > { %v1300_v36 = vmax.f32 %v1169_v49, 0.0  ;;  %3350 = vmatmul.msk.f32.gmra.mxu0 %vm868_vm0, %v846_v34  ;;  %v1606_v3 = vrot.slane %v1605_v15, 2  ;;  %v4599_v34 = vadd.f32 %v4521_v13, %v1411_v25  ;;  %v1594_v49 = vrot.slane %v1593_v35, 1 }
 0x2c3   : > { %v1601_v16 = vrot.slane %v1600_v33, 1  ;;  %v1566_v10 = vrot.slane %v1565_v19, 1 }
 0x2c4   : > { %1458 = vmatmul.f32.gmra.mxu1 %v1300_v36  ;;  %v1607_v38 = vadd.f32 %v1606_v3, %v1605_v15  ;;  %5764 = vst [vmem:[#allocation25_spill] sm:$0xff] %v4599_v34  ;;  %v1581_v15 = vadd.f32 %v1580_v8, %v1579_v54  ;;  %v1595_v59 = vadd.f32 %v1594_v49, %v1593_v35 }
 0x2c5   : > { %v848_v3 = vadd.f32 %v4350_v24, %v5766_v22  ;;  %v1602_v31 = vadd.f32 %v1601_v16, %v1600_v33  ;;  %v1790_v8 = vadd.f32 %v4608_v56, %v1588_v51  ;;  %v1851_v24 = vrot.slane %v1788_v62, 7 }
 0x2c6   : > { %v1608_v25 = vrot.slane %v1607_v38, 1  ;;  %v1789_v54 = vadd.f32 %v4608_v56, %v1581_v15  ;;  %v1791_v33 = vadd.f32 %v4608_v56, %v1595_v59 }
 0x2c7   : > { %v1171_v40 = vpop.f32.mrf.mxu0  ;;  %v1792_v14 = vadd.f32 %v4608_v56, %v1602_v31  ;;  %v1857_v49 = vrot.slane %v1790_v8, 5 }
 0x2c8   : > { %v1172_v18 = vadd.f32 %v4372_v2, %v1171_v40  ;;  %v1609_v6 = vadd.f32 %v1608_v25, %v1607_v38  ;;  %v1860_v25 = vrot.slane %v1791_v33, 4 }
 0x2c9   : > { %v1414_v5 = vpop.f32.mrf.mxu1 }
 0x2ca   : > { %v1301_v55 = vmax.f32 %v1172_v18, 0.0  ;;  %v4602_v61 = vadd.f32 %v4521_v13, %v1414_v5  ;;  %3351 = vmatmul.msk.f32.gmra.mxu0 %vm868_vm0, %v847_v1  ;;  %v1567_v1 = vadd.f32 %v1566_v10, %v1565_v19  ;;  %v1793_v28 = vadd.f32 %v4608_v56, %v1609_v6 }
 0x2cc   : > { %5765 = vst [vmem:[#allocation24_spill] sm:$0xff] %v4602_v61  ;;  %v1610_v9 = vadd.f32 %v4602_v61, %v4599_v34  ;;  %1461 = vmatmul.f32.gmra.mxu1 %v1301_v55  ;;  %1922 = vmatpush.msra.mxu2 %v4602_v61  ;;  %v1787_v38 = vadd.f32 %v4608_v56, %v1567_v1  ;;  %v1854_v55 = vrot.slane %v1789_v54, 6  ;;  %v1866_v22 = vrot.slane %v1793_v28, 2  ;;  %v2250_v61 = vld [vmem:[%s5670_s3 + $0x20] sm:$0xff] }
 0x2ce   : > { %v1611_v36 = vrot.slane %v1610_v9, 4  ;;  %1923 = vmatpush.msra.mxu2 %v4599_v34  ;;  %v1853_v15 = vsel %vm1852_vm1, %v1851_v24, %v1787_v38 }
 0x2cf   : > { %v1174_v52 = vpop.f32.mrf.mxu0 }
 0x2d0   : > { %v1612_v40 = vadd.f32 %v1611_v36, %v1610_v9  ;;  %v1175_v57 = vadd.f32 %v4372_v2, %v1174_v52  ;;  %1924 = vmatpush.msra.mxu2 %v4586_v45  ;;  %v5767_v9 = vld [vmem:[#allocation29_spill] sm:$0xff]  ;;  %v1863_v36 = vrot.slane %v1792_v14, 3  ;;  %v1856_v52 = vsel %vm1855_vm2, %v1854_v55, %v1853_v15 }
 0x2d1   : > { %v4617_v18 = vpop.f32.mrf.mxu1  ;;  %v849_v10 = vadd.f32 %v4358_v11, %v5767_v9  ;;  %v1859_v11 = vsel %vm1858_vm3, %v1857_v49, %v1856_v52  ;;  %v3496_v9 = vld [vmem:[%s4009_s21] sm:$0xff]  ;;  %v3499_v52 = vld [vmem:[%s3944_s17 + $0x1a8] sm:$0xff] }
 0x2d2   : > { %v1613_v5 = vrot.slane %v1612_v40, 2  ;;  %v1302_v35 = vmax.f32 %v1175_v57, 0.0  ;;  %3352 = vmatmul.msk.f32.gmra.mxu0 %vm868_vm0, %v848_v3  ;;  %1925 = vmatpush.msra.mxu2 %v4583_v58  ;;  %v1862_v57 = vsel %vm1861_vm4, %v1860_v25, %v1859_v11  ;;  %v3497_v15 = vld [vmem:[%s3944_s17 + $0x1a0] sm:$0xff] }
 0x2d3   : > { %v1865_v1 = vsel %vm1864_vm5, %v1863_v36, %v1862_v57  ;;  %v2246_v45 = vld [vmem:[%s5670_s3] sm:$0xff] }
 0x2d4   : > { %v1614_v19 = vadd.f32 %v1613_v5, %v1612_v40  ;;  %1464 = vmatmul.f32.gmra.mxu1 %v1302_v35  ;;  %1926 = vmatpush.msra.mxu2 %v4553_v26  ;;  %v1868_v6 = vsel %vm1867_vm6, %v1866_v22, %v1865_v1  ;;  %v5768_v35 = vld [vmem:[#allocation28_spill] sm:$0xff]  ;;  %v853_v22 = vadd.f32 %v3499_v52, %v4390_v4  ;;  %v3501_v1 = vld [vmem:[%s3944_s17 + $0x1b0] sm:$0xff] }
 0x2d5   : > { %v850_v24 = vadd.f32 %v4365_v17, %v5768_v35  ;;  %v3495_v17 = vld [vmem:[%s3944_s17 + $0x198] sm:$0xff] }
 0x2d6   : > { %v1615_v16 = vrot.slane %v1614_v19, 1  ;;  %1927 = vmatpush.msra.mxu2 %v4567_v23  ;;  %v851_v55 = vadd.f32 %v3495_v17, %v4374_v12  ;;  %v852_v12 = vadd.f32 %v3497_v15, %v4383_v41  ;;  %v3504_v17 = vld [vmem:[%s4009_s21 + $0x20] sm:$0xff] }
 0x2d7   : > { %v1177_v51 = vpop.f32.mrf.mxu0 }
 0x2d8   : > { %v1616_v62 = vadd.f32 %v1615_v16, %v1614_v19  ;;  %v1178_v59 = vadd.f32 %v4372_v2, %v1177_v51  ;;  %1928 = vmatpush.msra.mxu2 %v4547_v39 }
 0x2d9   : > { %v4636_v3 = vpop.f32.mrf.mxu1 }
 0x2da   : > { %v1794_v31 = vadd.f32 %v4608_v56, %v1616_v62  ;;  %v1303_v40 = vmax.f32 %v1178_v59, 0.0  ;;  %3353 = vmatmul.msk.f32.gmra.mxu0 %vm868_vm0, %v849_v10  ;;  %1929 = vmatpush.msra.mxu2 %v4562_v63  ;;  %v3498_v62 = vld [vmem:[%s4009_s21 + $0x8] sm:$0xff] }
 0x2dc   : > { %v1869_v54 = vrot.slane %v1794_v31, 1  ;;  %1467 = vmatmul.f32.gmra.mxu1 %v1303_v40  ;;  %1930 = vmatpush.msra.mxu2 %v4537_v27  ;;  %v3500_v40 = vld [vmem:[%s4009_s21 + $0x10] sm:$0xff] }
 0x2de   : > { %v1871_v8 = vsel %vm1870_vm7, %v1869_v54, %v1868_v6  ;;  %1931 = vmatpush.msra.mxu2 %v4550_v20  ;;  %v854_v54 = vadd.f32 %v3501_v1, %v4396_v7 }
 0x2df   : > { %1918 = vst [vmem:[%s4648_s10] sm:$0xff] %v1871_v8  ;;  %v1180_v5 = vpop.f32.mrf.mxu0 }
 0x2e0   : > { %v1181_v33 = vadd.f32 %v4372_v2, %v1180_v5  ;;  %1932 = vmatpush.msra.mxu2 %v4534_v53  ;;  %v3502_v5 = vld [vmem:[%s4009_s21 + $0x18] sm:$0xff] }
 0x2e1   : > { %v4655_v14 = vpop.f32.mrf.mxu1 }
 0x2e2   : > { %v1304_v19 = vmax.f32 %v1181_v33, 0.0  ;;  %3354 = vmatmul.msk.f32.gmra.mxu0 %vm868_vm0, %v850_v24  ;;  %1933 = vmatpush.msra.mxu2 %v4544_v37  ;;  %v3503_v24 = vld [vmem:[%s3944_s17 + $0x1b8] sm:$0xff] }
 0x2e3   : > { %v855_v33 = vadd.f32 %v3503_v24, %v4402_v43  ;;  %v3506_v43 = vld [vmem:[%s4009_s21 + $0x28] sm:$0xff] }
 0x2e4   : > { %1470 = vmatmul.f32.gmra.mxu1 %v1304_v19  ;;  %1934 = vmatpush.msra.mxu2 %v4524_v44 }
 0x2e6   : > { %1935 = vmatpush.msra.mxu2 %v4531_v29 }
 0x2e7   : > { %v1183_v38 = vpop.f32.mrf.mxu0 }
 0x2e8   : > { %v1184_v28 = vadd.f32 %v4372_v2, %v1183_v38  ;;  %1936 = vmatpush.msra.mxu2 %v4557_v60 }
 0x2e9   : > { %v4665_v49 = vpop.f32.mrf.mxu1 }
 0x2ea   : > { %v1305_v16 = vmax.f32 %v1184_v28, 0.0  ;;  %3355 = vmatmul.msk.f32.gmra.mxu0 %vm868_vm0, %v851_v55  ;;  %1937 = vmatpush.msra.mxu2 %v4571_v32  ;;  %v3505_v28 = vld [vmem:[%s3944_s17 + $0x1c0] sm:$0xff] }
 0x2eb   : > { %1938 = vmatmul.f32.vlgmr.msra.gmra.mxu2 %v3496_v9 }
 0x2ec   : > { %1473 = vmatmul.f32.gmra.mxu1 %v1305_v16  ;;  %v856_v16 = vadd.f32 %v3505_v28, %v4411_v50  ;;  %v3508_v50 = vld [vmem:[%s4009_s21 + $0x30] sm:$0xff] }
 0x2ef   : > { %v1186_v10 = vpop.f32.mrf.mxu0 }
 0x2f0   : > { %v1187_v25 = vadd.f32 %v4372_v2, %v1186_v10 }
 0x2f1   : > { %v4673_v51 = vpop.f32.mrf.mxu1 }
 0x2f2   : > { %v1306_v36 = vmax.f32 %v1187_v25, 0.0  ;;  %3356 = vmatmul.msk.f32.gmra.mxu0 %vm868_vm0, %v852_v12  ;;  %v3507_v25 = vld [vmem:[%s3944_s17 + $0x1c8] sm:$0xff] }
 0x2f3   : > { %1941 = vmatmul.f32.gmra.mxu2 %v3498_v62 }
 0x2f4   : > { %1476 = vmatmul.f32.gmra.mxu1 %v1306_v36  ;;  %v857_v36 = vadd.f32 %v3507_v25, %v4418_v21  ;;  %v3510_v21 = vld [vmem:[%s4009_s21 + $0x38] sm:$0xff] }
 0x2f7   : > { %v1189_v59 = vpop.f32.mrf.mxu0 }
 0x2f8   : > { %v1190_v11 = vadd.f32 %v4372_v2, %v1189_v59 }
 0x2f9   : > { %v4680_v31 = vpop.f32.mrf.mxu1 }
 0x2fa   : > { %v1307_v41 = vmax.f32 %v1190_v11, 0.0  ;;  %3357 = vmatmul.msk.f32.gmra.mxu0 %vm868_vm0, %v853_v22  ;;  %v3509_v11 = vld [vmem:[%s3944_s17 + $0x1d0] sm:$0xff] }
 0x2fb   : > { %1944 = vmatmul.f32.gmra.mxu2 %v3500_v40 }
 0x2fc   : > { %1479 = vmatmul.f32.gmra.mxu1 %v1307_v41  ;;  %v858_v41 = vadd.f32 %v3509_v11, %v4424_v0  ;;  %v3512_v0 = vld [vmem:[%s4009_s21 + $0x40] sm:$0xff] }
 0x2ff   : > { %v1192_v57 = vpop.f32.mrf.mxu0 }
 0x300   : > { %v1193_v6 = vadd.f32 %v4372_v2, %v1192_v57 }
 0x301   : > { %v4687_v8 = vpop.f32.mrf.mxu1 }
 0x302   : > { %v1308_v4 = vmax.f32 %v1193_v6, 0.0  ;;  %3358 = vmatmul.msk.f32.gmra.mxu0 %vm868_vm0, %v854_v54  ;;  %v3511_v6 = vld [vmem:[%s3944_s17 + $0x1d8] sm:$0xff] }
 0x303   : > { %1947 = vmatmul.f32.gmra.mxu2 %v3502_v5 }
 0x304   : > { %1482 = vmatmul.f32.gmra.mxu1 %v1308_v4  ;;  %v859_v4 = vadd.f32 %v3511_v6, %v4430_v42  ;;  %v3516_v6 = vld [vmem:[%s4009_s21 + $0x50] sm:$0xff] }
 0x307   : > { %v1195_v35 = vpop.f32.mrf.mxu0 }
 0x308   : > { %v1196_v19 = vadd.f32 %v4372_v2, %v1195_v35 }
 0x309   : > { %v1438_v38 = vpop.f32.mrf.mxu1 }
 0x30a   : > { %v1309_v7 = vmax.f32 %v1196_v19, 0.0  ;;  %3359 = vmatmul.msk.f32.gmra.mxu0 %vm868_vm0, %v855_v33  ;;  %v3513_v19 = vld [vmem:[%s3944_s17 + $0x1e0] sm:$0xff] }
 0x30b   : > { %1950 = vmatmul.f32.gmra.mxu2 %v3504_v17  ;;  %v4720_v17 = vadd.f32 %v4521_v13, %v4665_v49 }
 0x30c   : > { %1485 = vmatmul.f32.gmra.mxu1 %v1309_v7  ;;  %v860_v7 = vadd.f32 %v3513_v19, %v4439_v47  ;;  %v4737_v47 = vadd.f32 %v4521_v13, %v4673_v51  ;;  %v4754_v51 = vadd.f32 %v4521_v13, %v4636_v3 }
 0x30d   : > { %5769 = vst [vmem:[#allocation23_spill] sm:$0xff] %v4720_v17 }
 0x30e   : > { %5773 = vst [vmem:[#allocation32_spill] sm:$0xff] %v4737_v47 }
 0x30f   : > { %v1198_v55 = vpop.f32.mrf.mxu0  ;;  %5777 = vst [vmem:[#allocation29_spill] sm:$0xff] %v4754_v51 }
 0x310   : > { %v1199_v9 = vadd.f32 %v4372_v2, %v1198_v55  ;;  %v4725_v55 = vadd.f32 %v4521_v13, %v4680_v31  ;;  %v3514_v31 = vld [vmem:[%s4009_s21 + $0x48] sm:$0xff] }
 0x311   : > { %v1441_v10 = vpop.f32.mrf.mxu1 }
 0x312   : > { %v1310_v15 = vmax.f32 %v1199_v9, 0.0  ;;  %3360 = vmatmul.msk.f32.gmra.mxu0 %vm868_vm0, %v856_v16  ;;  %5770 = vst [vmem:[#allocation22_spill] sm:$0xff] %v4725_v55  ;;  %v4729_v16 = vadd.f32 %v4521_v13, %v4655_v14  ;;  %v4732_v9 = vadd.f32 %v4521_v13, %v1438_v38  ;;  %v4747_v38 = vadd.f32 %v4521_v13, %v4687_v8 }
 0x313   : > { %1953 = vmatmul.f32.gmra.mxu2 %v3506_v43  ;;  %v4759_v25 = vadd.f32 %v4521_v13, %v1441_v10 }
 0x314   : > { %1488 = vmatmul.f32.gmra.mxu1 %v1310_v15  ;;  %5771 = vst [vmem:[#allocation31_spill] sm:$0xff] %v4729_v16  ;;  %v1624_v14 = vadd.f32 %v4720_v17, %v4729_v16 }
 0x315   : > { %5772 = vst [vmem:[#allocation21_spill] sm:$0xff] %v4732_v9 }
 0x316   : > { %5775 = vst [vmem:[#allocation19_spill] sm:$0xff] %v4747_v38  ;;  %v1625_v10 = vrot.slane %v1624_v14, 4 }
 0x317   : > { %v1201_v12 = vpop.f32.mrf.mxu0  ;;  %5778 = vst [vmem:[#allocation28_spill] sm:$0xff] %v4759_v25 }
 0x318   : > { %v1202_v62 = vadd.f32 %v4372_v2, %v1201_v12  ;;  %v1631_v12 = vadd.f32 %v4725_v55, %v4737_v47 }
 0x319   : > { %v1444_v59 = vpop.f32.mrf.mxu1 }
 0x31a   : > { %v1311_v52 = vmax.f32 %v1202_v62, 0.0  ;;  %3361 = vmatmul.msk.f32.gmra.mxu0 %vm868_vm0, %v857_v36  ;;  %v4740_v49 = vadd.f32 %v4521_v13, %v1444_v59  ;;  %v1638_v36 = vadd.f32 %v4732_v9, %v4747_v38  ;;  %v4768_v62 = vadd.f32 %v4521_v13, %v4617_v18 }
 0x31b   : > { %1956 = vmatmul.f32.gmra.mxu2 %v3508_v50 }
 0x31c   : > { %1491 = vmatmul.f32.gmra.mxu1 %v1311_v52  ;;  %5774 = vst [vmem:[#allocation20_spill] sm:$0xff] %v4740_v49  ;;  %v1645_v3 = vadd.f32 %v4740_v49, %v4759_v25  ;;  %v3515_v52 = vld [vmem:[%s3944_s17 + $0x1e8] sm:$0xff] }
 0x31d   : > { %5780 = vst [vmem:[#allocation34_spill] sm:$0xff] %v4768_v62  ;;  %v861_v50 = vadd.f32 %v3515_v52, %v4446_v48 }
 0x31e   : > { %v1646_v48 = vrot.slane %v1645_v3, 4 }
 0x31f   : > { %v1204_v22 = vpop.f32.mrf.mxu0 }
 0x320   : > { %v1205_v40 = vadd.f32 %v4372_v2, %v1204_v22 }
 0x321   : > { %v1447_v57 = vpop.f32.mrf.mxu1 }
 0x322   : > { %v1312_v1 = vmax.f32 %v1205_v40, 0.0  ;;  %3362 = vmatmul.msk.f32.gmra.mxu0 %vm868_vm0, %v858_v41  ;;  %v4764_v8 = vadd.f32 %v4521_v13, %v1447_v57  ;;  %v1617_v41 = vadd.f32 %v4754_v51, %v4768_v62  ;;  %v1632_v40 = vrot.slane %v1631_v12, 4 }
 0x323   : > { %1959 = vmatmul.f32.gmra.mxu2 %v3510_v21  ;;  %v1639_v57 = vrot.slane %v1638_v36, 4 }
 0x324   : > { %1494 = vmatmul.f32.gmra.mxu1 %v1312_v1  ;;  %5779 = vst [vmem:[#allocation33_spill] sm:$0xff] %v4764_v8 }
 0x327   : > { %v1207_v54 = vpop.f32.mrf.mxu0 }
 0x328   : > { %v1208_v5 = vadd.f32 %v4372_v2, %v1207_v54 }
 0x329   : > { %v1450_v35 = vpop.f32.mrf.mxu1 }
 0x32a   : > { %v1313_v24 = vmax.f32 %v1208_v5, 0.0  ;;  %3363 = vmatmul.msk.f32.gmra.mxu0 %vm868_vm0, %v859_v4  ;;  %v4750_v43 = vadd.f32 %v4521_v13, %v1450_v35  ;;  %v1626_v4 = vadd.f32 %v1625_v10, %v1624_v14 }
 0x32b   : > { %1962 = vmatmul.f32.gmra.mxu2 %v3512_v0  ;;  %v1633_v0 = vadd.f32 %v1632_v40, %v1631_v12 }
 0x32c   : > { %1497 = vmatmul.f32.gmra.mxu1 %v1313_v24  ;;  %5776 = vst [vmem:[#allocation30_spill] sm:$0xff] %v4750_v43  ;;  %v1652_v22 = vadd.f32 %v4750_v43, %v4764_v8  ;;  %v1618_v24 = vrot.slane %v1617_v41, 4 }
 0x32e   : > { %v1653_v5 = vrot.slane %v1652_v22, 4  ;;  %v1619_v14 = vadd.f32 %v1618_v24, %v1617_v41 }
 0x32f   : > { %v1210_v33 = vpop.f32.mrf.mxu0 }
 0x330   : > { %v1211_v42 = vadd.f32 %v4372_v2, %v1210_v33  ;;  %v1640_v33 = vadd.f32 %v1639_v57, %v1638_v36  ;;  %v3518_v36 = vld [vmem:[%s4009_s21 + $0x58] sm:$0xff] }
 0x331   : > { %v1453_v28 = vpop.f32.mrf.mxu1 }
 0x332   : > { %v1314_v15 = vmax.f32 %v1211_v42, 0.0  ;;  %3364 = vmatmul.msk.f32.gmra.mxu0 %vm868_vm0, %v860_v7  ;;  %v4780_v1 = vadd.f32 %v4521_v13, %v1453_v28  ;;  %v1647_v7 = vadd.f32 %v1646_v48, %v1645_v3  ;;  %v3517_v28 = vld [vmem:[%s3944_s17 + $0x1f0] sm:$0xff] }
 0x333   : > { %1965 = vmatmul.f32.gmra.mxu2 %v3514_v31  ;;  %v1627_v31 = vrot.slane %v1626_v4, 2 }
 0x334   : > { %1500 = vmatmul.f32.gmra.mxu1 %v1314_v15  ;;  %5781 = vst [vmem:[#allocation35_spill] sm:$0xff] %v4780_v1  ;;  %v862_v15 = vadd.f32 %v3517_v28, %v4452_v46  ;;  %v1648_v12 = vrot.slane %v1647_v7, 2  ;;  %v1620_v46 = vrot.slane %v1619_v14, 2 }
 0x335   : > { %v1628_v3 = vadd.f32 %v1627_v31, %v1626_v4 }
 0x336   : > { %v1621_v28 = vadd.f32 %v1620_v46, %v1619_v14 }
 0x337   : > { %v1213_v59 = vpop.f32.mrf.mxu0 }
 0x338   : > { %v1214_v11 = vadd.f32 %v4372_v2, %v1213_v59  ;;  %v1654_v59 = vadd.f32 %v1653_v5, %v1652_v22 }
 0x339   : > { %v1456_v18 = vpop.f32.mrf.mxu1 }
 0x33a   : > { %v1315_v21 = vmax.f32 %v1214_v11, 0.0  ;;  %v4783_v54 = vadd.f32 %v4521_v13, %v1456_v18  ;;  %3365 = vmatmul.msk.f32.gmra.mxu0 %vm868_vm0, %v861_v50  ;;  %v1634_v50 = vrot.slane %v1633_v0, 2  ;;  %v1641_v18 = vrot.slane %v1640_v33, 2 }
 0x33b   : > { %1968 = vmatmul.f32.gmra.mxu2 %v3516_v6  ;;  %v1655_v40 = vrot.slane %v1654_v59, 2  ;;  %v3519_v6 = vld [vmem:[%s3944_s17 + $0x1f8] sm:$0xff] }
 0x33c   : > { %5782 = vst [vmem:[#allocation36_spill] sm:$0xff] %v4783_v54  ;;  %v1659_v35 = vadd.f32 %v4783_v54, %v4780_v1  ;;  %1503 = vmatmul.f32.gmra.mxu1 %v1315_v21  ;;  %v1635_v57 = vadd.f32 %v1634_v50, %v1633_v0  ;;  %v1642_v48 = vadd.f32 %v1641_v18, %v1640_v33 }
 0x33d   : > { %v863_v5 = vadd.f32 %v3519_v6, %v4458_v30  ;;  %v1656_v24 = vadd.f32 %v1655_v40, %v1654_v59  ;;  %v3521_v59 = vld [vmem:[%s4009_s21 + $0x60] sm:$0xff] }
 0x33e   : > { %v1660_v19 = vrot.slane %v1659_v35, 4  ;;  %v1636_v4 = vrot.slane %v1635_v57, 1 }
 0x33f   : > { %v1216_v42 = vpop.f32.mrf.mxu0  ;;  %v1657_v18 = vrot.slane %v1656_v24, 1 }
 0x340   : > { %v1217_v52 = vadd.f32 %v4372_v2, %v1216_v42  ;;  %v1661_v10 = vadd.f32 %v1660_v19, %v1659_v35  ;;  %v1649_v2 = vadd.f32 %v1648_v12, %v1647_v7  ;;  %v1629_v35 = vrot.slane %v1628_v3, 1  ;;  %v4796_v19 = vld [vmem:[#allocation5] ss:$0 sm:$0xff] }
 0x341   : > { %v1459_v11 = vpop.f32.mrf.mxu1 }
 0x342   : > { %v1316_v21 = vmax.f32 %v1217_v52, 0.0  ;;  %3366 = vmatmul.msk.f32.gmra.mxu0 %vm868_vm0, %v862_v15  ;;  %v1662_v22 = vrot.slane %v1661_v10, 2  ;;  %v1643_v52 = vrot.slane %v1642_v48, 1  ;;  %v4800_v0 = vadd.f32 %v4521_v13, %v1459_v11 }
 0x343   : > { %1971 = vmatmul.f32.gmra.mxu2 %v3518_v36  ;;  %v1650_v30 = vrot.slane %v1649_v2, 1  ;;  %v1630_v50 = vadd.f32 %v1629_v35, %v1628_v3  ;;  %v1658_v3 = vadd.f32 %v1657_v18, %v1656_v24  ;;  %v3522_v24 = vld [vmem:[%s4009_s21 + $0x68] sm:$0xff] }
 0x344   : > { %1506 = vmatmul.f32.gmra.mxu1 %v1316_v21  ;;  %v1663_v15 = vadd.f32 %v1662_v22, %v1661_v10  ;;  %5783 = vst [vmem:[#allocation37_spill] sm:$0xff] %v4800_v0  ;;  %v1637_v10 = vadd.f32 %v1636_v4, %v1635_v57  ;;  %v1622_v21 = vrot.slane %v1621_v28, 1  ;;  %v1644_v12 = vadd.f32 %v1643_v52, %v1642_v48 }
 0x345   : > { %v1651_v40 = vadd.f32 %v1650_v30, %v1649_v2  ;;  %v1796_v22 = vadd.f32 %v4608_v56, %v1630_v50 }
 0x346   : > { %v1664_v11 = vrot.slane %v1663_v15, 1  ;;  %v1623_v48 = vadd.f32 %v1622_v21, %v1621_v28 }
 0x347   : > { %v1219_v41 = vpop.f32.mrf.mxu0  ;;  %v1872_v52 = vrot.slane %v1796_v22, 7 }
 0x348   : > { %v1220_v42 = vadd.f32 %v4796_v19, %v1219_v41  ;;  %v1665_v57 = vadd.f32 %v1664_v11, %v1663_v15 }
 0x349   : > { %v1462_v31 = vpop.f32.mrf.mxu1 }
 0x34a   : > { %v1317_v33 = vmax.f32 %v1220_v42, 0.0  ;;  %v4803_v7 = vadd.f32 %v4521_v13, %v1462_v31  ;;  %3367 = vmatmul.msk.f32.gmra.mxu0 %vm868_vm0, %v863_v5  ;;  %v1797_v5 = vadd.f32 %v4608_v56, %v1637_v10  ;;  %v1798_v42 = vadd.f32 %v4608_v56, %v1644_v12 }
 0x34b   : > { %1974 = vmatmul.f32.gmra.mxu2 %v3521_v59  ;;  %v1799_v31 = vadd.f32 %v4608_v56, %v1651_v40  ;;  %v1801_v28 = vadd.f32 %v4608_v56, %v1665_v57  ;;  %v1795_v59 = vadd.f32 %v4608_v56, %v1623_v48  ;;  %v3523_v57 = vld [vmem:[%s4009_s21 + $0x70] sm:$0xff] }
 0x34c   : > { %5784 = vst [vmem:[#allocation38_spill] sm:$0xff] %v4803_v7  ;;  %v1666_v14 = vadd.f32 %v4803_v7, %v4800_v0  ;;  %1509 = vmatmul.f32.gmra.mxu1 %v1317_v33  ;;  %1987 = vmatpush.msra.mxu3 %v4803_v7  ;;  %v1800_v33 = vadd.f32 %v4608_v56, %v1658_v3  ;;  %v1874_v15 = vrot.slane %v1797_v5, 6  ;;  %v1876_v50 = vrot.slane %v1798_v42, 5  ;;  %v3535_v7 = vld [vmem:[%s4009_s21 + $0xd0] sm:$0xff] }
 0x34d   : > { %v1873_v11 = vsel %vm1852_vm1, %v1872_v52, %v1795_v59 }
 0x34e   : > { %v1667_v36 = vrot.slane %v1666_v14, 4  ;;  %1988 = vmatpush.msra.mxu3 %v4800_v0  ;;  %v1880_v21 = vrot.slane %v1800_v33, 3  ;;  %v1875_v40 = vsel %vm1855_vm2, %v1874_v15, %v1873_v11 }
 0x34f   : > { %v1222_v46 = vpop.f32.mrf.mxu0  ;;  %v1877_v3 = vsel %vm1858_vm3, %v1876_v50, %v1875_v40 }
 0x350   : > { %v1668_v41 = vadd.f32 %v1667_v36, %v1666_v14  ;;  %v1223_v6 = vadd.f32 %v4796_v19, %v1222_v46  ;;  %1989 = vmatpush.msra.mxu3 %v4783_v54  ;;  %v1878_v14 = vrot.slane %v1799_v31, 4  ;;  %v1882_v46 = vrot.slane %v1801_v28, 2 }
 0x351   : > { %v4815_v35 = vpop.f32.mrf.mxu1 }
 0x352   : > { %v1669_v4 = vrot.slane %v1668_v41, 2  ;;  %v1318_v2 = vmax.f32 %v1223_v6, 0.0  ;;  %1990 = vmatpush.msra.mxu3 %v4780_v1  ;;  %v1879_v5 = vsel %vm1861_vm4, %v1878_v14, %v1877_v3 }
 0x353   : > { %1977 = vmatmul.f32.gmra.mxu2 %v3522_v24  ;;  %v1881_v48 = vsel %vm1864_vm5, %v1880_v21, %v1879_v5 }
 0x354   : > { %v1670_v30 = vadd.f32 %v1669_v4, %v1668_v41  ;;  %1512 = vmatmul.f32.gmra.mxu1 %v1318_v2  ;;  %1991 = vmatpush.msra.mxu3 %v4750_v43  ;;  %v1883_v4 = vsel %vm1867_vm6, %v1882_v46, %v1881_v48 }
 0x356   : > { %v1671_v18 = vrot.slane %v1670_v30, 1  ;;  %1992 = vmatpush.msra.mxu3 %v4764_v8 }
 0x357   : > { %v1225_v10 = vpop.f32.mrf.mxu0 }
 0x358   : > { %v1672_v12 = vadd.f32 %v1671_v18, %v1670_v30  ;;  %v1226_v36 = vadd.f32 %v4796_v19, %v1225_v10  ;;  %1993 = vmatpush.msra.mxu3 %v4740_v49  ;;  %v3524_v30 = vld [vmem:[%s4009_s21 + $0x78] sm:$0xff]  ;;  %v3525_v18 = vld [vmem:[%s4009_s21 + $0x80] sm:$0xff] }
 0x359   : > { %v4830_v22 = vpop.f32.mrf.mxu1 }
 0x35a   : > { %v1802_v41 = vadd.f32 %v4608_v56, %v1672_v12  ;;  %v1319_v6 = vmax.f32 %v1226_v36, 0.0  ;;  %1994 = vmatpush.msra.mxu3 %v4759_v25  ;;  %v3526_v12 = vld [vmem:[%s4009_s21 + $0x88] sm:$0xff] }
 0x35b   : > { %1980 = vmatmul.f32.gmra.mxu2 %v3523_v57 }
 0x35c   : > { %v1884_v42 = vrot.slane %v1802_v41, 1  ;;  %1515 = vmatmul.f32.gmra.mxu1 %v1319_v6  ;;  %1995 = vmatpush.msra.mxu3 %v4732_v9  ;;  %v3527_v41 = vld [vmem:[%s4009_s21 + $0x90] sm:$0xff] }
 0x35e   : > { %v1885_v2 = vsel %vm1870_vm7, %v1884_v42, %v1883_v4  ;;  %1996 = vmatpush.msra.mxu3 %v4747_v38  ;;  %v3528_v42 = vld [vmem:[%s4009_s21 + $0x98] sm:$0xff] }
 0x35f   : > { %1919 = vst [vmem:[%s4648_s10 + $0x8] sm:$0xff] %v1885_v2  ;;  %v1228_v31 = vpop.f32.mrf.mxu0 }
 0x360   : > { %v1229_v24 = vadd.f32 %v4796_v19, %v1228_v31  ;;  %1997 = vmatpush.msra.mxu3 %v4725_v55 }
 0x361   : > { %v4845_v52 = vpop.f32.mrf.mxu1 }
 0x362   : > { %v1320_v33 = vmax.f32 %v1229_v24, 0.0  ;;  %1998 = vmatpush.msra.mxu3 %v4737_v47 }
 0x363   : > { %1983 = vmatmul.f32.gmra.mxu2 %v3524_v30 }
 0x364   : > { %1518 = vmatmul.f32.gmra.mxu1 %v1320_v33  ;;  %1999 = vmatpush.msra.mxu3 %v4720_v17  ;;  %v3529_v33 = vld [vmem:[%s4009_s21 + $0xa0] sm:$0xff]  ;;  %v3536_v17 = vld [vmem:[%s4009_s21 + $0xd8] sm:$0xff] }
 0x366   : > { %2000 = vmatpush.msra.mxu3 %v4729_v16 }
 0x367   : > { %v1231_v15 = vpop.f32.mrf.mxu0 }
 0x368   : > { %v1232_v28 = vadd.f32 %v4796_v19, %v1231_v15  ;;  %2001 = vmatpush.msra.mxu3 %v4754_v51 }
 0x369   : > { %v4853_v59 = vpop.f32.mrf.mxu1 }
 0x36a   : > { %v1321_v50 = vmax.f32 %v1232_v28, 0.0  ;;  %2002 = vmatpush.msra.mxu3 %v4768_v62 }
 0x36b   : > { %2003 = vmatmul.f32.vlgmr.msra.gmra.mxu3 %v3525_v18  ;;  %v3530_v18 = vld [vmem:[%s4009_s21 + $0xa8] sm:$0xff] }
 0x36c   : > { %1521 = vmatmul.f32.gmra.mxu1 %v1321_v50 }
 0x36f   : > { %v1234_v14 = vpop.f32.mrf.mxu0 }
 0x370   : > { %v1235_v10 = vadd.f32 %v4796_v19, %v1234_v14 }
 0x371   : > { %v1477_v11 = vpop.f32.mrf.mxu1 }
 0x372   : > { %v1322_v21 = vmax.f32 %v1235_v10, 0.0 }
 0x373   : > { %2006 = vmatmul.f32.gmra.mxu3 %v3526_v12 }
 0x374   : > { %1524 = vmatmul.f32.gmra.mxu1 %v1322_v21 }
 0x377   : > { %v1237_v36 = vpop.f32.mrf.mxu0 }
 0x378   : > { %v1238_v40 = vadd.f32 %v4796_v19, %v1237_v36  ;;  %v3531_v36 = vld [vmem:[%s4009_s21 + $0xb0] sm:$0xff] }
 0x379   : > { %v1480_v46 = vpop.f32.mrf.mxu1 }
 0x37a   : > { %v1323_v3 = vmax.f32 %v1238_v40, 0.0 }
 0x37b   : > { %2009 = vmatmul.f32.gmra.mxu3 %v3527_v41 }
 0x37c   : > { %1527 = vmatmul.f32.gmra.mxu1 %v1323_v3 }
 0x37f   : > { %v1240_v6 = vpop.f32.mrf.mxu0 }
 0x380   : > { %v1241_v5 = vadd.f32 %v4796_v19, %v1240_v6 }
 0x381   : > { %v1483_v57 = vpop.f32.mrf.mxu1 }
 0x382   : > { %v1324_v48 = vmax.f32 %v1241_v5, 0.0  ;;  %v3532_v5 = vld [vmem:[%s4009_s21 + $0xb8] sm:$0xff] }
 0x383   : > { %2012 = vmatmul.f32.gmra.mxu3 %v3528_v42 }
 0x384   : > { %1530 = vmatmul.f32.gmra.mxu1 %v1324_v48 }
 0x387   : > { %v1243_v4 = vpop.f32.mrf.mxu0 }
 0x388   : > { %v1244_v2 = vadd.f32 %v4796_v19, %v1243_v4 }
 0x389   : > { %v1486_v31 = vpop.f32.mrf.mxu1 }
 0x38a   : > { %v1325_v24 = vmax.f32 %v1244_v2, 0.0 }
 0x38b   : > { %2015 = vmatmul.f32.gmra.mxu3 %v3529_v33 }
 0x38c   : > { %1533 = vmatmul.f32.gmra.mxu1 %v1325_v24  ;;  %v3533_v24 = vld [vmem:[%s4009_s21 + $0xc0] sm:$0xff] }
 0x38f   : > { %v1246_v30 = vpop.f32.mrf.mxu0 }
 0x390   : > { %v1247_v15 = vadd.f32 %v4796_v19, %v1246_v30  ;;  %v4875_v30 = vadd.f32 %v4521_v13, %v4853_v59 }
 0x391   : > { %v1489_v28 = vpop.f32.mrf.mxu1 }
 0x392   : > { %v1326_v50 = vmax.f32 %v1247_v15, 0.0  ;;  %5785 = vst [vmem:[#allocation39_spill] sm:$0xff] %v4875_v30 }
 0x393   : > { %2018 = vmatmul.f32.gmra.mxu3 %v3530_v18 }
 0x394   : > { %1536 = vmatmul.f32.gmra.mxu1 %v1326_v50  ;;  %v4879_v50 = vadd.f32 %v4521_v13, %v1480_v46 }
 0x396   : > { %5786 = vst [vmem:[#allocation40_spill] sm:$0xff] %v4879_v50 }
 0x397   : > { %v1249_v14 = vpop.f32.mrf.mxu0 }
 0x398   : > { %v1250_v10 = vadd.f32 %v4796_v19, %v1249_v14  ;;  %v4883_v14 = vadd.f32 %v4521_v13, %v4845_v52 }
 0x399   : > { %v1492_v21 = vpop.f32.mrf.mxu1 }
 0x39a   : > { %v1327_v12 = vmax.f32 %v1250_v10, 0.0  ;;  %5787 = vst [vmem:[#allocation41_spill] sm:$0xff] %v4883_v14  ;;  %v4886_v10 = vadd.f32 %v4521_v13, %v1486_v31  ;;  %v4892_v59 = vadd.f32 %v4521_v13, %v1492_v21  ;;  %v1680_v46 = vadd.f32 %v4875_v30, %v4883_v14 }
 0x39b   : > { %2021 = vmatmul.f32.gmra.mxu3 %v3531_v36  ;;  %v4889_v36 = vadd.f32 %v4521_v13, %v1477_v11  ;;  %v4905_v31 = vadd.f32 %v4521_v13, %v4830_v22  ;;  %v4910_v21 = vadd.f32 %v4521_v13, %v1489_v28 }
 0x39c   : > { %1539 = vmatmul.f32.gmra.mxu1 %v1327_v12  ;;  %5788 = vst [vmem:[#allocation42_spill] sm:$0xff] %v4886_v10 }
 0x39d   : > { %5789 = vst [vmem:[#allocation43_spill] sm:$0xff] %v4889_v36  ;;  %v1687_v11 = vadd.f32 %v4879_v50, %v4889_v36  ;;  %v1701_v22 = vadd.f32 %v4892_v59, %v4910_v21 }
 0x39e   : > { %5790 = vst [vmem:[#allocation44_spill] sm:$0xff] %v4892_v59 }
 0x39f   : > { %v1252_v40 = vpop.f32.mrf.mxu0  ;;  %5793 = vst [vmem:[#allocation47_spill] sm:$0xff] %v4905_v31 }
 0x3a0   : > { %v1253_v3 = vadd.f32 %v4796_v19, %v1252_v40  ;;  %v3534_v40 = vld [vmem:[%s4009_s21 + $0xc8] sm:$0xff]  ;;  %5794 = vst [vmem:[#allocation48_spill] sm:$0xff] %v4910_v21 }
 0x3a1   : > { %v1495_v41 = vpop.f32.mrf.mxu1 }
 0x3a2   : > { %v1328_v6 = vmax.f32 %v1253_v3, 0.0  ;;  %v4898_v3 = vadd.f32 %v4521_v13, %v1483_v57  ;;  %v4915_v57 = vadd.f32 %v4521_v13, %v1495_v41 }
 0x3a3   : > { %2024 = vmatmul.f32.gmra.mxu3 %v3532_v5  ;;  %v4919_v5 = vadd.f32 %v4521_v13, %v4815_v35 }
 0x3a4   : > { %1542 = vmatmul.f32.gmra.mxu1 %v1328_v6  ;;  %5791 = vst [vmem:[#allocation45_spill] sm:$0xff] %v4898_v3  ;;  %v1694_v6 = vadd.f32 %v4886_v10, %v4898_v3 }
 0x3a5   : > { %5795 = vst [vmem:[#allocation49_spill] sm:$0xff] %v4915_v57 }
 0x3a6   : > { %5796 = vst [vmem:[#allocation50_spill] sm:$0xff] %v4919_v5 }
 0x3a7   : > { %v1255_v48 = vpop.f32.mrf.mxu0 }
 0x3a8   : > { %v1256_v42 = vadd.f32 %v4796_v19, %v1255_v48 }
 0x3a9   : > { %v1498_v4 = vpop.f32.mrf.mxu1 }
 0x3aa   : > { %v1329_v2 = vmax.f32 %v1256_v42, 0.0  ;;  %v4901_v52 = vadd.f32 %v4521_v13, %v1498_v4  ;;  %v1681_v42 = vrot.slane %v1680_v46, 4 }
 0x3ab   : > { %2027 = vmatmul.f32.gmra.mxu3 %v3533_v24  ;;  %v1688_v24 = vrot.slane %v1687_v11, 4 }
 0x3ac   : > { %1545 = vmatmul.f32.gmra.mxu1 %v1329_v2  ;;  %5792 = vst [vmem:[#allocation46_spill] sm:$0xff] %v4901_v52  ;;  %v1708_v28 = vadd.f32 %v4901_v52, %v4915_v57  ;;  %v1673_v2 = vadd.f32 %v4905_v31, %v4919_v5  ;;  %v1682_v0 = vadd.f32 %v1681_v42, %v1680_v46 }
 0x3ad   : > { %v1689_v43 = vadd.f32 %v1688_v24, %v1687_v11 }
 0x3ae   : > { %v1709_v54 = vrot.slane %v1708_v28, 4  ;;  %v1674_v1 = vrot.slane %v1673_v2, 4 }
 0x3af   : > { %v1258_v33 = vpop.f32.mrf.mxu0  ;;  %v1690_v38 = vrot.slane %v1689_v43, 2 }
 0x3b0   : > { %v1259_v15 = vadd.f32 %v4796_v19, %v1258_v33  ;;  %v1695_v33 = vrot.slane %v1694_v6, 4  ;;  %v1710_v9 = vadd.f32 %v1709_v54, %v1708_v28 }
 0x3b1   : > { %v1501_v18 = vpop.f32.mrf.mxu1 }
 0x3b2   : > { %v1330_v12 = vmax.f32 %v1259_v15, 0.0  ;;  %v4929_v15 = vadd.f32 %v4521_v13, %v1501_v18  ;;  %v1696_v8 = vadd.f32 %v1695_v33, %v1694_v6  ;;  %v1711_v16 = vrot.slane %v1710_v9, 2 }
 0x3b3   : > { %2030 = vmatmul.f32.gmra.mxu3 %v3534_v40  ;;  %v1702_v40 = vrot.slane %v1701_v22, 4  ;;  %v1691_v6 = vadd.f32 %v1690_v38, %v1689_v43 }
 0x3b4   : > { %1548 = vmatmul.f32.gmra.mxu1 %v1330_v12  ;;  %5797 = vst [vmem:[#allocation51_spill] sm:$0xff] %v4929_v15  ;;  %v1697_v42 = vrot.slane %v1696_v8, 2 }
 0x3b5   : > { %v1703_v18 = vadd.f32 %v1702_v40, %v1701_v22  ;;  %v1692_v33 = vrot.slane %v1691_v6, 1 }
 0x3b6   : > { %v1698_v24 = vadd.f32 %v1697_v42, %v1696_v8  ;;  %v3538_v8 = vld [vmem:[%s4009_s21 + $0xe0] sm:$0xff] }
 0x3b7   : > { %v1261_v48 = vpop.f32.mrf.mxu0  ;;  %v1704_v47 = vrot.slane %v1703_v18, 2 }
 0x3b8   : > { %v1262_v4 = vadd.f32 %v4796_v19, %v1261_v48 }
 0x3b9   : > { %v1504_v41 = vpop.f32.mrf.mxu1  ;;  %v1705_v54 = vadd.f32 %v1704_v47, %v1703_v18 }
 0x3ba   : > { %v1331_v35 = vmax.f32 %v1262_v4, 0.0  ;;  %v4932_v12 = vadd.f32 %v4521_v13, %v1504_v41  ;;  %v1683_v4 = vrot.slane %v1682_v0, 2  ;;  %v1675_v41 = vadd.f32 %v1674_v1, %v1673_v2 }
 0x3bb   : > { %2033 = vmatmul.f32.gmra.mxu3 %v3535_v7  ;;  %v1712_v1 = vadd.f32 %v1711_v16, %v1710_v9  ;;  %v1706_v47 = vrot.slane %v1705_v54, 1 }
 0x3bc   : > { %5798 = vst [vmem:[#allocation52_spill] sm:$0xff] %v4932_v12  ;;  %v1715_v48 = vadd.f32 %v4932_v12, %v4929_v15  ;;  %1551 = vmatmul.f32.gmra.mxu1 %v1331_v35  ;;  %v1684_v35 = vadd.f32 %v1683_v4, %v1682_v0  ;;  %v1676_v11 = vrot.slane %v1675_v41, 2  ;;  %v1693_v0 = vadd.f32 %v1692_v33, %v1691_v6 }
 0x3bd   : > { %v1713_v9 = vrot.slane %v1712_v1, 1 }
 0x3be   : > { %v1716_v49 = vrot.slane %v1715_v48, 4  ;;  %v1677_v2 = vadd.f32 %v1676_v11, %v1675_v41  ;;  %v4954_v11 = vpop.f32.mrf.mxu2 }
 0x3bf   : > { %v1264_v25 = vpop.f32.mrf.mxu0 }
 0x3c0   : > { %v1265_v13 = vadd.f32 %v4796_v19, %v1264_v25  ;;  %v1717_v7 = vadd.f32 %v1716_v49, %v1715_v48  ;;  %v1685_v25 = vrot.slane %v1684_v35, 1  ;;  %v1678_v4 = vrot.slane %v1677_v2, 1 }
 0x3c1   : > { %v1507_v46 = vpop.f32.mrf.mxu1 }
 0x3c2   : > { %v1332_v55 = vmax.f32 %v1265_v13, 0.0  ;;  %v1718_v22 = vrot.slane %v1717_v7, 2  ;;  %v1699_v13 = vrot.slane %v1698_v24, 1  ;;  %v1686_v16 = vadd.f32 %v1685_v25, %v1684_v35 }
 0x3c3   : > { %2036 = vmatmul.f32.gmra.mxu3 %v3536_v17  ;;  %v4940_v17 = vld [vmem:[#allocation8] ss:$0 sm:$0xff]  ;;  %v1714_v35 = vadd.f32 %v1713_v9, %v1712_v1 }
 0x3c4   : > { %1554 = vmatmul.f32.gmra.mxu1 %v1332_v55  ;;  %v1719_v40 = vadd.f32 %v1718_v22, %v1717_v7  ;;  %v4943_v55 = vadd.f32 %v4940_v17, %v1507_v46  ;;  %v1700_v41 = vadd.f32 %v1699_v13, %v1698_v24  ;;  %v1707_v46 = vadd.f32 %v1706_v47, %v1705_v54 }
 0x3c5   : > { %v1804_v42 = vadd.f32 %v4608_v56, %v1686_v16  ;;  %v1808_v1 = vadd.f32 %v4608_v56, %v1714_v35 }
 0x3c6   : > { %5799 = vst [vmem:[#allocation53_spill] sm:$0xff] %v4943_v55  ;;  %v1720_v18 = vrot.slane %v1719_v40, 1  ;;  %v1806_v24 = vadd.f32 %v4608_v56, %v1700_v41  ;;  %v1807_v54 = vadd.f32 %v4608_v56, %v1707_v46  ;;  %v4974_v46 = vpop.f32.mrf.mxu2 }
 0x3c7   : > { %v1267_v28 = vpop.f32.mrf.mxu0  ;;  %v1886_v13 = vrot.slane %v1804_v42, 7 }
 0x3c8   : > { %v1268_v49 = vadd.f32 %v4796_v19, %v1267_v28  ;;  %v1805_v28 = vadd.f32 %v4608_v56, %v1693_v0  ;;  %v1721_v25 = vadd.f32 %v1720_v18, %v1719_v40  ;;  %v1892_v9 = vrot.slane %v1807_v54, 4  ;;  %v3541_v54 = vld [vmem:[%s4009_s21 + $0xf8] sm:$0xff] }
 0x3c9   : > { %v1510_v48 = vpop.f32.mrf.mxu1  ;;  %v1894_v0 = vrot.slane %v1808_v1, 3  ;;  %v3542_v1 = vld [vmem:[%s4009_s21 + $0x100] sm:$0xff] }
 0x3ca   : > { %v1333_v38 = vmax.f32 %v1268_v49, 0.0  ;;  %v4946_v43 = vadd.f32 %v4940_v17, %v1510_v48  ;;  %v1679_v49 = vadd.f32 %v1678_v4, %v1677_v2  ;;  %v3539_v48 = vld [vmem:[%s4009_s21 + $0xe8] sm:$0xff]  ;;  %v1888_v47 = vrot.slane %v1805_v28, 6  ;;  %v3540_v28 = vld [vmem:[%s4009_s21 + $0xf0] sm:$0xff] }
 0x3cb   : > { %2039 = vmatmul.f32.gmra.mxu3 %v3538_v8  ;;  %v1809_v40 = vadd.f32 %v4608_v56, %v1721_v25  ;;  %v1890_v8 = vrot.slane %v1806_v24, 5 }
 0x3cc   : > { %5800 = vst [vmem:[#allocation54_spill] sm:$0xff] %v4946_v43  ;;  %v1722_v19 = vadd.f32 %v4946_v43, %v4943_v55  ;;  %1557 = vmatmul.f32.gmra.mxu1 %v1333_v38  ;;  %2052 = vmatpush.msrb.mxu2 %v4946_v43  ;;  %v1803_v2 = vadd.f32 %v4608_v56, %v1679_v49 }
 0x3cd   : > { %v1896_v41 = vrot.slane %v1809_v40, 2  ;;  %v3543_v40 = vld [vmem:[%s4009_s21 + $0x108] sm:$0xff] }
 0x3ce   : > { %v1723_v7 = vrot.slane %v1722_v19, 4  ;;  %2053 = vmatpush.msrb.mxu2 %v4943_v55 }
 0x3d0   : > { %v1724_v22 = vadd.f32 %v1723_v7, %v1722_v19  ;;  %2054 = vmatpush.msrb.mxu2 %v4932_v12  ;;  %v1887_v19 = vsel %vm1852_vm1, %v1886_v13, %v1803_v2 }
 0x3d1   : > { %v4958_v6 = vpop.f32.mrf.mxu1  ;;  %v1889_v4 = vsel %vm1855_vm2, %v1888_v47, %v1887_v19 }
 0x3d2   : > { %v1725_v33 = vrot.slane %v1724_v22, 2  ;;  %2055 = vmatpush.msrb.mxu2 %v4929_v15  ;;  %v1891_v42 = vsel %vm1858_vm3, %v1890_v8, %v1889_v4  ;;  %v3546_v4 = vld [vmem:[%s4009_s21 + $0x120] sm:$0xff]  ;;  %v5087_v15 = vadd.f32 %v4940_v17, %v4958_v6 }
 0x3d3   : > { %2042 = vmatmul.f32.gmra.mxu3 %v3539_v48  ;;  %v4990_v48 = vpop.f32.mrf.mxu2 }
 0x3d4   : > { %v1726_v38 = vadd.f32 %v1725_v33, %v1724_v22  ;;  %2056 = vmatpush.msrb.mxu2 %v4901_v52  ;;  %v1893_v22 = vsel %vm1861_vm4, %v1892_v9, %v1891_v42 }
 0x3d5   : > { %v1895_v25 = vsel %vm1864_vm5, %v1894_v0, %v1893_v22  ;;  %v3545_v0 = vld [vmem:[%s4009_s21 + $0x118] sm:$0xff] }
 0x3d6   : > { %v1727_v16 = vrot.slane %v1726_v38, 1  ;;  %2057 = vmatpush.msrb.mxu2 %v4915_v57  ;;  %v1897_v24 = vsel %vm1867_vm6, %v1896_v41, %v1895_v25  ;;  %v3548_v25 = vld [vmem:[%s4009_s21 + $0x130] sm:$0xff] }
 0x3d8   : > { %v1728_v18 = vadd.f32 %v1727_v16, %v1726_v38  ;;  %2058 = vmatpush.msrb.mxu2 %v4892_v59  ;;  %v3544_v16 = vld [vmem:[%s4009_s21 + $0x110] sm:$0xff] }
 0x3d9   : > { %v4972_v7 = vpop.f32.mrf.mxu1 }
 0x3da   : > { %v1810_v35 = vadd.f32 %v4608_v56, %v1728_v18  ;;  %2059 = vmatpush.msrb.mxu2 %v4910_v21  ;;  %v5073_v12 = vadd.f32 %v4940_v17, %v4972_v7 }
 0x3db   : > { %2045 = vmatmul.f32.gmra.mxu3 %v3540_v28  ;;  %v4997_v38 = vpop.f32.mrf.mxu2 }
 0x3dc   : > { %v1898_v49 = vrot.slane %v1810_v35, 1  ;;  %2060 = vmatpush.msrb.mxu2 %v4886_v10  ;;  %v3547_v35 = vld [vmem:[%s4009_s21 + $0x128] sm:$0xff]  ;;  %v1729_v59 = vadd.f32 %v5073_v12, %v5087_v15 }
 0x3de   : > { %v1899_v33 = vsel %vm1870_vm7, %v1898_v49, %v1897_v24  ;;  %2061 = vmatpush.msrb.mxu2 %v4898_v3 }
 0x3df   : > { %1920 = vst [vmem:[%s4648_s10 + $0x10] sm:$0xff] %v1899_v33  ;;  %v3549_v33 = vld [vmem:[%s4009_s21 + $0x138] sm:$0xff] }
 0x3e0   : > { %2062 = vmatpush.msrb.mxu2 %v4879_v50  ;;  %v3552_v50 = vld [vmem:[%s4009_s21 + $0x150] sm:$0xff] }
 0x3e1   : > { %v1519_v56 = vpop.f32.mrf.mxu1 }
 0x3e2   : > { %2063 = vmatpush.msrb.mxu2 %v4889_v36 }
 0x3e3   : > { %2048 = vmatmul.f32.gmra.mxu3 %v3541_v54  ;;  %v5000_v2 = vpop.f32.mrf.mxu2 }
 0x3e4   : > { %2064 = vmatpush.msrb.mxu2 %v4875_v30 }
 0x3e6   : > { %2065 = vmatpush.msrb.mxu2 %v4883_v14 }
 0x3e8   : > { %2066 = vmatpush.msrb.mxu2 %v4905_v31 }
 0x3e9   : > { %v1522_v13 = vpop.f32.mrf.mxu1 }
 0x3ea   : > { %2067 = vmatpush.msrb.mxu2 %v4919_v5 }
 0x3eb   : > { %2068 = vmatmul.f32.vlgmr.msrb.gmra.mxu2 %v3542_v1  ;;  %v5003_v19 = vpop.f32.mrf.mxu2 }
 0x3ee   : > { %v5145_v58 = vpop.f32.mrf.mxu3 }
 0x3f1   : > { %v1525_v47 = vpop.f32.mrf.mxu1 }
 0x3f2   : > { %v5044_v43 = vadd.f32 %v4940_v17, %v1525_v47 }
 0x3f3   : > { %2071 = vmatmul.f32.gmra.mxu2 %v3543_v40  ;;  %v5007_v41 = vpop.f32.mrf.mxu2  ;;  %v3550_v40 = vld [vmem:[%s4009_s21 + $0x140] sm:$0xff] }
 0x3f9   : > { %v1528_v8 = vpop.f32.mrf.mxu1 }
 0x3fb   : > { %2074 = vmatmul.f32.gmra.mxu2 %v3544_v16  ;;  %v5010_v22 = vpop.f32.mrf.mxu2  ;;  %v2261_v16 = vld [vmem:[%s5670_s3 + $0x78] sm:$0xff] }
 0x3fc   : > { %2264 = vmatpush.msra.mxu2 %v2261_v16  ;;  %v5038_v16 = vadd.f32 %v4940_v17, %v1519_v56 }
 0x401   : > { %v1531_v9 = vpop.f32.mrf.mxu1 }
 0x403   : > { %2077 = vmatmul.f32.gmra.mxu2 %v3545_v0  ;;  %v5013_v49 = vpop.f32.mrf.mxu2  ;;  %v2260_v0 = vld [vmem:[%s5670_s3 + $0x70] sm:$0xff] }
 0x404   : > { %2265 = vmatpush.msra.mxu2 %v2260_v0 }
 0x409   : > { %v1534_v18 = vpop.f32.mrf.mxu1 }
 0x40a   : > { %v5041_v0 = vadd.f32 %v4940_v17, %v1534_v18  ;;  %v5058_v18 = vadd.f32 %v4940_v17, %v1531_v9 }
 0x40b   : > { %2080 = vmatmul.f32.gmra.mxu2 %v3546_v4  ;;  %v5016_v1 = vpop.f32.mrf.mxu2  ;;  %v2259_v4 = vld [vmem:[%s5670_s3 + $0x68] sm:$0xff] }
 0x40c   : > { %2266 = vmatpush.msra.mxu2 %v2259_v4  ;;  %v2257_v4 = vld [vmem:[%s5670_s3 + $0x58] sm:$0xff]  ;;  %v1750_v9 = vadd.f32 %v5041_v0, %v5058_v18 }
 0x40e   : > { %v1751_v21 = vrot.slane %v1750_v9, 4 }
 0x410   : > { %v1752_v5 = vadd.f32 %v1751_v21, %v1750_v9 }
 0x411   : > { %v1537_v42 = vpop.f32.mrf.mxu1 }
 0x412   : > { %v1753_v21 = vrot.slane %v1752_v5, 2 }
 0x413   : > { %2083 = vmatmul.f32.gmra.mxu2 %v3547_v35  ;;  %v5029_v35 = vadd.f32 %v4940_v17, %v1522_v13  ;;  %v5053_v55 = vpop.f32.mrf.mxu2 }
 0x415   : > { %v1736_v56 = vadd.f32 %v5029_v35, %v5038_v16 }
 0x417   : > { %v1737_v7 = vrot.slane %v1736_v56, 4 }
 0x419   : > { %v1540_v28 = vpop.f32.mrf.mxu1  ;;  %v1738_v36 = vadd.f32 %v1737_v7, %v1736_v56  ;;  %v2251_v56 = vld [vmem:[%s5670_s3 + $0x28] sm:$0xff] }
 0x41a   : > { %v5047_v13 = vadd.f32 %v4940_v17, %v1540_v28 }
 0x41b   : > { %2086 = vmatmul.f32.gmra.mxu2 %v3548_v25  ;;  %v5032_v25 = vadd.f32 %v4940_v17, %v1528_v8  ;;  %v3551_v8 = vld [vmem:[%s4009_s21 + $0x148] sm:$0xff]  ;;  %v1739_v7 = vrot.slane %v1738_v36, 2 }
 0x41d   : > { %v1743_v28 = vadd.f32 %v5032_v25, %v5044_v43 }
 0x421   : > { %v1543_v24 = vpop.f32.mrf.mxu1 }
 0x423   : > { %2089 = vmatmul.f32.gmra.mxu2 %v3549_v33 }
 0x429   : > { %v1546_v54 = vpop.f32.mrf.mxu1 }
 0x42a   : > { %v5061_v47 = vadd.f32 %v4940_v17, %v1546_v54  ;;  %v5078_v54 = vadd.f32 %v4940_v17, %v1543_v24  ;;  %v1744_v24 = vrot.slane %v1743_v28, 4 }
 0x42b   : > { %2092 = vmatmul.f32.gmra.mxu2 %v3550_v40  ;;  %v2258_v40 = vld [vmem:[%s5670_s3 + $0x60] sm:$0xff] }
 0x42c   : > { %2267 = vmatpush.msra.mxu2 %v2258_v40  ;;  %v5066_v40 = vadd.f32 %v4940_v17, %v1537_v42  ;;  %v1764_v52 = vadd.f32 %v5061_v47, %v5078_v54  ;;  %v1745_v31 = vadd.f32 %v1744_v24, %v1743_v28 }
 0x42e   : > { %2268 = vmatpush.msra.mxu2 %v2257_v4  ;;  %v1757_v42 = vadd.f32 %v5047_v13, %v5066_v40  ;;  %v2255_v4 = vld [vmem:[%s5670_s3 + $0x48] sm:$0xff]  ;;  %v1765_v30 = vrot.slane %v1764_v52, 4  ;;  %v1746_v28 = vrot.slane %v1745_v31, 2 }
 0x430   : > { %v1758_v3 = vrot.slane %v1757_v42, 4  ;;  %v1766_v62 = vadd.f32 %v1765_v30, %v1764_v52  ;;  %v1747_v52 = vadd.f32 %v1746_v28, %v1745_v31 }
 0x431   : > { %v1549_v33 = vpop.f32.mrf.mxu1 }
 0x432   : > { %v5097_v10 = vadd.f32 %v4940_v17, %v1549_v33  ;;  %v5111_v33 = vpop.f32.mrf.mxu2  ;;  %v1759_v51 = vadd.f32 %v1758_v3, %v1757_v42  ;;  %v2249_v3 = vld [vmem:[%s5670_s3 + $0x18] sm:$0xff]  ;;  %v1740_v42 = vadd.f32 %v1739_v7, %v1738_v36  ;;  %v1767_v30 = vrot.slane %v1766_v62, 2 }
 0x433   : > { %2095 = vmatmul.f32.gmra.mxu2 %v3551_v8  ;;  %v2256_v8 = vld [vmem:[%s5670_s3 + $0x50] sm:$0xff]  ;;  %5801 = vst [vmem:[#allocation55_spill] sm:$0xff] %v5111_v33  ;;  %v1748_v31 = vrot.slane %v1747_v52, 1 }
 0x434   : > { %2269 = vmatpush.msra.mxu2 %v2256_v8  ;;  %v2254_v8 = vld [vmem:[%s5670_s3 + $0x40] sm:$0xff]  ;;  %v1760_v9 = vrot.slane %v1759_v51, 2  ;;  %v1741_v36 = vrot.slane %v1740_v42, 1  ;;  %v1768_v7 = vadd.f32 %v1767_v30, %v1766_v62 }
 0x436   : > { %2270 = vmatpush.msra.mxu2 %v2255_v4  ;;  %v2253_v4 = vld [vmem:[%s5670_s3 + $0x38] sm:$0xff]  ;;  %v1742_v62 = vadd.f32 %v1741_v36, %v1740_v42  ;;  %v1769_v30 = vrot.slane %v1768_v7, 1 }
 0x438   : > { %2271 = vmatpush.msra.mxu2 %v2254_v8  ;;  %v1730_v8 = vrot.slane %v1729_v59, 4  ;;  %v1770_v42 = vadd.f32 %v1769_v30, %v1768_v7 }
 0x439   : > { %v1552_v57 = vpop.f32.mrf.mxu1 }
 0x43a   : > { %v5100_v6 = vadd.f32 %v4940_v17, %v1552_v57  ;;  %2272 = vmatpush.msra.mxu2 %v2253_v4  ;;  %v2252_v57 = vld [vmem:[%s5670_s3 + $0x30] sm:$0xff]  ;;  %v1731_v34 = vadd.f32 %v1730_v8, %v1729_v59  ;;  %v1754_v59 = vadd.f32 %v1753_v21, %v1752_v5  ;;  %v2247_v8 = vld [vmem:[%s5670_s3 + $0x8] sm:$0xff] }
 0x43b   : > { %2098 = vmatmul.f32.gmra.mxu2 %v3552_v50 }
 0x43c   : > { %v1771_v14 = vadd.f32 %v5100_v6, %v5097_v10  ;;  %2273 = vmatpush.msra.mxu2 %v2252_v57  ;;  %v3553_v57 = vld [vmem:[%s4009_s21 + $0x158] sm:$0xff]  ;;  %v1755_v21 = vrot.slane %v1754_v59, 1 }
 0x43e   : > { %v1772_v50 = vrot.slane %v1771_v14, 4  ;;  %2274 = vmatpush.msra.mxu2 %v2251_v56  ;;  %v1732_v56 = vrot.slane %v1731_v34, 2 }
 0x440   : > { %v1773_v24 = vadd.f32 %v1772_v50, %v1771_v14  ;;  %2275 = vmatpush.msra.mxu2 %v2250_v61  ;;  %v2248_v50 = vld [vmem:[%s5670_s3 + $0x10] sm:$0xff]  ;;  %v1761_v61 = vadd.f32 %v1760_v9, %v1759_v51  ;;  %v1733_v5 = vadd.f32 %v1732_v56, %v1731_v34 }
 0x441   : > { %v1555_v4 = vpop.f32.mrf.mxu1 }
 0x442   : > { %2276 = vmatpush.msra.mxu2 %v2249_v3  ;;  %v1774_v14 = vrot.slane %v1773_v24, 2  ;;  %v5135_v51 = vadd.f32 %v4940_v17, %v1555_v4  ;;  %v1734_v56 = vrot.slane %v1733_v5, 1 }
 0x443   : > { %2101 = vmatmul.f32.gmra.mxu2 %v3553_v57  ;;  %v5129_v57 = vpop.f32.mrf.mxu2 }
 0x444   : > { %2277 = vmatpush.msra.mxu2 %v2248_v50  ;;  %5802 = vst [vmem:[#allocation56_spill] sm:$0xff] %v5129_v57  ;;  %v1775_v28 = vadd.f32 %v1774_v14, %v1773_v24  ;;  %v1762_v50 = vrot.slane %v1761_v61, 1  ;;  %v3554_v57 = vld [vmem:[%s4009_s21 + $0x160] sm:$0xff]  ;;  %v1749_v14 = vadd.f32 %v1748_v31, %v1747_v52  ;;  %v1735_v52 = vadd.f32 %v1734_v56, %v1733_v5 }
 0x445   : > { %5803 = vst [vmem:[#allocation57_spill] sm:$0xff] %v5135_v51 }
 0x446   : > { %2278 = vmatpush.msra.mxu2 %v2247_v8  ;;  %v1776_v34 = vrot.slane %v1775_v28, 1  ;;  %v1756_v8 = vadd.f32 %v1755_v21, %v1754_v59 }
 0x448   : > { %2279 = vmatpush.msra.mxu2 %v2246_v45  ;;  %v3555_v45 = vld [vmem:[#allocation10] ss:$0 sm:$0xff]  ;;  %v1777_v33 = vadd.f32 %v1776_v34, %v1775_v28 }
 0x449   : > { %v1558_v3 = vpop.f32.mrf.mxu1  ;;  %v1813_v36 = vadd.f32 %v3555_v45, %v1749_v14  ;;  %v1814_v31 = vadd.f32 %v3555_v45, %v1756_v8 }
 0x44a   : > { %v5138_v9 = vadd.f32 %v4940_v17, %v1558_v3  ;;  %v1763_v17 = vadd.f32 %v1762_v50, %v1761_v61  ;;  %v1812_v3 = vadd.f32 %v3555_v45, %v1742_v62  ;;  %v1816_v50 = vadd.f32 %v3555_v45, %v1770_v42 }
 0x44b   : > { %2104 = vmatmul.f32.gmra.mxu2 %v3554_v57  ;;  %v1902_v7 = vrot.slane %v1813_v36, 6  ;;  %v1817_v30 = vadd.f32 %v3555_v45, %v1777_v33  ;;  %v1904_v28 = vrot.slane %v1814_v31, 5 }
 0x44c   : > { %5804 = vst [vmem:[#allocation58_spill] sm:$0xff] %v5138_v9  ;;  %v1778_v24 = vadd.f32 %v5138_v9, %v5135_v51  ;;  %2117 = vmatpush.msrb.mxu3 %v5138_v9  ;;  %v5148_v9 = vpop.f32.mrf.mxu2  ;;  %v1815_v21 = vadd.f32 %v3555_v45, %v1763_v17  ;;  %v1900_v61 = vrot.slane %v1812_v3, 7  ;;  %v1908_v56 = vrot.slane %v1816_v50, 3  ;;  %v5157_v17 = vpop.f32.mrf.mxu3 }
 0x44e   : > { %v1779_v4 = vrot.slane %v1778_v24, 4  ;;  %2118 = vmatpush.msrb.mxu3 %v5135_v51  ;;  %v3556_v51 = vld [vmem:[%s4009_s21 + $0x168] sm:$0xff]  ;;  %v1906_v5 = vrot.slane %v1815_v21, 4 }
 0x450   : > { %v1780_v57 = vadd.f32 %v1779_v4, %v1778_v24  ;;  %2119 = vmatpush.msrb.mxu3 %v5100_v6  ;;  %v1811_v24 = vadd.f32 %v3555_v45, %v1735_v52  ;;  %v1910_v4 = vrot.slane %v1817_v30, 2 }
 0x452   : > { %v1781_v59 = vrot.slane %v1780_v57, 2  ;;  %2120 = vmatpush.msrb.mxu3 %v5097_v10  ;;  %v1901_v34 = vsel %vm1852_vm1, %v1900_v61, %v1811_v24 }
 0x453   : > { %2107 = vmatmul.f32.gmra.mxu2 %v3556_v51  ;;  %v1903_v51 = vsel %vm1855_vm2, %v1902_v7, %v1901_v34  ;;  %v3559_v7 = vld [vmem:[%s4009_s21 + $0x180] sm:$0xff]  ;;  %v3561_v34 = vld [vmem:[%s4009_s21 + $0x190] sm:$0xff] }
 0x454   : > { %v1782_v62 = vadd.f32 %v1781_v59, %v1780_v57  ;;  %2121 = vmatpush.msrb.mxu3 %v5061_v47  ;;  %v1905_v33 = vsel %vm1858_vm3, %v1904_v28, %v1903_v51  ;;  %v3557_v57 = vld [vmem:[%s4009_s21 + $0x170] sm:$0xff]  ;;  %v5163_v36 = vpop.f32.mrf.mxu2  ;;  %v5174_v61 = vpop.f32.mrf.mxu3  ;;  %v2183_v28 = vadd.f32 %v4974_v46, %v4557_v60  ;;  %v2185_v60 = vadd.f32 %v4997_v38, %v4524_v44  ;;  %v3564_v38 = vld [vmem:[%s4009_s21 + $0x1a8] sm:$0xff] }
 0x455   : > { %v1907_v42 = vsel %vm1861_vm4, %v1906_v5, %v1905_v33  ;;  %v2187_v44 = vadd.f32 %v5003_v19, %v4534_v53  ;;  %v2189_v53 = vadd.f32 %v5010_v22, %v4537_v27  ;;  %v3566_v19 = vld [vmem:[%s4009_s21 + $0x1b8] sm:$0xff]  ;;  %v3568_v27 = vld [vmem:[%s4009_s21 + $0x1c8] sm:$0xff] }
 0x456   : > { %v1783_v14 = vrot.slane %v1782_v62, 1  ;;  %2122 = vmatpush.msrb.mxu3 %v5078_v54  ;;  %v1909_v52 = vsel %vm1864_vm5, %v1908_v56, %v1907_v42  ;;  %v2553_v22 = vld [vmem:[#allocation7 + $0xf8] sm:$0xff] }
 0x457   : > { %v1911_v59 = vsel %vm1867_vm6, %v1910_v4, %v1909_v52 }
 0x458   : > { %v1784_v8 = vadd.f32 %v1783_v14, %v1782_v62  ;;  %2123 = vmatpush.msrb.mxu3 %v5047_v13  ;;  %v2182_v62 = vadd.f32 %v4954_v11, %v4571_v32  ;;  %v3560_v14 = vld [vmem:[%s4009_s21 + $0x188] sm:$0xff]  ;;  %v2184_v11 = vadd.f32 %v4990_v48, %v4531_v29  ;;  %v2186_v29 = vadd.f32 %v5000_v2, %v4544_v37  ;;  %v3563_v48 = vld [vmem:[%s4009_s21 + $0x1a0] sm:$0xff]  ;;  %v3565_v2 = vld [vmem:[%s4009_s21 + $0x1b0] sm:$0xff] }
 0x459   : > { %v2188_v37 = vadd.f32 %v5007_v41, %v4550_v20  ;;  %v3567_v41 = vld [vmem:[%s4009_s21 + $0x1c0] sm:$0xff] }
 0x45a   : > { %v1818_v3 = vadd.f32 %v3555_v45, %v1784_v8  ;;  %2124 = vmatpush.msrb.mxu3 %v5066_v40  ;;  %v3558_v45 = vld [vmem:[%s4009_s21 + $0x178] sm:$0xff] }
 0x45b   : > { %2110 = vmatmul.f32.gmra.mxu2 %v3557_v57  ;;  %v3562_v8 = vld [vmem:[%s4009_s21 + $0x198] sm:$0xff] }
 0x45c   : > { %v1912_v31 = vrot.slane %v1818_v3, 1  ;;  %2125 = vmatpush.msrb.mxu3 %v5041_v0  ;;  %v5177_v50 = vpop.f32.mrf.mxu2  ;;  %v5185_v30 = vpop.f32.mrf.mxu3 }
 0x45e   : > { %v1913_v21 = vsel %vm1870_vm7, %v1912_v31, %v1911_v59  ;;  %2126 = vmatpush.msrb.mxu3 %v5058_v18  ;;  %v2190_v59 = vadd.f32 %v5013_v49, %v4562_v63  ;;  %v2551_v49 = vld [vmem:[#allocation7 + $0xe8] sm:$0xff] }
 0x45f   : > { %1921 = vst [vmem:[%s4648_s10 + $0x18] sm:$0xff] %v1913_v21 }
 0x460   : > { %2127 = vmatpush.msrb.mxu3 %v5032_v25 }
 0x462   : > { %2128 = vmatpush.msrb.mxu3 %v5044_v43 }
 0x463   : > { %2113 = vmatmul.f32.gmra.mxu2 %v3558_v45  ;;  %v2191_v45 = vadd.f32 %v5016_v1, %v4547_v39  ;;  %v3569_v39 = vld [vmem:[%s4009_s21 + $0x1d0] sm:$0xff] }
 0x464   : > { %2129 = vmatpush.msrb.mxu3 %v5029_v35  ;;  %v5194_v32 = vpop.f32.mrf.mxu3  ;;  %v2549_v1 = vld [vmem:[#allocation7 + $0xd8] sm:$0xff] }
 0x466   : > { %2130 = vmatpush.msrb.mxu3 %v5038_v16 }
 0x468   : > { %2131 = vmatpush.msrb.mxu3 %v5073_v12 }
 0x46a   : > { %2132 = vmatpush.msrb.mxu3 %v5087_v15 }
 0x46b   : > { %2133 = vmatmul.f32.vlgmr.msrb.gmra.mxu3 %v3559_v7  ;;  %2280 = vmatmul.f32.vlgmr.msra.gmra.mxu2 %v2182_v62  ;;  %v2552_v7 = vld [vmem:[#allocation7 + $0xf0] sm:$0xff] }
 0x46c   : > { %v5203_v46 = vpop.f32.mrf.mxu3  ;;  %2556 = vmatpush.msra.mxu3 %v2553_v22  ;;  %v2540_v22 = vld [vmem:[#allocation7 + $0x90] sm:$0xff] }
 0x46e   : > { %v5187_v24 = vpop.f32.mrf.mxu2  ;;  %2557 = vmatpush.msra.mxu3 %v2552_v7 }
 0x470   : > { %2558 = vmatpush.msra.mxu3 %v2551_v49  ;;  %v2539_v49 = vld [vmem:[#allocation7 + $0x88] sm:$0xff] }
 0x473   : > { %2136 = vmatmul.f32.gmra.mxu3 %v3560_v14  ;;  %2283 = vmatmul.f32.gmra.mxu2 %v2183_v28  ;;  %v2550_v28 = vld [vmem:[#allocation7 + $0xe0] sm:$0xff]  ;;  %v2192_v14 = vadd.f32 %v5053_v55, %v4567_v23  ;;  %v2545_v55 = vld [vmem:[#allocation7 + $0xb8] sm:$0xff] }
 0x474   : > { %v5211_v4 = vpop.f32.mrf.mxu3  ;;  %2559 = vmatpush.msra.mxu3 %v2550_v28  ;;  %v3570_v23 = vld [vmem:[%s4009_s21 + $0x1d8] sm:$0xff]  ;;  %v5808_v28 = vld [vmem:[#allocation26_spill] sm:$0xff] }
 0x476   : > { %v5192_v5 = vpop.f32.mrf.mxu2  ;;  %2560 = vmatpush.msra.mxu3 %v2549_v1 }
 0x47b   : > { %2139 = vmatmul.f32.gmra.mxu3 %v3561_v34  ;;  %2286 = vmatmul.f32.gmra.mxu2 %v2184_v11  ;;  %v2548_v11 = vld [vmem:[#allocation7 + $0xd0] sm:$0xff] }
 0x47c   : > { %v5218_v3 = vpop.f32.mrf.mxu3  ;;  %2561 = vmatpush.msra.mxu3 %v2548_v11  ;;  %v3572_v11 = vld [vmem:[%s4009_s21 + $0x1e8] sm:$0xff] }
 0x47e   : > { %v5199_v56 = vpop.f32.mrf.mxu2 }
 0x483   : > { %2142 = vmatmul.f32.gmra.mxu3 %v3562_v8  ;;  %2289 = vmatmul.f32.gmra.mxu2 %v2185_v60  ;;  %v2547_v8 = vld [vmem:[#allocation7 + $0xc8] sm:$0xff] }
 0x484   : > { %v5227_v52 = vpop.f32.mrf.mxu3  ;;  %2562 = vmatpush.msra.mxu3 %v2547_v8 }
 0x486   : > { %v5206_v51 = vpop.f32.mrf.mxu2 }
 0x48b   : > { %2145 = vmatmul.f32.gmra.mxu3 %v3563_v48  ;;  %2292 = vmatmul.f32.gmra.mxu2 %v2186_v29  ;;  %v2546_v29 = vld [vmem:[#allocation7 + $0xc0] sm:$0xff] }
 0x48c   : > { %v5236_v20 = vpop.f32.mrf.mxu3  ;;  %v5805_v48 = vld [vmem:[#allocation55_spill] sm:$0xff]  ;;  %2563 = vmatpush.msra.mxu3 %v2546_v29  ;;  %v5809_v29 = vld [vmem:[#allocation25_spill] sm:$0xff] }
 0x48e   : > { %v5213_v33 = vpop.f32.mrf.mxu2  ;;  %2564 = vmatpush.msra.mxu3 %v2545_v55 }
 0x493   : > { %2148 = vmatmul.f32.gmra.mxu3 %v3564_v38  ;;  %2295 = vmatmul.f32.gmra.mxu2 %v2187_v44  ;;  %v2193_v44 = vadd.f32 %v5805_v48, %v4553_v26  ;;  %v2544_v38 = vld [vmem:[#allocation7 + $0xb0] sm:$0xff]  ;;  %v2196_v48 = vadd.f32 %v5163_v36, %v5809_v29 }
 0x494   : > { %v5244_v62 = vpop.f32.mrf.mxu3  ;;  %2565 = vmatpush.msra.mxu3 %v2544_v38  ;;  %v3571_v26 = vld [vmem:[%s4009_s21 + $0x1e0] sm:$0xff] }
 0x496   : > { %v5220_v42 = vpop.f32.mrf.mxu2 }
 0x49b   : > { %2151 = vmatmul.f32.gmra.mxu3 %v3565_v2  ;;  %2298 = vmatmul.f32.gmra.mxu2 %v2188_v37  ;;  %v2543_v2 = vld [vmem:[#allocation7 + $0xa8] sm:$0xff] }
 0x49c   : > { %v5251_v34 = vpop.f32.mrf.mxu3  ;;  %2566 = vmatpush.msra.mxu3 %v2543_v2  ;;  %v3574_v2 = vld [vmem:[%s4009_s21 + $0x1f8] sm:$0xff] }
 0x49e   : > { %v5225_v57 = vpop.f32.mrf.mxu2 }
 0x4a3   : > { %2154 = vmatmul.f32.gmra.mxu3 %v3566_v19  ;;  %2301 = vmatmul.f32.gmra.mxu2 %v2189_v53  ;;  %v2542_v53 = vld [vmem:[#allocation7 + $0xa0] sm:$0xff] }
 0x4a4   : > { %v5260_v19 = vpop.f32.mrf.mxu3  ;;  %2567 = vmatpush.msra.mxu3 %v2542_v53 }
 0x4a6   : > { %v5232_v31 = vpop.f32.mrf.mxu2 }
 0x4ab   : > { %2157 = vmatmul.f32.gmra.mxu3 %v3567_v41  ;;  %2304 = vmatmul.f32.gmra.mxu2 %v2190_v59  ;;  %v5806_v59 = vld [vmem:[#allocation27_spill] sm:$0xff]  ;;  %v5807_v41 = vld [vmem:[#allocation56_spill] sm:$0xff] }
 0x4ac   : > { %v5269_v1 = vpop.f32.mrf.mxu3 }
 0x4ae   : > { %v5239_v21 = vpop.f32.mrf.mxu2 }
 0x4b3   : > { %2160 = vmatmul.f32.gmra.mxu3 %v3568_v27  ;;  %2307 = vmatmul.f32.gmra.mxu2 %v2191_v45  ;;  %v2194_v45 = vadd.f32 %v5807_v41, %v5806_v59  ;;  %v2541_v27 = vld [vmem:[#allocation7 + $0x98] sm:$0xff] }
 0x4b4   : > { %2568 = vmatpush.msra.mxu3 %v2541_v27  ;;  %v5811_v41 = vld [vmem:[#allocation34_spill] sm:$0xff] }
 0x4b5   : > { %v2198_v36 = vadd.f32 %v5145_v58, %v5811_v41  ;;  %v5813_v58 = vld [vmem:[#allocation31_spill] sm:$0xff] }
 0x4b6   : > { %v5246_v63 = vpop.f32.mrf.mxu2  ;;  %2569 = vmatpush.msra.mxu3 %v2540_v22  ;;  %v2200_v29 = vadd.f32 %v5174_v61, %v5813_v58  ;;  %v5815_v61 = vld [vmem:[#allocation32_spill] sm:$0xff] }
 0x4b8   : > { %2570 = vmatpush.msra.mxu3 %v2539_v49  ;;  %v5812_v49 = vld [vmem:[#allocation29_spill] sm:$0xff] }
 0x4bb   : > { %2163 = vmatmul.f32.gmra.mxu3 %v3569_v39  ;;  %2310 = vmatmul.f32.gmra.mxu2 %v2192_v14  ;;  %v2195_v14 = vadd.f32 %v5148_v9, %v5808_v28  ;;  %v2538_v39 = vld [vmem:[#allocation7 + $0x80] sm:$0xff]  ;;  %v5810_v9 = vld [vmem:[#allocation24_spill] sm:$0xff] }
 0x4bc   : > { %2571 = vmatpush.msra.mxu3 %v2538_v39  ;;  %v2197_v38 = vadd.f32 %v5177_v50, %v5810_v9  ;;  %v2199_v50 = vadd.f32 %v5157_v17, %v5812_v49  ;;  %v5814_v17 = vld [vmem:[#allocation23_spill] sm:$0xff]  ;;  %v2202_v49 = vadd.f32 %v5194_v32, %v5815_v61 }
 0x4bd   : > { %v5817_v32 = vld [vmem:[#allocation19_spill] sm:$0xff] }
 0x4be   : > { %v5253_v60 = vpop.f32.mrf.mxu2 }
 0x4c3   : > { %2166 = vmatmul.f32.gmra.mxu3 %v3570_v23  ;;  %2313 = vmatmul.f32.gmra.mxu2 %v2193_v44  ;;  %v3573_v44 = vld [vmem:[%s4009_s21 + $0x1f0] sm:$0xff]  ;;  %v5277_v23 = vpop.f32.mrf.mxu3  ;;  %s3121_s21 = scalar_lea.sflag [#allocation4], %s394_s23 }
 0x4c6   : > { %v5258_v37 = vpop.f32.mrf.mxu2 }
 0x4cb   : > { %2169 = vmatmul.f32.gmra.mxu3 %v3571_v26  ;;  %2316 = vmatmul.f32.gmra.mxu2 %v2194_v45  ;;  %v5284_v53 = vpop.f32.mrf.mxu3  ;;  %v5290_v45 = vld [vmem:[#allocation5 + $0x1] ss:$0 sm:$0xff] }
 0x4ce   : > { %v5265_v7 = vpop.f32.mrf.mxu2 }
 0x4d3   : > { %2172 = vmatmul.f32.gmra.mxu3 %v3572_v11  ;;  %2319 = vmatmul.f32.gmra.mxu2 %v2195_v14 }
 0x4d6   : > { %v5272_v8 = vpop.f32.mrf.mxu2 }
 0x4db   : > { %2175 = vmatmul.f32.gmra.mxu3 %v3573_v44  ;;  %2322 = vmatmul.f32.gmra.mxu2 %v2196_v48 }
 0x4de   : > { %v5279_v55 = vpop.f32.mrf.mxu2 }
 0x4e3   : > { %2178 = vmatmul.f32.gmra.mxu3 %v3574_v2  ;;  %2325 = vmatmul.f32.gmra.mxu2 %v2197_v38  ;;  %v2201_v2 = vadd.f32 %v5185_v30, %v5814_v17  ;;  %v5816_v30 = vld [vmem:[#allocation22_spill] sm:$0xff]  ;;  %v2204_v17 = vadd.f32 %v5211_v4, %v5817_v32  ;;  %v5819_v4 = vld [vmem:[#allocation28_spill] sm:$0xff] }
 0x4e4   : > { %v2203_v58 = vadd.f32 %v5203_v46, %v5816_v30  ;;  %v5818_v46 = vld [vmem:[#allocation21_spill] sm:$0xff]  ;;  %v2206_v30 = vadd.f32 %v5227_v52, %v5819_v4 }
 0x4e5   : > { %v2205_v61 = vadd.f32 %v5218_v3, %v5818_v46  ;;  %v5820_v3 = vld [vmem:[#allocation20_spill] sm:$0xff]  ;;  %v5821_v52 = vld [vmem:[#allocation33_spill] sm:$0xff] }
 0x4e6   : > { %v5286_v59 = vpop.f32.mrf.mxu2  ;;  %v2207_v32 = vadd.f32 %v5236_v20, %v5820_v3  ;;  %v2208_v46 = vadd.f32 %v5244_v62, %v5821_v52  ;;  %v5822_v20 = vld [vmem:[#allocation30_spill] sm:$0xff]  ;;  %v5823_v62 = vld [vmem:[#allocation35_spill] sm:$0xff] }
 0x4e7   : > { %v2209_v4 = vadd.f32 %v5251_v34, %v5822_v20  ;;  %v2210_v3 = vadd.f32 %v5260_v19, %v5823_v62  ;;  %v5824_v34 = vld [vmem:[#allocation36_spill] sm:$0xff] }
 0x4e8   : > { %v2211_v52 = vadd.f32 %v5269_v1, %v5824_v34 }
 0x4eb   : > { %2328 = vmatmul.f32.gmra.mxu2 %v2198_v36 }
 0x4ee   : > { %v5292_v26 = vpop.f32.mrf.mxu3  ;;  %v2281_v27 = vpop.f32.mrf.mxu2 }
 0x4ef   : > { %v2282_v22 = vadd.f32 %v5290_v45, %v2281_v27 }
 0x4f1   : > { %v2473_v28 = vmax.f32 %v2282_v22, 0.0 }
 0x4f3   : > { %2331 = vmatmul.f32.gmra.mxu2 %v2199_v50  ;;  %2572 = vmatmul.f32.vlgmr.msra.gmra.mxu3 %v2473_v28 }
 0x4f6   : > { %v5297_v14 = vpop.f32.mrf.mxu3  ;;  %v2284_v39 = vpop.f32.mrf.mxu2 }
 0x4f7   : > { %v2285_v11 = vadd.f32 %v5290_v45, %v2284_v39 }
 0x4f9   : > { %v2474_v48 = vmax.f32 %v2285_v11, 0.0 }
 0x4fb   : > { %2334 = vmatmul.f32.gmra.mxu2 %v2200_v29  ;;  %2575 = vmatmul.f32.gmra.mxu3 %v2474_v48 }
 0x4fe   : > { %v5302_v44 = vpop.f32.mrf.mxu3  ;;  %v2287_v9 = vpop.f32.mrf.mxu2 }
 0x4ff   : > { %v2288_v38 = vadd.f32 %v5290_v45, %v2287_v9 }
 0x501   : > { %v2475_v41 = vmax.f32 %v2288_v38, 0.0 }
 0x503   : > { %2337 = vmatmul.f32.gmra.mxu2 %v2201_v2  ;;  %2578 = vmatmul.f32.gmra.mxu3 %v2475_v41 }
 0x506   : > { %v5307_v36 = vpop.f32.mrf.mxu3  ;;  %v2290_v27 = vpop.f32.mrf.mxu2 }
 0x507   : > { %v2291_v22 = vadd.f32 %v5290_v45, %v2290_v27 }
 0x509   : > { %v2476_v50 = vmax.f32 %v2291_v22, 0.0 }
 0x50b   : > { %2340 = vmatmul.f32.gmra.mxu2 %v2202_v49  ;;  %2581 = vmatmul.f32.gmra.mxu3 %v2476_v50 }
 0x50e   : > { %v5312_v28 = vpop.f32.mrf.mxu3  ;;  %v2293_v39 = vpop.f32.mrf.mxu2 }
 0x50f   : > { %v2294_v11 = vadd.f32 %v5290_v45, %v2293_v39 }
 0x511   : > { %v2477_v29 = vmax.f32 %v2294_v11, 0.0 }
 0x513   : > { %2343 = vmatmul.f32.gmra.mxu2 %v2203_v58  ;;  %2584 = vmatmul.f32.gmra.mxu3 %v2477_v29 }
 0x516   : > { %v5317_v48 = vpop.f32.mrf.mxu3  ;;  %v2296_v9 = vpop.f32.mrf.mxu2 }
 0x517   : > { %v2297_v38 = vadd.f32 %v5290_v45, %v2296_v9 }
 0x519   : > { %v2478_v2 = vmax.f32 %v2297_v38, 0.0 }
 0x51b   : > { %2346 = vmatmul.f32.gmra.mxu2 %v2204_v17  ;;  %2587 = vmatmul.f32.gmra.mxu3 %v2478_v2 }
 0x51e   : > { %v5322_v41 = vpop.f32.mrf.mxu3  ;;  %v2299_v27 = vpop.f32.mrf.mxu2 }
 0x51f   : > { %v2300_v22 = vadd.f32 %v5290_v45, %v2299_v27 }
 0x521   : > { %v2479_v49 = vmax.f32 %v2300_v22, 0.0 }
 0x523   : > { %2349 = vmatmul.f32.gmra.mxu2 %v2205_v61  ;;  %2590 = vmatmul.f32.gmra.mxu3 %v2479_v49 }
 0x526   : > { %v5327_v50 = vpop.f32.mrf.mxu3  ;;  %v2302_v39 = vpop.f32.mrf.mxu2 }
 0x527   : > { %v2303_v11 = vadd.f32 %v5290_v45, %v2302_v39 }
 0x529   : > { %v2480_v58 = vmax.f32 %v2303_v11, 0.0 }
 0x52b   : > { %2352 = vmatmul.f32.gmra.mxu2 %v2206_v30  ;;  %2593 = vmatmul.f32.gmra.mxu3 %v2480_v58 }
 0x52e   : > { %v5332_v29 = vpop.f32.mrf.mxu3  ;;  %v2305_v9 = vpop.f32.mrf.mxu2 }
 0x52f   : > { %v2306_v38 = vadd.f32 %v5290_v45, %v2305_v9 }
 0x531   : > { %v2481_v17 = vmax.f32 %v2306_v38, 0.0 }
 0x533   : > { %2355 = vmatmul.f32.gmra.mxu2 %v2207_v32  ;;  %2596 = vmatmul.f32.gmra.mxu3 %v2481_v17 }
 0x536   : > { %v5337_v2 = vpop.f32.mrf.mxu3  ;;  %v2308_v27 = vpop.f32.mrf.mxu2 }
 0x537   : > { %v2309_v22 = vadd.f32 %v5290_v45, %v2308_v27 }
 0x539   : > { %v2482_v61 = vmax.f32 %v2309_v22, 0.0 }
 0x53b   : > { %2358 = vmatmul.f32.gmra.mxu2 %v2208_v46  ;;  %2599 = vmatmul.f32.gmra.mxu3 %v2482_v61 }
 0x53e   : > { %v5342_v49 = vpop.f32.mrf.mxu3  ;;  %v2311_v39 = vpop.f32.mrf.mxu2 }
 0x53f   : > { %v2312_v11 = vadd.f32 %v5290_v45, %v2311_v39 }
 0x541   : > { %v2483_v30 = vmax.f32 %v2312_v11, 0.0  ;;  %v5825_v11 = vld [vmem:[#allocation37_spill] sm:$0xff] }
 0x542   : > { %v2212_v19 = vadd.f32 %v5277_v23, %v5825_v11  ;;  %v5827_v23 = vld [vmem:[#allocation50_spill] sm:$0xff] }
 0x543   : > { %2361 = vmatmul.f32.gmra.mxu2 %v2209_v4  ;;  %2602 = vmatmul.f32.gmra.mxu3 %v2483_v30 }
 0x546   : > { %v5347_v58 = vpop.f32.mrf.mxu3  ;;  %v2314_v9 = vpop.f32.mrf.mxu2 }
 0x547   : > { %v2315_v38 = vadd.f32 %v5290_v45, %v2314_v9 }
 0x549   : > { %v2484_v32 = vmax.f32 %v2315_v38, 0.0  ;;  %v5826_v38 = vld [vmem:[#allocation38_spill] sm:$0xff] }
 0x54a   : > { %v2213_v1 = vadd.f32 %v5284_v53, %v5826_v38  ;;  %v5828_v53 = vld [vmem:[#allocation47_spill] sm:$0xff] }
 0x54b   : > { %2364 = vmatmul.f32.gmra.mxu2 %v2210_v3  ;;  %2605 = vmatmul.f32.gmra.mxu3 %v2484_v32 }
 0x54e   : > { %v2317_v17 = vpop.f32.mrf.mxu2  ;;  %v5353_v22 = vpop.f32.mrf.mxu3 }
 0x54f   : > { %v2318_v27 = vadd.f32 %v5290_v45, %v2317_v17 }
 0x551   : > { %v2485_v46 = vmax.f32 %v2318_v27, 0.0  ;;  %v2214_v27 = vadd.f32 %v5187_v24, %v5827_v23 }
 0x553   : > { %2367 = vmatmul.f32.gmra.mxu2 %v2211_v52  ;;  %2608 = vmatmul.f32.gmra.mxu3 %v2485_v46 }
 0x556   : > { %v2320_v61 = vpop.f32.mrf.mxu2  ;;  %v5360_v4 = vpop.f32.mrf.mxu3 }
 0x557   : > { %v2321_v39 = vadd.f32 %v5290_v45, %v2320_v61 }
 0x559   : > { %v2486_v20 = vmax.f32 %v2321_v39, 0.0  ;;  %v2215_v39 = vadd.f32 %v5192_v5, %v5828_v53 }
 0x55b   : > { %2370 = vmatmul.f32.gmra.mxu2 %v2212_v19  ;;  %2611 = vmatmul.f32.gmra.mxu3 %v2486_v20 }
 0x55e   : > { %v2323_v30 = vpop.f32.mrf.mxu2  ;;  %v5365_v3 = vpop.f32.mrf.mxu3 }
 0x55f   : > { %v2324_v9 = vadd.f32 %v5290_v45, %v2323_v30 }
 0x561   : > { %v2487_v62 = vmax.f32 %v2324_v9, 0.0  ;;  %v5829_v9 = vld [vmem:[#allocation41_spill] sm:$0xff] }
 0x562   : > { %v2216_v24 = vadd.f32 %v5199_v56, %v5829_v9 }
 0x563   : > { %2373 = vmatmul.f32.gmra.mxu2 %v2213_v1  ;;  %2614 = vmatmul.f32.gmra.mxu3 %v2487_v62  ;;  %v5378_v1 = vld [vmem:[#allocation8 + $0x1] ss:$0 sm:$0xff] }
 0x566   : > { %v2326_v32 = vpop.f32.mrf.mxu2  ;;  %v5370_v52 = vpop.f32.mrf.mxu3 }
 0x567   : > { %v2327_v17 = vadd.f32 %v5290_v45, %v2326_v32 }
 0x569   : > { %v2488_v34 = vmax.f32 %v2327_v17, 0.0 }
 0x56b   : > { %2376 = vmatmul.f32.gmra.mxu2 %v2214_v27  ;;  %2617 = vmatmul.f32.gmra.mxu3 %v2488_v34  ;;  %v5830_v27 = vld [vmem:[#allocation39_spill] sm:$0xff] }
 0x56c   : > { %v2217_v34 = vadd.f32 %v5206_v51, %v5830_v27 }
 0x56e   : > { %v2329_v46 = vpop.f32.mrf.mxu2 }
 0x56f   : > { %v2330_v61 = vadd.f32 %v5290_v45, %v2329_v46 }
 0x571   : > { %v2489_v11 = vmax.f32 %v2330_v61, 0.0 }
 0x573   : > { %2379 = vmatmul.f32.gmra.mxu2 %v2215_v39  ;;  %2620 = vmatmul.f32.gmra.mxu3 %v2489_v11  ;;  %v5831_v11 = vld [vmem:[#allocation43_spill] sm:$0xff] }
 0x576   : > { %v2332_v19 = vpop.f32.mrf.mxu2  ;;  %v2573_v20 = vpop.f32.mrf.mxu3 }
 0x577   : > { %v2333_v30 = vadd.f32 %v5290_v45, %v2332_v19  ;;  %v2574_v17 = vadd.f32 %v5378_v1, %v2573_v20  ;;  %v2218_v19 = vadd.f32 %v5213_v33, %v5831_v11 }
 0x579   : > { %v2490_v38 = vmax.f32 %v2333_v30, 0.0 }
 0x57b   : > { %2382 = vmatmul.f32.gmra.mxu2 %v2216_v24  ;;  %2623 = vmatmul.f32.gmra.mxu3 %v2490_v38 }
 0x57e   : > { %v2335_v62 = vpop.f32.mrf.mxu2  ;;  %v2576_v32 = vpop.f32.mrf.mxu3 }
 0x57f   : > { %v2336_v5 = vadd.f32 %v5290_v45, %v2335_v62  ;;  %v2577_v23 = vadd.f32 %v5378_v1, %v2576_v32 }
 0x581   : > { %v2491_v46 = vmax.f32 %v2336_v5, 0.0  ;;  %v2765_v61 = vadd.f32 %v2577_v23, %v2574_v17  ;;  %v5832_v17 = vld [vmem:[#allocation40_spill] sm:$0xff] }
 0x582   : > { %v2219_v5 = vadd.f32 %v5220_v42, %v5832_v17 }
 0x583   : > { %2385 = vmatmul.f32.gmra.mxu2 %v2217_v34  ;;  %2626 = vmatmul.f32.gmra.mxu3 %v2491_v46  ;;  %v2766_v30 = vrot.slane %v2765_v61, 4 }
 0x585   : > { %v2767_v9 = vadd.f32 %v2766_v30, %v2765_v61 }
 0x586   : > { %v2338_v56 = vpop.f32.mrf.mxu2  ;;  %v2579_v53 = vpop.f32.mrf.mxu3 }
 0x587   : > { %v2339_v39 = vadd.f32 %v5290_v45, %v2338_v56  ;;  %v2580_v51 = vadd.f32 %v5378_v1, %v2579_v53  ;;  %v2768_v23 = vrot.slane %v2767_v9, 2 }
 0x589   : > { %v2492_v20 = vmax.f32 %v2339_v39, 0.0  ;;  %v2769_v46 = vadd.f32 %v2768_v23, %v2767_v9 }
 0x58b   : > { %2388 = vmatmul.f32.gmra.mxu2 %v2218_v19  ;;  %2629 = vmatmul.f32.gmra.mxu3 %v2492_v20  ;;  %v5833_v19 = vld [vmem:[#allocation45_spill] sm:$0xff]  ;;  %v2770_v20 = vrot.slane %v2769_v46, 1 }
 0x58c   : > { %v2220_v30 = vadd.f32 %v5225_v57, %v5833_v19 }
 0x58e   : > { %v2341_v24 = vpop.f32.mrf.mxu2  ;;  %v2582_v38 = vpop.f32.mrf.mxu3 }
 0x58f   : > { %v2342_v62 = vadd.f32 %v5290_v45, %v2341_v24  ;;  %v2583_v32 = vadd.f32 %v5378_v1, %v2582_v38 }
 0x591   : > { %v2493_v27 = vmax.f32 %v2342_v62, 0.0  ;;  %v2772_v34 = vadd.f32 %v2583_v32, %v2580_v51  ;;  %v2771_v51 = vadd.f32 %v2770_v20, %v2769_v46  ;;  %v5396_v62 = vld [vmem:[#allocation10 + $0x1] ss:$0 sm:$0xff] }
 0x593   : > { %v2773_v33 = vrot.slane %v2772_v34, 4  ;;  %2391 = vmatmul.f32.gmra.mxu2 %v2219_v5  ;;  %2632 = vmatmul.f32.gmra.mxu3 %v2493_v27 }
 0x595   : > { %v2774_v56 = vadd.f32 %v2773_v33, %v2772_v34  ;;  %v5834_v34 = vld [vmem:[#allocation42_spill] sm:$0xff] }
 0x596   : > { %v2344_v61 = vpop.f32.mrf.mxu2  ;;  %v2585_v39 = vpop.f32.mrf.mxu3  ;;  %v2221_v33 = vadd.f32 %v5232_v31, %v5834_v34 }
 0x597   : > { %v2775_v11 = vrot.slane %v2774_v56, 2  ;;  %v2345_v53 = vadd.f32 %v5290_v45, %v2344_v61  ;;  %v2586_v23 = vadd.f32 %v5378_v1, %v2585_v39 }
 0x599   : > { %v2776_v24 = vadd.f32 %v2775_v11, %v2774_v56  ;;  %v2494_v38 = vmax.f32 %v2345_v53, 0.0  ;;  %v2991_v56 = vadd.f32 %v5396_v62, %v2771_v51 }
 0x59b   : > { %v2777_v42 = vrot.slane %v2776_v24, 1  ;;  %2394 = vmatmul.f32.gmra.mxu2 %v2220_v30  ;;  %2635 = vmatmul.f32.gmra.mxu3 %v2494_v38 }
 0x59d   : > { %v2778_v32 = vadd.f32 %v2777_v42, %v2776_v24  ;;  %v5835_v42 = vld [vmem:[#allocation48_spill] sm:$0xff] }
 0x59e   : > { %v2347_v9 = vpop.f32.mrf.mxu2  ;;  %v2588_v17 = vpop.f32.mrf.mxu3 }
 0x59f   : > { %v2992_v5 = vadd.f32 %v5396_v62, %v2778_v32  ;;  %v2348_v27 = vadd.f32 %v5290_v45, %v2347_v9  ;;  %v2589_v57 = vadd.f32 %v5378_v1, %v2588_v17  ;;  %v2222_v32 = vadd.f32 %v5239_v21, %v5835_v42 }
 0x5a1   : > { %v3055_v61 = vrot.slane %v2992_v5, 7  ;;  %v2495_v46 = vmax.f32 %v2348_v27, 0.0  ;;  %v2779_v11 = vadd.f32 %v2589_v57, %v2586_v23 }
 0x5a3   : > { %v3056_v53 = vsel %vm1852_vm1, %v3055_v61, %v2991_v56  ;;  %v2780_v19 = vrot.slane %v2779_v11, 4  ;;  %2397 = vmatmul.f32.gmra.mxu2 %v2221_v33  ;;  %2638 = vmatmul.f32.gmra.mxu3 %v2495_v46  ;;  %v5836_v56 = vld [vmem:[#allocation44_spill] sm:$0xff] }
 0x5a4   : > { %v2223_v61 = vadd.f32 %v5246_v63, %v5836_v56 }
 0x5a5   : > { %v2781_v30 = vadd.f32 %v2780_v19, %v2779_v11 }
 0x5a6   : > { %v2350_v20 = vpop.f32.mrf.mxu2  ;;  %v2591_v39 = vpop.f32.mrf.mxu3 }
 0x5a7   : > { %v2782_v24 = vrot.slane %v2781_v30, 2  ;;  %v2351_v38 = vadd.f32 %v5290_v45, %v2350_v20  ;;  %v2592_v57 = vadd.f32 %v5378_v1, %v2591_v39 }
 0x5a9   : > { %v2783_v31 = vadd.f32 %v2782_v24, %v2781_v30  ;;  %v2496_v9 = vmax.f32 %v2351_v38, 0.0 }
 0x5ab   : > { %v2784_v51 = vrot.slane %v2783_v31, 1  ;;  %2400 = vmatmul.f32.gmra.mxu2 %v2222_v32  ;;  %2641 = vmatmul.f32.gmra.mxu3 %v2496_v9  ;;  %v5837_v32 = vld [vmem:[#allocation49_spill] sm:$0xff] }
 0x5ad   : > { %v2785_v17 = vadd.f32 %v2784_v51, %v2783_v31  ;;  %v2224_v31 = vadd.f32 %v5253_v60, %v5837_v32 }
 0x5ae   : > { %v2353_v5 = vpop.f32.mrf.mxu2  ;;  %v2594_v23 = vpop.f32.mrf.mxu3 }
 0x5af   : > { %v2993_v27 = vadd.f32 %v5396_v62, %v2785_v17  ;;  %v2354_v34 = vadd.f32 %v5290_v45, %v2353_v5  ;;  %v2595_v33 = vadd.f32 %v5378_v1, %v2594_v23 }
 0x5b1   : > { %v3057_v21 = vrot.slane %v2993_v27, 6  ;;  %v2497_v46 = vmax.f32 %v2354_v34, 0.0  ;;  %v2786_v11 = vadd.f32 %v2595_v33, %v2592_v57  ;;  %v5838_v57 = vld [vmem:[#allocation46_spill] sm:$0xff] }
 0x5b2   : > { %v2225_v34 = vadd.f32 %v5258_v37, %v5838_v57 }
 0x5b3   : > { %v3058_v19 = vsel %vm1855_vm2, %v3057_v21, %v3056_v53  ;;  %v2787_v30 = vrot.slane %v2786_v11, 4  ;;  %2403 = vmatmul.f32.gmra.mxu2 %v2223_v61  ;;  %2644 = vmatmul.f32.gmra.mxu3 %v2497_v46 }
 0x5b5   : > { %v2788_v20 = vadd.f32 %v2787_v30, %v2786_v11  ;;  %v5839_v11 = vld [vmem:[#allocation51_spill] sm:$0xff] }
 0x5b6   : > { %v2356_v24 = vpop.f32.mrf.mxu2  ;;  %v2597_v38 = vpop.f32.mrf.mxu3  ;;  %v2226_v30 = vadd.f32 %v5265_v7, %v5839_v11  ;;  %v5841_v7 = vld [vmem:[#allocation53_spill] sm:$0xff]  ;;  %v5842_v11 = vld [vmem:[#allocation54_spill] sm:$0xff] }
 0x5b7   : > { %v2789_v42 = vrot.slane %v2788_v20, 2  ;;  %v2357_v39 = vadd.f32 %v5290_v45, %v2356_v24 }
 0x5b9   : > { %v2790_v9 = vadd.f32 %v2789_v42, %v2788_v20  ;;  %v2498_v51 = vmax.f32 %v2357_v39, 0.0  ;;  %v5840_v39 = vld [vmem:[#allocation52_spill] sm:$0xff] }
 0x5bb   : > { %v2791_v63 = vrot.slane %v2790_v9, 1  ;;  %2406 = vmatmul.f32.gmra.mxu2 %v2224_v31  ;;  %2647 = vmatmul.f32.gmra.mxu3 %v2498_v51 }
 0x5bd   : > { %v2792_v17 = vadd.f32 %v2791_v63, %v2790_v9 }
 0x5be   : > { %v2359_v5 = vpop.f32.mrf.mxu2  ;;  %v2600_v53 = vpop.f32.mrf.mxu3 }
 0x5bf   : > { %v2994_v23 = vadd.f32 %v5396_v62, %v2792_v17  ;;  %v2360_v27 = vadd.f32 %v5290_v45, %v2359_v5  ;;  %v2601_v63 = vadd.f32 %v5378_v1, %v2600_v53  ;;  %v2228_v17 = vadd.f32 %v5279_v55, %v5841_v7 }
 0x5c1   : > { %v3059_v33 = vrot.slane %v2994_v23, 5  ;;  %v2499_v56 = vmax.f32 %v2360_v27, 0.0  ;;  %v2598_v27 = vadd.f32 %v5378_v1, %v2597_v38 }
 0x5c3   : > { %v5424_v61 = vsel %vm1858_vm3, %v3059_v33, %v3058_v19  ;;  %2409 = vmatmul.f32.gmra.mxu2 %v2225_v34  ;;  %2650 = vmatmul.f32.gmra.mxu3 %v2499_v56  ;;  %v2227_v19 = vadd.f32 %v5272_v8, %v5840_v39  ;;  %v2793_v8 = vadd.f32 %v2601_v63, %v2598_v27 }
 0x5c5   : > { %v2794_v55 = vrot.slane %v2793_v8, 4 }
 0x5c6   : > { %v2362_v60 = vpop.f32.mrf.mxu2  ;;  %v2603_v21 = vpop.f32.mrf.mxu3 }
 0x5c7   : > { %v2363_v46 = vadd.f32 %v5290_v45, %v2362_v60  ;;  %v2604_v57 = vadd.f32 %v5378_v1, %v2603_v21 }
 0x5c9   : > { %v2500_v20 = vmax.f32 %v2363_v46, 0.0 }
 0x5cb   : > { %2412 = vmatmul.f32.gmra.mxu2 %v2226_v30  ;;  %2653 = vmatmul.f32.gmra.mxu3 %v2500_v20  ;;  %v2229_v30 = vadd.f32 %v5286_v59, %v5842_v11 }
 0x5ce   : > { %v2365_v24 = vpop.f32.mrf.mxu2  ;;  %v2606_v42 = vpop.f32.mrf.mxu3 }
 0x5cf   : > { %v2366_v37 = vadd.f32 %v5290_v45, %v2365_v24  ;;  %v2607_v5 = vadd.f32 %v5378_v1, %v2606_v42  ;;  %v2795_v42 = vadd.f32 %v2794_v55, %v2793_v8 }
 0x5d1   : > { %v2501_v32 = vmax.f32 %v2366_v37, 0.0  ;;  %v2800_v34 = vadd.f32 %v2607_v5, %v2604_v57 }
 0x5d3   : > { %2415 = vmatmul.f32.gmra.mxu2 %v2227_v19  ;;  %2656 = vmatmul.f32.gmra.mxu3 %v2501_v32  ;;  %v2801_v20 = vrot.slane %v2800_v34, 4 }
 0x5d5   : > { %v2802_v37 = vadd.f32 %v2801_v20, %v2800_v34 }
 0x5d6   : > { %v2368_v31 = vpop.f32.mrf.mxu2  ;;  %v2609_v9 = vpop.f32.mrf.mxu3 }
 0x5d7   : > { %v2369_v51 = vadd.f32 %v5290_v45, %v2368_v31  ;;  %v2610_v60 = vadd.f32 %v5378_v1, %v2609_v9  ;;  %v2796_v9 = vrot.slane %v2795_v42, 2  ;;  %v2803_v63 = vrot.slane %v2802_v37, 2 }
 0x5d9   : > { %v2502_v23 = vmax.f32 %v2369_v51, 0.0  ;;  %v2230_v51 = vadd.f32 %v5292_v26, %v5087_v15  ;;  %v2804_v5 = vadd.f32 %v2803_v63, %v2802_v37  ;;  %v2231_v15 = vadd.f32 %v5297_v14, %v5073_v12 }
 0x5da   : > { %v2232_v12 = vadd.f32 %v5302_v44, %v5038_v16 }
 0x5db   : > { %2418 = vmatmul.f32.gmra.mxu2 %v2228_v17  ;;  %2659 = vmatmul.f32.gmra.mxu3 %v2502_v23  ;;  %v2797_v17 = vadd.f32 %v2796_v9, %v2795_v42  ;;  %v2805_v26 = vrot.slane %v2804_v5, 1 }
 0x5de   : > { %v2371_v33 = vpop.f32.mrf.mxu2  ;;  %v2612_v56 = vpop.f32.mrf.mxu3 }
 0x5df   : > { %v2372_v53 = vadd.f32 %v5290_v45, %v2371_v33  ;;  %v2613_v46 = vadd.f32 %v5378_v1, %v2612_v56  ;;  %v2798_v56 = vrot.slane %v2797_v17, 1 }
 0x5e1   : > { %v2503_v38 = vmax.f32 %v2372_v53, 0.0  ;;  %v2807_v24 = vadd.f32 %v2613_v46, %v2610_v60  ;;  %v2799_v11 = vadd.f32 %v2798_v56, %v2797_v17 }
 0x5e3   : > { %v2808_v21 = vrot.slane %v2807_v24, 4  ;;  %2421 = vmatmul.f32.gmra.mxu2 %v2229_v30  ;;  %2662 = vmatmul.f32.gmra.mxu3 %v2503_v38  ;;  %v2806_v30 = vadd.f32 %v2805_v26, %v2804_v5 }
 0x5e5   : > { %v2809_v39 = vadd.f32 %v2808_v21, %v2807_v24  ;;  %v2996_v14 = vadd.f32 %v5396_v62, %v2806_v30 }
 0x5e6   : > { %v2374_v19 = vpop.f32.mrf.mxu2  ;;  %v2615_v32 = vpop.f32.mrf.mxu3 }
 0x5e7   : > { %v2375_v31 = vadd.f32 %v5290_v45, %v2374_v19  ;;  %v2810_v59 = vrot.slane %v2809_v39, 2  ;;  %v2616_v8 = vadd.f32 %v5378_v1, %v2615_v32  ;;  %v3063_v63 = vrot.slane %v2996_v14, 3 }
 0x5e9   : > { %v2504_v7 = vmax.f32 %v2375_v31, 0.0  ;;  %v2811_v23 = vadd.f32 %v2810_v59, %v2809_v39  ;;  %v2995_v39 = vadd.f32 %v5396_v62, %v2799_v11 }
 0x5eb   : > { %2424 = vmatmul.f32.gmra.mxu2 %v2230_v51  ;;  %2665 = vmatmul.f32.gmra.mxu3 %v2504_v7  ;;  %v2812_v46 = vrot.slane %v2811_v23, 1  ;;  %v3061_v51 = vrot.slane %v2995_v39, 4 }
 0x5ed   : > { %v2813_v38 = vadd.f32 %v2812_v46, %v2811_v23 }
 0x5ee   : > { %v2377_v27 = vpop.f32.mrf.mxu2  ;;  %v2618_v57 = vpop.f32.mrf.mxu3 }
 0x5ef   : > { %v2378_v34 = vadd.f32 %v5290_v45, %v2377_v27  ;;  %v2619_v33 = vadd.f32 %v5378_v1, %v2618_v57  ;;  %v2997_v31 = vadd.f32 %v5396_v62, %v2813_v38  ;;  %v2233_v57 = vadd.f32 %v5307_v36, %v5029_v35 }
 0x5f0   : > { %v2234_v35 = vadd.f32 %v5312_v28, %v5044_v43 }
 0x5f1   : > { %v2505_v60 = vmax.f32 %v2378_v34, 0.0  ;;  %v2814_v53 = vadd.f32 %v2619_v33, %v2616_v8  ;;  %v3065_v59 = vrot.slane %v2997_v31, 2  ;;  %v3062_v8 = vsel %vm1861_vm4, %v3061_v51, %v5424_v61 }
 0x5f2   : > { %v3064_v34 = vsel %vm1864_vm5, %v3063_v63, %v3062_v8  ;;  %v2236_v51 = vadd.f32 %v5322_v41, %v5058_v18  ;;  %v2237_v18 = vadd.f32 %v5327_v50, %v5041_v0 }
 0x5f3   : > { %v2815_v55 = vrot.slane %v2814_v53, 4  ;;  %2427 = vmatmul.f32.gmra.mxu2 %v2231_v15  ;;  %2668 = vmatmul.f32.gmra.mxu3 %v2505_v60  ;;  %v3066_v26 = vsel %vm1867_vm6, %v3065_v59, %v3064_v34 }
 0x5f5   : > { %v2816_v20 = vadd.f32 %v2815_v55, %v2814_v53 }
 0x5f6   : > { %v2380_v24 = vpop.f32.mrf.mxu2  ;;  %v2621_v21 = vpop.f32.mrf.mxu3 }
 0x5f7   : > { %v2817_v42 = vrot.slane %v2816_v20, 2  ;;  %v2381_v37 = vadd.f32 %v5290_v45, %v2380_v24  ;;  %v2622_v16 = vadd.f32 %v5378_v1, %v2621_v21 }
 0x5f9   : > { %v2818_v19 = vadd.f32 %v2817_v42, %v2816_v20  ;;  %v2506_v32 = vmax.f32 %v2381_v37, 0.0  ;;  %v2235_v42 = vadd.f32 %v5317_v48, %v5032_v25 }
 0x5fb   : > { %v2819_v9 = vrot.slane %v2818_v19, 1  ;;  %2430 = vmatmul.f32.gmra.mxu2 %v2232_v12  ;;  %2671 = vmatmul.f32.gmra.mxu3 %v2506_v32 }
 0x5fd   : > { %v2820_v7 = vadd.f32 %v2819_v9, %v2818_v19 }
 0x5fe   : > { %v2383_v17 = vpop.f32.mrf.mxu2  ;;  %v2624_v5 = vpop.f32.mrf.mxu3 }
 0x5ff   : > { %v2998_v23 = vadd.f32 %v5396_v62, %v2820_v7  ;;  %v2384_v44 = vadd.f32 %v5290_v45, %v2383_v17  ;;  %v2625_v27 = vadd.f32 %v5378_v1, %v2624_v5 }
 0x601   : > { %v3067_v33 = vrot.slane %v2998_v23, 1  ;;  %v2507_v56 = vmax.f32 %v2384_v44, 0.0  ;;  %v2821_v15 = vadd.f32 %v2625_v27, %v2622_v16 }
 0x603   : > { %v3068_v60 = vsel %vm1870_vm7, %v3067_v33, %v3066_v26  ;;  %2433 = vmatmul.f32.gmra.mxu2 %v2233_v57  ;;  %2674 = vmatmul.f32.gmra.mxu3 %v2507_v56  ;;  %v2822_v36 = vrot.slane %v2821_v15, 4 }
 0x604   : > { %3368 = vst [vmem:[%s4648_s10 + $0x20] sm:$0xff] %v3068_v60 }
 0x605   : > { %v2823_v11 = vadd.f32 %v2822_v36, %v2821_v15 }
 0x606   : > { %v2386_v53 = vpop.f32.mrf.mxu2  ;;  %v2627_v46 = vpop.f32.mrf.mxu3 }
 0x607   : > { %v2387_v55 = vadd.f32 %v5290_v45, %v2386_v53  ;;  %v2628_v38 = vadd.f32 %v5378_v1, %v2627_v46  ;;  %v2824_v37 = vrot.slane %v2823_v11, 2 }
 0x609   : > { %v2508_v61 = vmax.f32 %v2387_v55, 0.0  ;;  %v2825_v28 = vadd.f32 %v2824_v37, %v2823_v11 }
 0x60b   : > { %2436 = vmatmul.f32.gmra.mxu2 %v2234_v35  ;;  %2677 = vmatmul.f32.gmra.mxu3 %v2508_v61  ;;  %v2826_v63 = vrot.slane %v2825_v28, 1  ;;  %v2238_v35 = vadd.f32 %v5332_v29, %v5066_v40 }
 0x60d   : > { %v2827_v48 = vadd.f32 %v2826_v63, %v2825_v28 }
 0x60e   : > { %v2389_v30 = vpop.f32.mrf.mxu2  ;;  %v2630_v20 = vpop.f32.mrf.mxu3 }
 0x60f   : > { %v2390_v24 = vadd.f32 %v5290_v45, %v2389_v30  ;;  %v2631_v21 = vadd.f32 %v5378_v1, %v2630_v20  ;;  %v2999_v41 = vadd.f32 %v5396_v62, %v2827_v48  ;;  %v2241_v48 = vadd.f32 %v5347_v58, %v5061_v47 }
 0x610   : > { %v2243_v58 = vadd.f32 %v5360_v4, %v5100_v6 }
 0x611   : > { %v2509_v39 = vmax.f32 %v2390_v24, 0.0  ;;  %v2828_v12 = vadd.f32 %v2631_v21, %v2628_v38 }
 0x613   : > { %v2829_v43 = vrot.slane %v2828_v12, 4  ;;  %2439 = vmatmul.f32.gmra.mxu2 %v2235_v42  ;;  %2680 = vmatmul.f32.gmra.mxu3 %v2509_v39  ;;  %v2239_v42 = vadd.f32 %v5337_v2, %v5047_v13 }
 0x615   : > { %v2830_v14 = vadd.f32 %v2829_v43, %v2828_v12 }
 0x616   : > { %v2392_v19 = vpop.f32.mrf.mxu2  ;;  %v2633_v32 = vpop.f32.mrf.mxu3 }
 0x617   : > { %v2831_v31 = vrot.slane %v2830_v14, 2  ;;  %v2393_v9 = vadd.f32 %v5290_v45, %v2392_v19  ;;  %v2634_v44 = vadd.f32 %v5378_v1, %v2633_v32 }
 0x619   : > { %v2832_v7 = vadd.f32 %v2831_v31, %v2830_v14  ;;  %v2510_v59 = vmax.f32 %v2393_v9, 0.0  ;;  %v2240_v31 = vadd.f32 %v5342_v49, %v5078_v54 }
 0x61b   : > { %v2833_v25 = vrot.slane %v2832_v7, 1  ;;  %2442 = vmatmul.f32.gmra.mxu2 %v2236_v51  ;;  %2683 = vmatmul.f32.gmra.mxu3 %v2510_v59 }
 0x61d   : > { %v2834_v17 = vadd.f32 %v2833_v25, %v2832_v7 }
 0x61e   : > { %v2395_v5 = vpop.f32.mrf.mxu2  ;;  %v2636_v23 = vpop.f32.mrf.mxu3 }
 0x61f   : > { %v3000_v16 = vadd.f32 %v5396_v62, %v2834_v17  ;;  %v2396_v27 = vadd.f32 %v5290_v45, %v2395_v5  ;;  %v2637_v57 = vadd.f32 %v5378_v1, %v2636_v23 }
 0x621   : > { %v3069_v8 = vrot.slane %v3000_v16, 7  ;;  %v2511_v34 = vmax.f32 %v2396_v27, 0.0  ;;  %v2835_v33 = vadd.f32 %v2637_v57, %v2634_v44  ;;  %v2242_v44 = vadd.f32 %v5353_v22, %v5097_v10  ;;  %v5843_v10 = vld [vmem:[#allocation57_spill] sm:$0xff] }
 0x622   : > { %v2244_v22 = vadd.f32 %v5365_v3, %v5843_v10 }
 0x623   : > { %v3070_v56 = vsel %vm1852_vm1, %v3069_v8, %v2999_v41  ;;  %v2836_v15 = vrot.slane %v2835_v33, 4  ;;  %2445 = vmatmul.f32.gmra.mxu2 %v2237_v18  ;;  %2686 = vmatmul.f32.gmra.mxu3 %v2511_v34 }
 0x625   : > { %v2837_v26 = vadd.f32 %v2836_v15, %v2835_v33 }
 0x626   : > { %v2398_v60 = vpop.f32.mrf.mxu2  ;;  %v2639_v53 = vpop.f32.mrf.mxu3 }
 0x627   : > { %v2838_v46 = vrot.slane %v2837_v26, 2  ;;  %v2399_v55 = vadd.f32 %v5290_v45, %v2398_v60  ;;  %v2640_v38 = vadd.f32 %v5378_v1, %v2639_v53 }
 0x629   : > { %v2839_v0 = vadd.f32 %v2838_v46, %v2837_v26  ;;  %v2512_v50 = vmax.f32 %v2399_v55, 0.0 }
 0x62b   : > { %v2840_v36 = vrot.slane %v2839_v0, 1  ;;  %2448 = vmatmul.f32.gmra.mxu2 %v2238_v35  ;;  %2689 = vmatmul.f32.gmra.mxu3 %v2512_v50 }
 0x62d   : > { %v2841_v61 = vadd.f32 %v2840_v36, %v2839_v0  ;;  %v5844_v36 = vld [vmem:[#allocation58_spill] sm:$0xff] }
 0x62e   : > { %v2401_v11 = vpop.f32.mrf.mxu2  ;;  %v2642_v30 = vpop.f32.mrf.mxu3 }
 0x62f   : > { %v3001_v20 = vadd.f32 %v5396_v62, %v2841_v61  ;;  %v2402_v24 = vadd.f32 %v5290_v45, %v2401_v11  ;;  %v2643_v21 = vadd.f32 %v5378_v1, %v2642_v30  ;;  %v2245_v61 = vadd.f32 %v5370_v52, %v5844_v36 }
 0x631   : > { %v3071_v40 = vrot.slane %v3001_v20, 6  ;;  %v2513_v29 = vmax.f32 %v2402_v24, 0.0  ;;  %v2842_v37 = vadd.f32 %v2643_v21, %v2640_v38 }
 0x633   : > { %v3072_v39 = vsel %vm1855_vm2, %v3071_v40, %v3070_v56  ;;  %v2843_v12 = vrot.slane %v2842_v37, 4  ;;  %2451 = vmatmul.f32.gmra.mxu2 %v2239_v42  ;;  %2692 = vmatmul.f32.gmra.mxu3 %v2513_v29 }
 0x635   : > { %v2844_v43 = vadd.f32 %v2843_v12, %v2842_v37 }
 0x636   : > { %v2404_v28 = vpop.f32.mrf.mxu2  ;;  %v2645_v14 = vpop.f32.mrf.mxu3 }
 0x637   : > { %v2845_v19 = vrot.slane %v2844_v43, 2  ;;  %v2405_v32 = vadd.f32 %v5290_v45, %v2404_v28  ;;  %v2646_v60 = vadd.f32 %v5378_v1, %v2645_v14 }
 0x639   : > { %v2846_v9 = vadd.f32 %v2845_v19, %v2844_v43  ;;  %v2514_v51 = vmax.f32 %v2405_v32, 0.0 }
 0x63b   : > { %v2847_v13 = vrot.slane %v2846_v9, 1  ;;  %2454 = vmatmul.f32.gmra.mxu2 %v2240_v31  ;;  %2695 = vmatmul.f32.gmra.mxu3 %v2514_v51 }
 0x63d   : > { %v2848_v2 = vadd.f32 %v2847_v13, %v2846_v9 }
 0x63e   : > { %v2407_v63 = vpop.f32.mrf.mxu2  ;;  %v2648_v7 = vpop.f32.mrf.mxu3 }
 0x63f   : > { %v3002_v59 = vadd.f32 %v5396_v62, %v2848_v2  ;;  %v2408_v25 = vadd.f32 %v5290_v45, %v2407_v63  ;;  %v2649_v56 = vadd.f32 %v5378_v1, %v2648_v7 }
 0x641   : > { %v3073_v17 = vrot.slane %v3002_v59, 5  ;;  %v2515_v5 = vmax.f32 %v2408_v25, 0.0  ;;  %v2849_v6 = vadd.f32 %v2649_v56, %v2646_v60 }
 0x643   : > { %v5507_v23 = vsel %vm1858_vm3, %v3073_v17, %v3072_v39  ;;  %2457 = vmatmul.f32.gmra.mxu2 %v2241_v48  ;;  %2698 = vmatmul.f32.gmra.mxu3 %v2515_v5  ;;  %v2850_v3 = vrot.slane %v2849_v6, 4 }
 0x645   : > { %v2851_v24 = vadd.f32 %v2850_v3, %v2849_v6 }
 0x646   : > { %v2410_v54 = vpop.f32.mrf.mxu2  ;;  %v2651_v49 = vpop.f32.mrf.mxu3 }
 0x647   : > { %v2411_v16 = vadd.f32 %v5290_v45, %v2410_v54  ;;  %v2652_v53 = vadd.f32 %v5378_v1, %v2651_v49  ;;  %v2852_v39 = vrot.slane %v2851_v24, 2 }
 0x649   : > { %v2516_v27 = vmax.f32 %v2411_v16, 0.0  ;;  %v2853_v14 = vadd.f32 %v2852_v39, %v2851_v24 }
 0x64b   : > { %2460 = vmatmul.f32.gmra.mxu2 %v2242_v44  ;;  %2701 = vmatmul.f32.gmra.mxu3 %v2516_v27  ;;  %v2854_v2 = vrot.slane %v2853_v14, 1 }
 0x64d   : > { %v2855_v17 = vadd.f32 %v2854_v2, %v2853_v14 }
 0x64e   : > { %v2413_v57 = vpop.f32.mrf.mxu2  ;;  %v2654_v18 = vpop.f32.mrf.mxu3 }
 0x64f   : > { %v2414_v47 = vadd.f32 %v5290_v45, %v2413_v57  ;;  %v2655_v15 = vadd.f32 %v5378_v1, %v2654_v18  ;;  %v5531_v57 = vld [vmem:[#allocation5 + $0x1] ss:$0 sm:$0xff]  ;;  %v3003_v18 = vadd.f32 %v5396_v62, %v2855_v17 }
 0x651   : > { %v2517_v41 = vmax.f32 %v2414_v47, 0.0  ;;  %v2856_v4 = vadd.f32 %v2655_v15, %v2652_v53 }
 0x653   : > { %2463 = vmatmul.f32.gmra.mxu2 %v2243_v58  ;;  %2704 = vmatmul.f32.gmra.mxu3 %v2517_v41  ;;  %v2857_v11 = vrot.slane %v2856_v4, 4 }
 0x655   : > { %v2858_v21 = vadd.f32 %v2857_v11, %v2856_v4 }
 0x656   : > { %v2416_v8 = vpop.f32.mrf.mxu2  ;;  %v2657_v34 = vpop.f32.mrf.mxu3 }
 0x657   : > { %v2417_v33 = vadd.f32 %v5290_v45, %v2416_v8  ;;  %v2658_v35 = vadd.f32 %v5378_v1, %v2657_v34  ;;  %v2859_v12 = vrot.slane %v2858_v21, 2 }
 0x659   : > { %v2518_v26 = vmax.f32 %v2417_v33, 0.0  ;;  %v2860_v52 = vadd.f32 %v2859_v12, %v2858_v21  ;;  %v3075_v33 = vrot.slane %v3003_v18, 4 }
 0x65b   : > { %2466 = vmatmul.f32.gmra.mxu2 %v2244_v22  ;;  %2707 = vmatmul.f32.gmra.mxu3 %v2518_v26  ;;  %v2861_v63 = vrot.slane %v2860_v52, 1 }
 0x65d   : > { %v2862_v5 = vadd.f32 %v2861_v63, %v2860_v52 }
 0x65e   : > { %v2419_v46 = vpop.f32.mrf.mxu2  ;;  %v2660_v55 = vpop.f32.mrf.mxu3 }
 0x65f   : > { %v2420_v0 = vadd.f32 %v5290_v45, %v2419_v46  ;;  %v2661_v50 = vadd.f32 %v5378_v1, %v2660_v55  ;;  %v3004_v47 = vadd.f32 %v5396_v62, %v2862_v5  ;;  %v3076_v46 = vsel %vm1861_vm4, %v3075_v33, %v5507_v23 }
 0x661   : > { %v2519_v30 = vmax.f32 %v2420_v0, 0.0  ;;  %v2863_v20 = vadd.f32 %v2661_v50, %v2658_v35  ;;  %v3077_v56 = vrot.slane %v3004_v47, 3 }
 0x663   : > { %v2864_v38 = vrot.slane %v2863_v20, 4  ;;  %2469 = vmatmul.f32.gmra.mxu2 %v2245_v61  ;;  %2710 = vmatmul.f32.gmra.mxu3 %v2519_v30  ;;  %v3078_v55 = vsel %vm1864_vm5, %v3077_v56, %v3076_v46 }
 0x665   : > { %v2865_v42 = vadd.f32 %v2864_v38, %v2863_v20 }
 0x666   : > { %v2422_v40 = vpop.f32.mrf.mxu2  ;;  %v2663_v29 = vpop.f32.mrf.mxu3 }
 0x667   : > { %v2423_v37 = vadd.f32 %v5290_v45, %v2422_v40  ;;  %v2866_v28 = vrot.slane %v2865_v42, 2  ;;  %v2664_v9 = vadd.f32 %v5378_v1, %v2663_v29 }
 0x669   : > { %v2520_v43 = vmax.f32 %v2423_v37, 0.0  ;;  %v2867_v19 = vadd.f32 %v2866_v28, %v2865_v42 }
 0x66b   : > { %2713 = vmatmul.f32.gmra.mxu3 %v2520_v43  ;;  %v2868_v25 = vrot.slane %v2867_v19, 1 }
 0x66d   : > { %v2869_v49 = vadd.f32 %v2868_v25, %v2867_v19 }
 0x66e   : > { %v2425_v32 = vpop.f32.mrf.mxu2  ;;  %v2666_v31 = vpop.f32.mrf.mxu3 }
 0x66f   : > { %v2426_v51 = vadd.f32 %v5290_v45, %v2425_v32  ;;  %v2667_v13 = vadd.f32 %v5378_v1, %v2666_v31  ;;  %v3005_v8 = vadd.f32 %v5396_v62, %v2869_v49 }
 0x671   : > { %v2521_v7 = vmax.f32 %v2426_v51, 0.0  ;;  %v2870_v59 = vadd.f32 %v2667_v13, %v2664_v9  ;;  %v3079_v22 = vrot.slane %v3005_v8, 2 }
 0x673   : > { %v2871_v48 = vrot.slane %v2870_v59, 4  ;;  %2716 = vmatmul.f32.gmra.mxu3 %v2521_v7  ;;  %v3080_v3 = vsel %vm1867_vm6, %v3079_v22, %v3078_v55 }
 0x675   : > { %v2872_v54 = vadd.f32 %v2871_v48, %v2870_v59 }
 0x676   : > { %v2428_v16 = vpop.f32.mrf.mxu2  ;;  %v2669_v44 = vpop.f32.mrf.mxu3 }
 0x677   : > { %v2873_v27 = vrot.slane %v2872_v54, 2  ;;  %v2429_v45 = vadd.f32 %v5531_v57, %v2428_v16  ;;  %v2670_v53 = vadd.f32 %v5378_v1, %v2669_v44 }
 0x679   : > { %v2874_v58 = vadd.f32 %v2873_v27, %v2872_v54  ;;  %v2522_v41 = vmax.f32 %v2429_v45, 0.0 }
 0x67b   : > { %v2875_v34 = vrot.slane %v2874_v58, 1  ;;  %2719 = vmatmul.f32.gmra.mxu3 %v2522_v41 }
 0x67d   : > { %v2876_v10 = vadd.f32 %v2875_v34, %v2874_v58 }
 0x67e   : > { %v2431_v15 = vpop.f32.mrf.mxu2  ;;  %v2672_v26 = vpop.f32.mrf.mxu3 }
 0x67f   : > { %v3006_v60 = vadd.f32 %v5396_v62, %v2876_v10  ;;  %v2432_v6 = vadd.f32 %v5531_v57, %v2431_v15  ;;  %v2673_v4 = vadd.f32 %v5378_v1, %v2672_v26 }
 0x681   : > { %v3081_v35 = vrot.slane %v3006_v60, 1  ;;  %v2523_v0 = vmax.f32 %v2432_v6, 0.0  ;;  %v2877_v50 = vadd.f32 %v2673_v4, %v2670_v53 }
 0x683   : > { %v3082_v36 = vsel %vm1870_vm7, %v3081_v35, %v3080_v3  ;;  %2722 = vmatmul.f32.gmra.mxu3 %v2523_v0  ;;  %v2878_v20 = vrot.slane %v2877_v50, 4 }
 0x684   : > { %3369 = vst [vmem:[%s4648_s10 + $0x28] sm:$0xff] %v3082_v36 }
 0x685   : > { %v2879_v24 = vadd.f32 %v2878_v20, %v2877_v50 }
 0x686   : > { %v2434_v61 = vpop.f32.mrf.mxu2  ;;  %v2675_v11 = vpop.f32.mrf.mxu3 }
 0x687   : > { %v2435_v30 = vadd.f32 %v5531_v57, %v2434_v61  ;;  %v2676_v42 = vadd.f32 %v5378_v1, %v2675_v11  ;;  %v2880_v37 = vrot.slane %v2879_v24, 2 }
 0x689   : > { %v2524_v38 = vmax.f32 %v2435_v30, 0.0  ;;  %v2881_v28 = vadd.f32 %v2880_v37, %v2879_v24 }
 0x68b   : > { %2725 = vmatmul.f32.gmra.mxu3 %v2524_v38  ;;  %v2882_v9 = vrot.slane %v2881_v28, 1 }
 0x68d   : > { %v2883_v63 = vadd.f32 %v2882_v9, %v2881_v28 }
 0x68e   : > { %v2437_v23 = vpop.f32.mrf.mxu2  ;;  %v2678_v21 = vpop.f32.mrf.mxu3 }
 0x68f   : > { %v2438_v40 = vadd.f32 %v5531_v57, %v2437_v23  ;;  %v2679_v29 = vadd.f32 %v5378_v1, %v2678_v21  ;;  %v3007_v49 = vadd.f32 %v5396_v62, %v2883_v63 }
 0x691   : > { %v2525_v39 = vmax.f32 %v2438_v40, 0.0  ;;  %v2884_v12 = vadd.f32 %v2679_v29, %v2676_v42 }
 0x693   : > { %v2885_v43 = vrot.slane %v2884_v12, 4  ;;  %2728 = vmatmul.f32.gmra.mxu3 %v2525_v39 }
 0x695   : > { %v2886_v14 = vadd.f32 %v2885_v43, %v2884_v12 }
 0x696   : > { %v2440_v52 = vpop.f32.mrf.mxu2  ;;  %v2681_v19 = vpop.f32.mrf.mxu3 }
 0x697   : > { %v2887_v32 = vrot.slane %v2886_v14, 2  ;;  %v2441_v31 = vadd.f32 %v5531_v57, %v2440_v52  ;;  %v2682_v17 = vadd.f32 %v5378_v1, %v2681_v19 }
 0x699   : > { %v2888_v51 = vadd.f32 %v2887_v32, %v2886_v14  ;;  %v2526_v13 = vmax.f32 %v2441_v31, 0.0 }
 0x69b   : > { %v2889_v2 = vrot.slane %v2888_v51, 1  ;;  %2731 = vmatmul.f32.gmra.mxu3 %v2526_v13  ;;  %v5573_v13 = vld [vmem:[#allocation8 + $0x1] ss:$0 sm:$0xff] }
 0x69d   : > { %v2890_v7 = vadd.f32 %v2889_v2, %v2888_v51 }
 0x69e   : > { %v2443_v59 = vpop.f32.mrf.mxu2  ;;  %v2684_v25 = vpop.f32.mrf.mxu3 }
 0x69f   : > { %v3008_v48 = vadd.f32 %v5396_v62, %v2890_v7  ;;  %v2444_v5 = vadd.f32 %v5531_v57, %v2443_v59  ;;  %v2685_v54 = vadd.f32 %v5378_v1, %v2684_v25 }
 0x6a1   : > { %v3083_v16 = vrot.slane %v3008_v48, 7  ;;  %v2527_v44 = vmax.f32 %v2444_v5, 0.0  ;;  %v2891_v27 = vadd.f32 %v2685_v54, %v2682_v17 }
 0x6a3   : > { %v3084_v45 = vsel %vm1852_vm1, %v3083_v16, %v3007_v49  ;;  %v2892_v18 = vrot.slane %v2891_v27, 4  ;;  %2734 = vmatmul.f32.gmra.mxu3 %v2527_v44 }
 0x6a5   : > { %v2893_v47 = vadd.f32 %v2892_v18, %v2891_v27 }
 0x6a6   : > { %v2446_v58 = vpop.f32.mrf.mxu2  ;;  %v2687_v41 = vpop.f32.mrf.mxu3 }
 0x6a7   : > { %v2894_v8 = vrot.slane %v2893_v47, 2  ;;  %v2447_v34 = vadd.f32 %v5531_v57, %v2446_v58  ;;  %v2688_v53 = vadd.f32 %v5378_v1, %v2687_v41 }
 0x6a9   : > { %v2895_v33 = vadd.f32 %v2894_v8, %v2893_v47  ;;  %v2528_v56 = vmax.f32 %v2447_v34, 0.0 }
 0x6ab   : > { %v2896_v10 = vrot.slane %v2895_v33, 1  ;;  %2737 = vmatmul.f32.gmra.mxu3 %v2528_v56 }
 0x6ad   : > { %v2897_v22 = vadd.f32 %v2896_v10, %v2895_v33 }
 0x6ae   : > { %v2449_v15 = vpop.f32.mrf.mxu2  ;;  %v2690_v26 = vpop.f32.mrf.mxu3 }
 0x6af   : > { %v3009_v60 = vadd.f32 %v5396_v62, %v2897_v22  ;;  %v2450_v6 = vadd.f32 %v5531_v57, %v2449_v15  ;;  %v2691_v4 = vadd.f32 %v5378_v1, %v2690_v26 }
 0x6b1   : > { %v3085_v46 = vrot.slane %v3009_v60, 6  ;;  %v2529_v55 = vmax.f32 %v2450_v6, 0.0  ;;  %v2898_v35 = vadd.f32 %v2691_v4, %v2688_v53 }
 0x6b3   : > { %v3086_v0 = vsel %vm1855_vm2, %v3085_v46, %v3084_v45  ;;  %v2899_v50 = vrot.slane %v2898_v35, 4  ;;  %2740 = vmatmul.f32.gmra.mxu3 %v2529_v55 }
 0x6b5   : > { %v2900_v3 = vadd.f32 %v2899_v50, %v2898_v35 }
 0x6b6   : > { %v2452_v36 = vpop.f32.mrf.mxu2  ;;  %v2693_v61 = vpop.f32.mrf.mxu3 }
 0x6b7   : > { %v2901_v11 = vrot.slane %v2900_v3, 2  ;;  %v2453_v30 = vadd.f32 %v5531_v57, %v2452_v36  ;;  %v2694_v59 = vadd.f32 %v5573_v13, %v2693_v61 }
 0x6b9   : > { %v2902_v20 = vadd.f32 %v2901_v11, %v2900_v3  ;;  %v2530_v38 = vmax.f32 %v2453_v30, 0.0 }
 0x6bb   : > { %v2903_v24 = vrot.slane %v2902_v20, 1  ;;  %2743 = vmatmul.f32.gmra.mxu3 %v2530_v38 }
 0x6bd   : > { %v2904_v23 = vadd.f32 %v2903_v24, %v2902_v20 }
 0x6be   : > { %v2455_v21 = vpop.f32.mrf.mxu2  ;;  %v2696_v1 = vpop.f32.mrf.mxu3 }
 0x6bf   : > { %v3010_v42 = vadd.f32 %v5396_v62, %v2904_v23  ;;  %v2456_v40 = vadd.f32 %v5531_v57, %v2455_v21  ;;  %v2697_v2 = vadd.f32 %v5573_v13, %v2696_v1  ;;  %v5585_v23 = vld [vmem:[#allocation10 + $0x1] ss:$0 sm:$0xff] }
 0x6c1   : > { %v3087_v29 = vrot.slane %v3010_v42, 5  ;;  %v2531_v37 = vmax.f32 %v2456_v40, 0.0  ;;  %v2905_v48 = vadd.f32 %v2697_v2, %v2694_v59 }
 0x6c3   : > { %v5568_v39 = vsel %vm1858_vm3, %v3087_v29, %v3086_v0  ;;  %2746 = vmatmul.f32.gmra.mxu3 %v2531_v37  ;;  %v2906_v27 = vrot.slane %v2905_v48, 4 }
 0x6c5   : > { %v2907_v41 = vadd.f32 %v2906_v27, %v2905_v48 }
 0x6c6   : > { %v2458_v12 = vpop.f32.mrf.mxu2  ;;  %v2699_v43 = vpop.f32.mrf.mxu3 }
 0x6c7   : > { %v2459_v28 = vadd.f32 %v5531_v57, %v2458_v12  ;;  %v2700_v25 = vadd.f32 %v5573_v13, %v2699_v43  ;;  %v2908_v22 = vrot.slane %v2907_v41, 2 }
 0x6c9   : > { %v2532_v14 = vmax.f32 %v2459_v28, 0.0  ;;  %v2909_v53 = vadd.f32 %v2908_v22, %v2907_v41 }
 0x6cb   : > { %2749 = vmatmul.f32.gmra.mxu3 %v2532_v14  ;;  %v2910_v0 = vrot.slane %v2909_v53, 1 }
 0x6cd   : > { %v2911_v11 = vadd.f32 %v2910_v0, %v2909_v53 }
 0x6ce   : > { %v2461_v52 = vpop.f32.mrf.mxu2  ;;  %v2702_v19 = vpop.f32.mrf.mxu3 }
 0x6cf   : > { %v2462_v32 = vadd.f32 %v5531_v57, %v2461_v52  ;;  %v2703_v63 = vadd.f32 %v5573_v13, %v2702_v19  ;;  %v3011_v21 = vadd.f32 %v5585_v23, %v2911_v11 }
 0x6d1   : > { %v2533_v31 = vmax.f32 %v2462_v32, 0.0  ;;  %v2912_v17 = vadd.f32 %v2703_v63, %v2700_v25  ;;  %v3089_v37 = vrot.slane %v3011_v21, 4 }
 0x6d3   : > { %2752 = vmatmul.f32.gmra.mxu3 %v2533_v31  ;;  %v2913_v45 = vrot.slane %v2912_v17, 4  ;;  %v3090_v31 = vsel %vm1861_vm4, %v3089_v37, %v5568_v39 }
 0x6d5   : > { %v2914_v8 = vadd.f32 %v2913_v45, %v2912_v17 }
 0x6d6   : > { %v2464_v62 = vpop.f32.mrf.mxu2  ;;  %v2705_v9 = vpop.f32.mrf.mxu3 }
 0x6d7   : > { %v2465_v51 = vadd.f32 %v5531_v57, %v2464_v62  ;;  %v2706_v49 = vadd.f32 %v5573_v13, %v2705_v9  ;;  %v2915_v15 = vrot.slane %v2914_v8, 2 }
 0x6d9   : > { %v2534_v7 = vmax.f32 %v2465_v51, 0.0  ;;  %v2916_v6 = vadd.f32 %v2915_v15, %v2914_v8 }
 0x6db   : > { %2755 = vmatmul.f32.gmra.mxu3 %v2534_v7  ;;  %v2917_v50 = vrot.slane %v2916_v6, 1 }
 0x6de   : > { %v2467_v5 = vpop.f32.mrf.mxu2  ;;  %v2708_v54 = vpop.f32.mrf.mxu3 }
 0x6df   : > { %v2468_v16 = vadd.f32 %v5531_v57, %v2467_v5  ;;  %v2709_v44 = vadd.f32 %v5573_v13, %v2708_v54 }
 0x6e1   : > { %v2535_v18 = vmax.f32 %v2468_v16, 0.0  ;;  %v2919_v47 = vadd.f32 %v2709_v44, %v2706_v49 }
 0x6e3   : > { %v2920_v58 = vrot.slane %v2919_v47, 4  ;;  %2758 = vmatmul.f32.gmra.mxu3 %v2535_v18 }
 0x6e5   : > { %v2921_v34 = vadd.f32 %v2920_v58, %v2919_v47 }
 0x6e6   : > { %v2470_v33 = vpop.f32.mrf.mxu2  ;;  %v2711_v56 = vpop.f32.mrf.mxu3 }
 0x6e7   : > { %v2471_v10 = vadd.f32 %v5531_v57, %v2470_v33  ;;  %v2922_v60 = vrot.slane %v2921_v34, 2  ;;  %v2712_v55 = vadd.f32 %v5573_v13, %v2711_v56  ;;  %v2918_v57 = vadd.f32 %v2917_v50, %v2916_v6 }
 0x6e9   : > { %v2536_v26 = vmax.f32 %v2471_v10, 0.0  ;;  %v2923_v4 = vadd.f32 %v2922_v60, %v2921_v34  ;;  %v3012_v1 = vadd.f32 %v5585_v23, %v2918_v57 }
 0x6eb   : > { %2761 = vmatmul.f32.gmra.mxu3 %v2536_v26  ;;  %v2924_v36 = vrot.slane %v2923_v4, 1  ;;  %v3091_v12 = vrot.slane %v3012_v1, 3 }
 0x6ed   : > { %v2925_v20 = vadd.f32 %v2924_v36, %v2923_v4  ;;  %v3092_v62 = vsel %vm1864_vm5, %v3091_v12, %v3090_v31 }
 0x6ee   : > { %v2714_v46 = vpop.f32.mrf.mxu3 }
 0x6ef   : > { %v2715_v35 = vadd.f32 %v5573_v13, %v2714_v46  ;;  %v3013_v40 = vadd.f32 %v5585_v23, %v2925_v20 }
 0x6f1   : > { %v2926_v3 = vadd.f32 %v2715_v35, %v2712_v55  ;;  %v3093_v28 = vrot.slane %v3013_v40, 2 }
 0x6f3   : > { %v2927_v61 = vrot.slane %v2926_v3, 4  ;;  %v3094_v2 = vsel %vm1867_vm6, %v3093_v28, %v3092_v62 }
 0x6f5   : > { %v2928_v30 = vadd.f32 %v2927_v61, %v2926_v3 }
 0x6f6   : > { %v2717_v38 = vpop.f32.mrf.mxu3 }
 0x6f7   : > { %v2929_v24 = vrot.slane %v2928_v30, 2  ;;  %v2718_v19 = vadd.f32 %v5573_v13, %v2717_v38 }
 0x6f9   : > { %v2930_v42 = vadd.f32 %v2929_v24, %v2928_v30 }
 0x6fb   : > { %v2931_v29 = vrot.slane %v2930_v42, 1 }
 0x6fd   : > { %v2932_v43 = vadd.f32 %v2931_v29, %v2930_v42 }
 0x6fe   : > { %v2720_v14 = vpop.f32.mrf.mxu3 }
 0x6ff   : > { %v3014_v52 = vadd.f32 %v5585_v23, %v2932_v43  ;;  %v2721_v32 = vadd.f32 %v5573_v13, %v2720_v14 }
 0x701   : > { %v3095_v9 = vrot.slane %v3014_v52, 1  ;;  %v2933_v51 = vadd.f32 %v2721_v32, %v2718_v19 }
 0x703   : > { %v3096_v63 = vsel %vm1870_vm7, %v3095_v9, %v3094_v2  ;;  %v2934_v59 = vrot.slane %v2933_v51, 4 }
 0x704   : > { %3370 = vst [vmem:[%s4648_s10 + $0x30] sm:$0xff] %v3096_v63 }
 0x705   : > { %v2935_v25 = vadd.f32 %v2934_v59, %v2933_v51 }
 0x706   : > { %v2723_v7 = vpop.f32.mrf.mxu3 }
 0x707   : > { %v2724_v17 = vadd.f32 %v5573_v13, %v2723_v7  ;;  %v2936_v54 = vrot.slane %v2935_v25, 2 }
 0x709   : > { %v2937_v16 = vadd.f32 %v2936_v54, %v2935_v25 }
 0x70b   : > { %v2938_v18 = vrot.slane %v2937_v16, 1 }
 0x70d   : > { %v2939_v41 = vadd.f32 %v2938_v18, %v2937_v16 }
 0x70e   : > { %v2726_v48 = vpop.f32.mrf.mxu3 }
 0x70f   : > { %v2727_v5 = vadd.f32 %v5573_v13, %v2726_v48  ;;  %v3015_v22 = vadd.f32 %v5585_v23, %v2939_v41 }
 0x711   : > { %v2940_v49 = vadd.f32 %v2727_v5, %v2724_v17 }
 0x713   : > { %v2941_v39 = vrot.slane %v2940_v49, 4 }
 0x715   : > { %v2942_v44 = vadd.f32 %v2941_v39, %v2940_v49 }
 0x716   : > { %v2729_v27 = vpop.f32.mrf.mxu3 }
 0x717   : > { %v2943_v45 = vrot.slane %v2942_v44, 2  ;;  %v2730_v56 = vadd.f32 %v5573_v13, %v2729_v27 }
 0x719   : > { %v2944_v47 = vadd.f32 %v2943_v45, %v2942_v44 }
 0x71b   : > { %v2945_v58 = vrot.slane %v2944_v47, 1 }
 0x71d   : > { %v2946_v8 = vadd.f32 %v2945_v58, %v2944_v47 }
 0x71e   : > { %v2732_v34 = vpop.f32.mrf.mxu3 }
 0x71f   : > { %v3016_v33 = vadd.f32 %v5585_v23, %v2946_v8  ;;  %v2733_v10 = vadd.f32 %v5573_v13, %v2732_v34 }
 0x721   : > { %v3097_v15 = vrot.slane %v3016_v33, 7  ;;  %v2947_v26 = vadd.f32 %v2733_v10, %v2730_v56 }
 0x723   : > { %v3098_v60 = vsel %vm1852_vm1, %v3097_v15, %v3015_v22  ;;  %v2948_v53 = vrot.slane %v2947_v26, 4 }
 0x725   : > { %v2949_v6 = vadd.f32 %v2948_v53, %v2947_v26 }
 0x726   : > { %v2735_v4 = vpop.f32.mrf.mxu3 }
 0x727   : > { %v2950_v46 = vrot.slane %v2949_v6, 2  ;;  %v2736_v36 = vadd.f32 %v5573_v13, %v2735_v4 }
 0x729   : > { %v2951_v55 = vadd.f32 %v2950_v46, %v2949_v6 }
 0x72b   : > { %v2952_v35 = vrot.slane %v2951_v55, 1 }
 0x72d   : > { %v2953_v0 = vadd.f32 %v2952_v35, %v2951_v55 }
 0x72e   : > { %v2738_v50 = vpop.f32.mrf.mxu3 }
 0x72f   : > { %v3017_v3 = vadd.f32 %v5585_v23, %v2953_v0  ;;  %v2739_v61 = vadd.f32 %v5573_v13, %v2738_v50 }
 0x731   : > { %v3099_v11 = vrot.slane %v3017_v3, 6  ;;  %v2954_v57 = vadd.f32 %v2739_v61, %v2736_v36 }
 0x733   : > { %v3100_v30 = vsel %vm1855_vm2, %v3099_v11, %v3098_v60  ;;  %v2955_v20 = vrot.slane %v2954_v57, 4 }
 0x735   : > { %v2956_v38 = vadd.f32 %v2955_v20, %v2954_v57 }
 0x736   : > { %v2741_v24 = vpop.f32.mrf.mxu3 }
 0x737   : > { %v2957_v21 = vrot.slane %v2956_v38, 2  ;;  %v2742_v31 = vadd.f32 %v5573_v13, %v2741_v24 }
 0x739   : > { %v2958_v1 = vadd.f32 %v2957_v21, %v2956_v38 }
 0x73b   : > { %v2959_v42 = vrot.slane %v2958_v1, 1 }
 0x73d   : > { %v2960_v40 = vadd.f32 %v2959_v42, %v2958_v1 }
 0x73e   : > { %v2744_v29 = vpop.f32.mrf.mxu3 }
 0x73f   : > { %v3018_v37 = vadd.f32 %v5585_v23, %v2960_v40  ;;  %v2745_v19 = vadd.f32 %v5573_v13, %v2744_v29 }
 0x741   : > { %v3101_v12 = vrot.slane %v3018_v37, 5  ;;  %v2961_v9 = vadd.f32 %v2745_v19, %v2742_v31 }
 0x743   : > { %v3102_v43 = vsel %vm1858_vm3, %v3101_v12, %v3100_v30  ;;  %v2962_v59 = vrot.slane %v2961_v9, 4 }
 0x745   : > { %v2963_v5 = vadd.f32 %v2962_v59, %v2961_v9 }
 0x746   : > { %v2747_v28 = vpop.f32.mrf.mxu3 }
 0x747   : > { %v2748_v62 = vadd.f32 %v5573_v13, %v2747_v28  ;;  %v2964_v16 = vrot.slane %v2963_v5, 2 }
 0x749   : > { %v2965_v45 = vadd.f32 %v2964_v16, %v2963_v5 }
 0x74b   : > { %v2966_v34 = vrot.slane %v2965_v45, 1 }
 0x74d   : > { %v2967_v15 = vadd.f32 %v2966_v34, %v2965_v45 }
 0x74e   : > { %v2750_v14 = vpop.f32.mrf.mxu3 }
 0x74f   : > { %v2751_v32 = vadd.f32 %v5573_v13, %v2750_v14  ;;  %v3019_v4 = vadd.f32 %v5585_v23, %v2967_v15 }
 0x751   : > { %v2968_v51 = vadd.f32 %v2751_v32, %v2748_v62  ;;  %v3103_v0 = vrot.slane %v3019_v4, 4 }
 0x753   : > { %v2969_v25 = vrot.slane %v2968_v51, 4  ;;  %v3104_v11 = vsel %vm1861_vm4, %v3103_v0, %v3102_v43 }
 0x755   : > { %v2970_v54 = vadd.f32 %v2969_v25, %v2968_v51 }
 0x756   : > { %v2753_v52 = vpop.f32.mrf.mxu3 }
 0x757   : > { %v2754_v63 = vadd.f32 %v5573_v13, %v2753_v52  ;;  %v2971_v44 = vrot.slane %v2970_v54, 2 }
 0x759   : > { %v2972_v18 = vadd.f32 %v2971_v44, %v2970_v54 }
 0x75b   : > { %v2973_v33 = vrot.slane %v2972_v18, 1 }
 0x75d   : > { %v2974_v26 = vadd.f32 %v2973_v33, %v2972_v18 }
 0x75e   : > { %v2756_v2 = vpop.f32.mrf.mxu3 }
 0x75f   : > { %v2757_v7 = vadd.f32 %v5573_v13, %v2756_v2  ;;  %v3020_v46 = vadd.f32 %v5585_v23, %v2974_v26 }
 0x761   : > { %v2975_v48 = vadd.f32 %v2757_v7, %v2754_v63  ;;  %v3105_v50 = vrot.slane %v3020_v46, 3 }
 0x763   : > { %v2976_v17 = vrot.slane %v2975_v48, 4  ;;  %v3106_v57 = vsel %vm1864_vm5, %v3105_v50, %v3104_v11 }
 0x765   : > { %v2977_v49 = vadd.f32 %v2976_v17, %v2975_v48 }
 0x766   : > { %v2759_v39 = vpop.f32.mrf.mxu3 }
 0x767   : > { %v2978_v27 = vrot.slane %v2977_v49, 2  ;;  %v2760_v41 = vadd.f32 %v5573_v13, %v2759_v39 }
 0x769   : > { %v2979_v47 = vadd.f32 %v2978_v27, %v2977_v49 }
 0x76b   : > { %v2980_v10 = vrot.slane %v2979_v47, 1 }
 0x76d   : > { %v2981_v53 = vadd.f32 %v2980_v10, %v2979_v47 }
 0x76e   : > { %v2762_v58 = vpop.f32.mrf.mxu3 }
 0x76f   : > { %v2763_v8 = vadd.f32 %v5573_v13, %v2762_v58  ;;  %v3021_v35 = vadd.f32 %v5585_v23, %v2981_v53 }
 0x771   : > { %v2982_v56 = vadd.f32 %v2763_v8, %v2760_v41  ;;  %v3107_v36 = vrot.slane %v3021_v35, 2 }
 0x773   : > { %v2983_v22 = vrot.slane %v2982_v56, 4  ;;  %v3108_v20 = vsel %vm1867_vm6, %v3107_v36, %v3106_v57 }
 0x775   : > { %v2984_v60 = vadd.f32 %v2983_v22, %v2982_v56 }
 0x777   : > { %v2985_v6 = vrot.slane %v2984_v60, 2 }
 0x779   : > { %v2986_v55 = vadd.f32 %v2985_v6, %v2984_v60 }
 0x77b   : > { %v2987_v13 = vrot.slane %v2986_v55, 1 }
 0x77d   : > { %v2988_v3 = vadd.f32 %v2987_v13, %v2986_v55 }
 0x77f   : > { %v3022_v61 = vadd.f32 %v5585_v23, %v2988_v3 }
 0x781   : > { %v3109_v30 = vrot.slane %v3022_v61, 1 }
 0x783   : > { %v3110_v38 = vsel %vm1870_vm7, %v3109_v30, %v3108_v20 }
 0x784   : > { %3371 = vst [vmem:[%s4648_s10 + $0x38] sm:$0xff] %v3110_v38 }
 0x785   : > { %s3379_s25 = sshll.u32 %s3856_s9, 5  ;;  %s3143_s19 = sshll.u32 %s4648_s10, 4  ;;  %s3144_s19 = int_to_ptr.vmem [resolvable:$true] %s3143_s19 }
 0x786   : > { %s3132_s6 = scalar_lea.hbm %s5675_s8, %s3379_s25  ;;  %s3783_s17 = smov 512  }
 0x787   : > { %s3145_s14 = sshll.u32 %s3132_s6, 4  ;;  %3400 = sst [smem:[#allocation13]] (%p3873_p5), %s3783_s17  ;;  %s3146_s14 = int_to_ptr.hbm [resolvable:$true] %s3145_s14 }
 0x788   : > { %s3784_s23 = smov 1024   ;;  %s3785_s26 = smov 4  }
 0x789   : > { %3401 = sst [smem:[#allocation13 + $0x1]] (%p3873_p5), %s3784_s23  ;;  %s3786_s9 = smov 128  }
 0x78a   : > { %3402 = sst [smem:[#allocation13 + $0x2]] (%p3873_p5), %s3785_s26  ;;  %s3787_s10 = smov 8  }
 0x78b   : > { %3403 = sst [smem:[#allocation13 + $0x3]] (%p3873_p5), %s3786_s9  ;;  %s3788_s13 = smov [#allocation12]  }
 0x78c   : > { %3404 = sst [smem:[#allocation13 + $0x4]] (%p3873_p5), %s3786_s9  ;;  %s3789_s24 = smov 0  }
 0x78d   : > { %3405 = sst [smem:[#allocation13 + $0x5]] (%p3873_p5), %s3787_s10 }
 0x78e   : > { %3406 = dma.general (%p3873_p5), %s3144_s19, 1024, %s3146_s14, %s3121_s21, %s3788_s13, [#allocation13], %s3789_s24, 0  }
 0x78f PF: > { %p3438_p0 = scmp.ge.s32.totalorder %s3774_s30, 2  ;;  %s3173_s12 = sand.u32 1, %s3762_s27  }
 0x790   : > { %s3174_s20 = scalar_lea.sflag [#allocation4], %s3173_s12 }
 0x791   : > { %p3425_p1 = pnand %p3438_p0, %p3877_p6 }
 0x793   : > { %p3426_p2 = pneg %p3425_p1 }
 0x795   : > { %3757 = dma.done.wait (%p3426_p2), %s3174_s20, 1024  }
 0x796   : > { %3759 = vsyncadd (%p3426_p2), %s3174_s20, 4294966272  ;;  %s5845_s22 = sld [smem:[#allocation18_spill]]  ;;  %p21_p3 = scmp.ge.s32.totalorder %s3860_s11, 4  }
 0x797   : > { %s5846_s27 = smov %s3766_s28  ;;  %s5847_s28 = smov %s3770_s29 }
 0x798   : > { %s5849_s30 = smov %s3860_s11  ;;  %23 = sbr.rel (!%p21_p3) target bundleno = 10 (0xa), region = 118 }
 0x79c   : > { %s5848_s29 = smov %s5845_s22 }
 0x79d   :  { %3180 = vsyncpa [#allocation3], 1 }
 0x79e   :  { %3182 = vsyncpa [#allocation3 + $0x1], 1 }
 0x79f   :  { %3183 = vsyncpa [#allocation6], 1 }
 0x7a0   :  { %3184 = vsyncpa [#allocation9], 1 }
 0x7a1   :  { %3185 = vsyncpa [#allocation4], 1 }
 0x7a2   :  { %3187 = vsyncpa [#allocation4 + $0x1], 1 }

</bundles_post_ra>
